<compile_context>
chip_gen: v6e
topology: v6e:2x2x1
jax: 0.10.0
libtpu: 0.0.40
codegen_flags: <defaults>
</compile_context>

<pallas_src>
import math

import jax
import jax.numpy as jnp
import numpy as np
from jax.experimental import pallas as pl
from jax.experimental.pallas import tpu as pltpu

_TAPS = ((0, 0), (0, 1), (1, 0), (1, 1))   # (di, dj) taps of a 2x2 kernel
_ROWS = 128                                # padded activation row count (>= B*16)


# ---------------------------------------------------------------------------
# Fused kernel: whole DQN forward in one invocation.
# ---------------------------------------------------------------------------
def _dqn_fused_kernel(x_ref, w1_ref, b1_ref, s2_ref, w2_ref, b2_ref,
                      s3_ref, w3_ref, b3_ref, sl_ref, wl_ref, bl_ref, o_ref):
    f32 = jnp.float32

    def conv_taps(act, sel_ref, w_ref):
        # sum_t gather(act, tap t) @ W_tap ; the "gather" is a constant 0/1
        # row-selection matmul, every contraction is exactly 128 wide.
        acc = None
        for t in range(4):
            patch = jnp.dot(sel_ref[t], act, preferred_element_type=f32)
            part = jnp.dot(patch, w_ref[t], preferred_element_type=f32)
            acc = part if acc is None else acc + part
        return acc

    # Conv2d(1, 64, 1x1) + folded BN + ReLU: pure VPU broadcast multiply-add.
    a1 = jnp.maximum(x_ref[...] * w1_ref[...] + b1_ref[...], 0.0)       # (128, 128)
    # Conv2d(64, 128, 2x2) + folded BN + ReLU.
    a2 = jnp.maximum(conv_taps(a1, s2_ref, w2_ref) + b2_ref[...], 0.0)  # (128, 128)
    # Conv2d(128, 128, 2x2) + folded BN + ReLU.
    a3 = jnp.maximum(conv_taps(a2, s3_ref, w3_ref) + b3_ref[...], 0.0)  # (128, 128)
    # Flatten (NCHW order folded into wl layout at init) + Linear(512, 32) + ReLU.
    out = conv_taps(a3, sl_ref, wl_ref)                                  # (B, 32)
    o_ref[...] = jnp.maximum(out + bl_ref[...], 0.0).astype(o_ref.dtype)


def _full_spec(shape):
    nd = len(shape)
    return pl.BlockSpec(shape, lambda i, nd=nd: (0,) * nd)


def dqn_forward(kp, x):
    """x: (B, 1, 4, 4) NCHW float32 -> (B, 32) float32."""
    B = x.shape[0]
    x_col = jnp.pad(x.reshape(B * 16, 1).astype(jnp.float32),
                    ((0, _ROWS - B * 16), (0, 0)))
    operands = (x_col, kp["w1"], kp["b1"], kp["sel2"], kp["w2"], kp["b2"],
                kp["sel3"], kp["w3"], kp["b3"], kp["sell"], kp["wl"], kp["bl"])
    return pl.pallas_call(
        _dqn_fused_kernel,
        out_shape=jax.ShapeDtypeStruct((B, 32), jnp.float32),
        grid=(1,),
        in_specs=[_full_spec(op.shape) for op in operands],
        out_specs=_full_spec((B, 32)),
        compiler_params=pltpu.CompilerParams(
            dimension_semantics=("arbitrary",)),
    )(*operands)


# ---------------------------------------------------------------------------
# One-time parameter packing: BN folding, weight re-layout, selection matrices.
# ---------------------------------------------------------------------------
def _selection_matrices(batch):
    """Constant 0/1 im2col row-selection matrices (depend only on batch size)."""
    assert batch * 16 <= _ROWS
    sel2 = np.zeros((4, _ROWS, _ROWS), np.float32)   # 4x4 -> 3x3 windows
    sel3 = np.zeros((4, _ROWS, _ROWS), np.float32)   # 3x3 -> 2x2 windows
    sell = np.zeros((4, batch, _ROWS), np.float32)   # NCHW flatten row picks
    for t, (di, dj) in enumerate(_TAPS):
        for b in range(batch):
            for i in range(3):
                for j in range(3):
                    sel2[t, b * 9 + i * 3 + j,
                         b * 16 + (i + di) * 4 + (j + dj)] = 1.0
            for i in range(2):
                for j in range(2):
                    sel3[t, b * 4 + i * 2 + j,
                         b * 9 + (i + di) * 3 + (j + dj)] = 1.0
    for p in range(4):
        for b in range(batch):
            sell[p, b, b * 4 + p] = 1.0
    return jnp.asarray(sel2), jnp.asarray(sel3), jnp.asarray(sell)


def pack_params(raw, batch_size):
    """Fold BN into weights/biases, re-lay-out and pad everything once."""
    assert batch_size * 16 <= _ROWS
    kp = {}
    # conv1 (1x1, Cin=1) folded: y = relu(x * w1 + b1); padded to 128 lanes.
    w1 = raw["w1"].reshape(64) * raw["s1"]
    b1 = raw["b1"] * raw["s1"] + raw["t1"]
    kp["w1"] = jnp.zeros((1, 128), jnp.float32).at[0, :64].set(w1)
    kp["b1"] = jnp.zeros((1, 128), jnp.float32).at[0, :64].set(b1)
    # conv2 folded: one (Cin=128-padded, Cout=128) matrix per 2x2 tap.
    w2_taps = []
    for (di, dj) in _TAPS:
        m = (raw["w2"][:, :, di, dj] * raw["s2"][:, None]).T        # (64, 128)
        w2_taps.append(jnp.zeros((128, 128), jnp.float32).at[:64, :].set(m))
    kp["w2"] = jnp.stack(w2_taps)                                   # (4, 128, 128)
    kp["b2"] = (raw["b2"] * raw["s2"] + raw["t2"]).reshape(1, 128)
    # conv3 folded: (128, 128) per tap.
    kp["w3"] = jnp.stack(
        [(raw["w3"][:, :, di, dj] * raw["s3"][:, None]).T for (di, dj) in _TAPS])
    kp["b3"] = (raw["b3"] * raw["s3"] + raw["t3"]).reshape(1, 128)
    # Linear: absorb PyTorch NCHW flatten order (k = c*4 + (i*2+j)) into a
    # per-spatial-position (128, 32) slab.
    kp["wl"] = jnp.transpose(raw["wl"].reshape(32, 128, 4), (2, 1, 0))
    kp["bl"] = raw["bl"].reshape(1, 32)
    # Constant im2col selection matrices.
    kp["sel2"], kp["sel3"], kp["sell"] = _selection_matrices(batch_size)
    return kp


# ---------------------------------------------------------------------------
# Raw parameter initialization (deterministic, PyTorch-like uniform bounds)
# ---------------------------------------------------------------------------
def init_params(key):
    ks = jax.random.split(key, 20)

    def u(k, shape, fan_in):
        bound = 1.0 / math.sqrt(fan_in)
        return jax.random.uniform(k, shape, jnp.float32, -bound, bound)

    eps = 1e-5
    params = {}

    # Conv1: (64, 1, 1, 1)
    params["w1"] = u(ks[0], (64, 1, 1, 1), 1)
    params["b1"] = u(ks[1], (64,), 1)
    g1 = 1.0 + 0.1 * jax.random.normal(ks[2], (64,), jnp.float32)
    be1 = 0.1 * jax.random.normal(ks[3], (64,), jnp.float32)
    m1 = 0.1 * jax.random.normal(ks[4], (64,), jnp.float32)
    v1 = jnp.abs(jax.random.normal(ks[5], (64,), jnp.float32)) + 1.0
    params["s1"] = g1 / jnp.sqrt(v1 + eps)
    params["t1"] = be1 - m1 * params["s1"]

    # Conv2: (128, 64, 2, 2)
    params["w2"] = u(ks[6], (128, 64, 2, 2), 64 * 4)
    params["b2"] = u(ks[7], (128,), 64 * 4)
    g2 = 1.0 + 0.1 * jax.random.normal(ks[8], (128,), jnp.float32)
    be2 = 0.1 * jax.random.normal(ks[9], (128,), jnp.float32)
    m2 = 0.1 * jax.random.normal(ks[10], (128,), jnp.float32)
    v2 = jnp.abs(jax.random.normal(ks[11], (128,), jnp.float32)) + 1.0
    params["s2"] = g2 / jnp.sqrt(v2 + eps)
    params["t2"] = be2 - m2 * params["s2"]

    # Conv3: (128, 128, 2, 2)
    params["w3"] = u(ks[12], (128, 128, 2, 2), 128 * 4)
    params["b3"] = u(ks[13], (128,), 128 * 4)
    g3 = 1.0 + 0.1 * jax.random.normal(ks[14], (128,), jnp.float32)
    be3 = 0.1 * jax.random.normal(ks[15], (128,), jnp.float32)
    m3 = 0.1 * jax.random.normal(ks[16], (128,), jnp.float32)
    v3 = jnp.abs(jax.random.normal(ks[17], (128,), jnp.float32)) + 1.0
    params["s3"] = g3 / jnp.sqrt(v3 + eps)
    params["t3"] = be3 - m3 * params["s3"]

    # Linear: (32, 512)
    params["wl"] = u(ks[18], (32, 512), 512)
    params["bl"] = u(ks[19], (32,), 512)
    return params


# ---------------------------------------------------------------------------
# Pure-JAX reference (same inference-mode folded BatchNorm) for validation.
# ---------------------------------------------------------------------------
def reference_forward(raw, x):
    def bn(y, s, t):
        return y * s[None, :, None, None] + t[None, :, None, None]

    def conv2x2(a, w, b):
        h, wd = a.shape[2] - 1, a.shape[3] - 1
        acc = b[None, :, None, None]
        for di in range(2):
            for dj in range(2):
                acc = acc + jnp.einsum("bcij,oc->boij",
                                       a[:, :, di:di + h, dj:dj + wd],
                                       w[:, :, di, dj])
        return acc

    a = x * raw["w1"].reshape(1, 64, 1, 1) + raw["b1"].reshape(1, 64, 1, 1)
    a = jnp.maximum(bn(a, raw["s1"], raw["t1"]), 0.0)
    a = jnp.maximum(bn(conv2x2(a, raw["w2"], raw["b2"]), raw["s2"], raw["t2"]), 0.0)
    a = jnp.maximum(bn(conv2x2(a, raw["w3"], raw["b3"]), raw["s3"], raw["t3"]), 0.0)
    flat = a.reshape(a.shape[0], -1)                     # NCHW flatten -> (B, 512)
    return jnp.maximum(flat @ raw["wl"].T + raw["bl"], 0.0)


if __name__ == "__main__":
    key = jax.random.PRNGKey(0)
    pkey, xkey = jax.random.split(key)

    batch = 2
    raw = init_params(pkey)
    kp = pack_params(raw, batch)

    # (B, 1, 4, 4) NCHW: in_features = 4*4 = 16, as in the module.
    x = jax.random.normal(xkey, (batch, 1, 4, 4), jnp.float32)

    fwd = jax.jit(dqn_forward)
    out = jax.block_until_ready(fwd(kp, x))

    assert out.shape == (batch, 32), out.shape
    assert bool(jnp.all(jnp.isfinite(out)))
    assert bool(jnp.all(out >= 0.0))          # final ReLU

    ref = reference_forward(raw, x)
    max_err = float(jnp.max(jnp.abs(out - ref)))
    assert bool(jnp.allclose(out, ref, rtol=5e-2, atol=5e-2)), max_err

    print("KERNEL_OK")
</pallas_src>

<mosaic_0001>
module attributes {stable_mosaic.version = 11 : i64} {
  func.func @_dqn_fused_kernel(%arg0: i32, %arg1: memref<128x1xf32, #tpu.memory_space<vmem>>, %arg2: memref<1x128xf32, #tpu.memory_space<vmem>>, %arg3: memref<1x128xf32, #tpu.memory_space<vmem>>, %arg4: memref<4x128x128xf32, #tpu.memory_space<vmem>>, %arg5: memref<4x128x128xf32, #tpu.memory_space<vmem>>, %arg6: memref<1x128xf32, #tpu.memory_space<vmem>>, %arg7: memref<4x128x128xf32, #tpu.memory_space<vmem>>, %arg8: memref<4x128x128xf32, #tpu.memory_space<vmem>>, %arg9: memref<1x128xf32, #tpu.memory_space<vmem>>, %arg10: memref<4x2x128xf32, #tpu.memory_space<vmem>>, %arg11: memref<4x128x32xf32, #tpu.memory_space<vmem>>, %arg12: memref<1x32xf32, #tpu.memory_space<vmem>>, %arg13: memref<2x32xf32, #tpu.memory_space<vmem>>) attributes {dimension_semantics = [#tpu.dimension_semantics<arbitrary>], iteration_bounds = array<i64: 1>, scalar_prefetch = 0 : i64, scratch_operands = 0 : i64, tpu.core_type = #tpu.core_type<tc>, window_params = [{pipeline_mode = #tpu.pipeline_mode<synchronous>, transform_indices = @transform_0, window_bounds = array<i64: 128, 1>}, {pipeline_mode = #tpu.pipeline_mode<synchronous>, transform_indices = @transform_1, window_bounds = array<i64: 1, 128>}, {pipeline_mode = #tpu.pipeline_mode<synchronous>, transform_indices = @transform_2, window_bounds = array<i64: 1, 128>}, {pipeline_mode = #tpu.pipeline_mode<synchronous>, transform_indices = @transform_3, window_bounds = array<i64: 4, 128, 128>}, {pipeline_mode = #tpu.pipeline_mode<synchronous>, transform_indices = @transform_4, window_bounds = array<i64: 4, 128, 128>}, {pipeline_mode = #tpu.pipeline_mode<synchronous>, transform_indices = @transform_5, window_bounds = array<i64: 1, 128>}, {pipeline_mode = #tpu.pipeline_mode<synchronous>, transform_indices = @transform_6, window_bounds = array<i64: 4, 128, 128>}, {pipeline_mode = #tpu.pipeline_mode<synchronous>, transform_indices = @transform_7, window_bounds = array<i64: 4, 128, 128>}, {pipeline_mode = #tpu.pipeline_mode<synchronous>, transform_indices = @transform_8, window_bounds = array<i64: 1, 128>}, {pipeline_mode = #tpu.pipeline_mode<synchronous>, transform_indices = @transform_9, window_bounds = array<i64: 4, 2, 128>}, {pipeline_mode = #tpu.pipeline_mode<synchronous>, transform_indices = @transform_10, window_bounds = array<i64: 4, 128, 32>}, {pipeline_mode = #tpu.pipeline_mode<synchronous>, transform_indices = @transform_11, window_bounds = array<i64: 1, 32>}, {pipeline_mode = #tpu.pipeline_mode<synchronous>, transform_indices = @transform_12, window_bounds = array<i64: 2, 32>}]} {
    %c0 = arith.constant 0 : index
    %c0_0 = arith.constant 0 : index
    %0 = vector.load %arg1[%c0, %c0_0] : memref<128x1xf32, #tpu.memory_space<vmem>>, vector<128x1xf32>
    %c0_1 = arith.constant 0 : index
    %c0_2 = arith.constant 0 : index
    %1 = vector.load %arg2[%c0_1, %c0_2] : memref<1x128xf32, #tpu.memory_space<vmem>>, vector<1x128xf32>
    %2 = vector.broadcast %0 : vector<128x1xf32> to vector<128x128xf32>
    %3 = vector.broadcast %1 : vector<1x128xf32> to vector<128x128xf32>
    %4 = arith.mulf %2, %3 : vector<128x128xf32>
    %c0_3 = arith.constant 0 : index
    %c0_4 = arith.constant 0 : index
    %5 = vector.load %arg3[%c0_3, %c0_4] : memref<1x128xf32, #tpu.memory_space<vmem>>, vector<1x128xf32>
    %6 = vector.broadcast %5 : vector<1x128xf32> to vector<128x128xf32>
    %7 = arith.addf %4, %6 : vector<128x128xf32>
    %cst = arith.constant 0.000000e+00 : f32
    %8 = vector.broadcast %cst : f32 to vector<128x128xf32>
    %9 = arith.maximumf %7, %8 : vector<128x128xf32>
    %c0_5 = arith.constant 0 : index
    %c0_6 = arith.constant 0 : index
    %c0_7 = arith.constant 0 : index
    %10 = vector.load %arg4[%c0_5, %c0_6, %c0_7] : memref<4x128x128xf32, #tpu.memory_space<vmem>>, vector<1x128x128xf32>
    %11 = vector.shape_cast %10 : vector<1x128x128xf32> to vector<128x128xf32>
    %cst_8 = arith.constant dense<0.000000e+00> : vector<128x128xf32>
    %12 = tpu.matmul %11, %9, %cst_8 {dimension_numbers = #tpu.dot_dimension_numbers<[1], [0], [0], [1], [0, 0, 1, 1], [], []>} : vector<128x128xf32>, vector<128x128xf32>, vector<128x128xf32> -> vector<128x128xf32>
    %c0_9 = arith.constant 0 : index
    %c0_10 = arith.constant 0 : index
    %c0_11 = arith.constant 0 : index
    %13 = vector.load %arg5[%c0_9, %c0_10, %c0_11] : memref<4x128x128xf32, #tpu.memory_space<vmem>>, vector<1x128x128xf32>
    %14 = vector.shape_cast %13 : vector<1x128x128xf32> to vector<128x128xf32>
    %cst_12 = arith.constant dense<0.000000e+00> : vector<128x128xf32>
    %15 = tpu.matmul %12, %14, %cst_12 {dimension_numbers = #tpu.dot_dimension_numbers<[1], [0], [0], [1], [0, 0, 1, 1], [], []>} : vector<128x128xf32>, vector<128x128xf32>, vector<128x128xf32> -> vector<128x128xf32>
    %c1 = arith.constant 1 : index
    %c0_13 = arith.constant 0 : index
    %c0_14 = arith.constant 0 : index
    %16 = vector.load %arg4[%c1, %c0_13, %c0_14] : memref<4x128x128xf32, #tpu.memory_space<vmem>>, vector<1x128x128xf32>
    %17 = vector.shape_cast %16 : vector<1x128x128xf32> to vector<128x128xf32>
    %cst_15 = arith.constant dense<0.000000e+00> : vector<128x128xf32>
    %18 = tpu.matmul %17, %9, %cst_15 {dimension_numbers = #tpu.dot_dimension_numbers<[1], [0], [0], [1], [0, 0, 1, 1], [], []>} : vector<128x128xf32>, vector<128x128xf32>, vector<128x128xf32> -> vector<128x128xf32>
    %c1_16 = arith.constant 1 : index
    %c0_17 = arith.constant 0 : index
    %c0_18 = arith.constant 0 : index
    %19 = vector.load %arg5[%c1_16, %c0_17, %c0_18] : memref<4x128x128xf32, #tpu.memory_space<vmem>>, vector<1x128x128xf32>
    %20 = vector.shape_cast %19 : vector<1x128x128xf32> to vector<128x128xf32>
    %cst_19 = arith.constant dense<0.000000e+00> : vector<128x128xf32>
    %21 = tpu.matmul %18, %20, %cst_19 {dimension_numbers = #tpu.dot_dimension_numbers<[1], [0], [0], [1], [0, 0, 1, 1], [], []>} : vector<128x128xf32>, vector<128x128xf32>, vector<128x128xf32> -> vector<128x128xf32>
    %22 = arith.addf %15, %21 : vector<128x128xf32>
    %c2 = arith.constant 2 : index
    %c0_20 = arith.constant 0 : index
    %c0_21 = arith.constant 0 : index
    %23 = vector.load %arg4[%c2, %c0_20, %c0_21] : memref<4x128x128xf32, #tpu.memory_space<vmem>>, vector<1x128x128xf32>
    %24 = vector.shape_cast %23 : vector<1x128x128xf32> to vector<128x128xf32>
    %cst_22 = arith.constant dense<0.000000e+00> : vector<128x128xf32>
    %25 = tpu.matmul %24, %9, %cst_22 {dimension_numbers = #tpu.dot_dimension_numbers<[1], [0], [0], [1], [0, 0, 1, 1], [], []>} : vector<128x128xf32>, vector<128x128xf32>, vector<128x128xf32> -> vector<128x128xf32>
    %c2_23 = arith.constant 2 : index
    %c0_24 = arith.constant 0 : index
    %c0_25 = arith.constant 0 : index
    %26 = vector.load %arg5[%c2_23, %c0_24, %c0_25] : memref<4x128x128xf32, #tpu.memory_space<vmem>>, vector<1x128x128xf32>
    %27 = vector.shape_cast %26 : vector<1x128x128xf32> to vector<128x128xf32>
    %cst_26 = arith.constant dense<0.000000e+00> : vector<128x128xf32>
    %28 = tpu.matmul %25, %27, %cst_26 {dimension_numbers = #tpu.dot_dimension_numbers<[1], [0], [0], [1], [0, 0, 1, 1], [], []>} : vector<128x128xf32>, vector<128x128xf32>, vector<128x128xf32> -> vector<128x128xf32>
    %29 = arith.addf %22, %28 : vector<128x128xf32>
    %c3 = arith.constant 3 : index
    %c0_27 = arith.constant 0 : index
    %c0_28 = arith.constant 0 : index
    %30 = vector.load %arg4[%c3, %c0_27, %c0_28] : memref<4x128x128xf32, #tpu.memory_space<vmem>>, vector<1x128x128xf32>
    %31 = vector.shape_cast %30 : vector<1x128x128xf32> to vector<128x128xf32>
    %cst_29 = arith.constant dense<0.000000e+00> : vector<128x128xf32>
    %32 = tpu.matmul %31, %9, %cst_29 {dimension_numbers = #tpu.dot_dimension_numbers<[1], [0], [0], [1], [0, 0, 1, 1], [], []>} : vector<128x128xf32>, vector<128x128xf32>, vector<128x128xf32> -> vector<128x128xf32>
    %c3_30 = arith.constant 3 : index
    %c0_31 = arith.constant 0 : index
    %c0_32 = arith.constant 0 : index
    %33 = vector.load %arg5[%c3_30, %c0_31, %c0_32] : memref<4x128x128xf32, #tpu.memory_space<vmem>>, vector<1x128x128xf32>
    %34 = vector.shape_cast %33 : vector<1x128x128xf32> to vector<128x128xf32>
    %cst_33 = arith.constant dense<0.000000e+00> : vector<128x128xf32>
    %35 = tpu.matmul %32, %34, %cst_33 {dimension_numbers = #tpu.dot_dimension_numbers<[1], [0], [0], [1], [0, 0, 1, 1], [], []>} : vector<128x128xf32>, vector<128x128xf32>, vector<128x128xf32> -> vector<128x128xf32>
    %36 = arith.addf %29, %35 : vector<128x128xf32>
    %c0_34 = arith.constant 0 : index
    %c0_35 = arith.constant 0 : index
    %37 = vector.load %arg6[%c0_34, %c0_35] : memref<1x128xf32, #tpu.memory_space<vmem>>, vector<1x128xf32>
    %38 = vector.broadcast %37 : vector<1x128xf32> to vector<128x128xf32>
    %39 = arith.addf %36, %38 : vector<128x128xf32>
    %cst_36 = arith.constant 0.000000e+00 : f32
    %40 = vector.broadcast %cst_36 : f32 to vector<128x128xf32>
    %41 = arith.maximumf %39, %40 : vector<128x128xf32>
    %c0_37 = arith.constant 0 : index
    %c0_38 = arith.constant 0 : index
    %c0_39 = arith.constant 0 : index
    %42 = vector.load %arg7[%c0_37, %c0_38, %c0_39] : memref<4x128x128xf32, #tpu.memory_space<vmem>>, vector<1x128x128xf32>
    %43 = vector.shape_cast %42 : vector<1x128x128xf32> to vector<128x128xf32>
    %cst_40 = arith.constant dense<0.000000e+00> : vector<128x128xf32>
    %44 = tpu.matmul %43, %41, %cst_40 {dimension_numbers = #tpu.dot_dimension_numbers<[1], [0], [0], [1], [0, 0, 1, 1], [], []>} : vector<128x128xf32>, vector<128x128xf32>, vector<128x128xf32> -> vector<128x128xf32>
    %c0_41 = arith.constant 0 : index
    %c0_42 = arith.constant 0 : index
    %c0_43 = arith.constant 0 : index
    %45 = vector.load %arg8[%c0_41, %c0_42, %c0_43] : memref<4x128x128xf32, #tpu.memory_space<vmem>>, vector<1x128x128xf32>
    %46 = vector.shape_cast %45 : vector<1x128x128xf32> to vector<128x128xf32>
    %cst_44 = arith.constant dense<0.000000e+00> : vector<128x128xf32>
    %47 = tpu.matmul %44, %46, %cst_44 {dimension_numbers = #tpu.dot_dimension_numbers<[1], [0], [0], [1], [0, 0, 1, 1], [], []>} : vector<128x128xf32>, vector<128x128xf32>, vector<128x128xf32> -> vector<128x128xf32>
    %c1_45 = arith.constant 1 : index
    %c0_46 = arith.constant 0 : index
    %c0_47 = arith.constant 0 : index
    %48 = vector.load %arg7[%c1_45, %c0_46, %c0_47] : memref<4x128x128xf32, #tpu.memory_space<vmem>>, vector<1x128x128xf32>
    %49 = vector.shape_cast %48 : vector<1x128x128xf32> to vector<128x128xf32>
    %cst_48 = arith.constant dense<0.000000e+00> : vector<128x128xf32>
    %50 = tpu.matmul %49, %41, %cst_48 {dimension_numbers = #tpu.dot_dimension_numbers<[1], [0], [0], [1], [0, 0, 1, 1], [], []>} : vector<128x128xf32>, vector<128x128xf32>, vector<128x128xf32> -> vector<128x128xf32>
    %c1_49 = arith.constant 1 : index
    %c0_50 = arith.constant 0 : index
    %c0_51 = arith.constant 0 : index
    %51 = vector.load %arg8[%c1_49, %c0_50, %c0_51] : memref<4x128x128xf32, #tpu.memory_space<vmem>>, vector<1x128x128xf32>
    %52 = vector.shape_cast %51 : vector<1x128x128xf32> to vector<128x128xf32>
    %cst_52 = arith.constant dense<0.000000e+00> : vector<128x128xf32>
    %53 = tpu.matmul %50, %52, %cst_52 {dimension_numbers = #tpu.dot_dimension_numbers<[1], [0], [0], [1], [0, 0, 1, 1], [], []>} : vector<128x128xf32>, vector<128x128xf32>, vector<128x128xf32> -> vector<128x128xf32>
    %54 = arith.addf %47, %53 : vector<128x128xf32>
    %c2_53 = arith.constant 2 : index
    %c0_54 = arith.constant 0 : index
    %c0_55 = arith.constant 0 : index
    %55 = vector.load %arg7[%c2_53, %c0_54, %c0_55] : memref<4x128x128xf32, #tpu.memory_space<vmem>>, vector<1x128x128xf32>
    %56 = vector.shape_cast %55 : vector<1x128x128xf32> to vector<128x128xf32>
    %cst_56 = arith.constant dense<0.000000e+00> : vector<128x128xf32>
    %57 = tpu.matmul %56, %41, %cst_56 {dimension_numbers = #tpu.dot_dimension_numbers<[1], [0], [0], [1], [0, 0, 1, 1], [], []>} : vector<128x128xf32>, vector<128x128xf32>, vector<128x128xf32> -> vector<128x128xf32>
    %c2_57 = arith.constant 2 : index
    %c0_58 = arith.constant 0 : index
    %c0_59 = arith.constant 0 : index
    %58 = vector.load %arg8[%c2_57, %c0_58, %c0_59] : memref<4x128x128xf32, #tpu.memory_space<vmem>>, vector<1x128x128xf32>
    %59 = vector.shape_cast %58 : vector<1x128x128xf32> to vector<128x128xf32>
    %cst_60 = arith.constant dense<0.000000e+00> : vector<128x128xf32>
    %60 = tpu.matmul %57, %59, %cst_60 {dimension_numbers = #tpu.dot_dimension_numbers<[1], [0], [0], [1], [0, 0, 1, 1], [], []>} : vector<128x128xf32>, vector<128x128xf32>, vector<128x128xf32> -> vector<128x128xf32>
    %61 = arith.addf %54, %60 : vector<128x128xf32>
    %c3_61 = arith.constant 3 : index
    %c0_62 = arith.constant 0 : index
    %c0_63 = arith.constant 0 : index
    %62 = vector.load %arg7[%c3_61, %c0_62, %c0_63] : memref<4x128x128xf32, #tpu.memory_space<vmem>>, vector<1x128x128xf32>
    %63 = vector.shape_cast %62 : vector<1x128x128xf32> to vector<128x128xf32>
    %cst_64 = arith.constant dense<0.000000e+00> : vector<128x128xf32>
    %64 = tpu.matmul %63, %41, %cst_64 {dimension_numbers = #tpu.dot_dimension_numbers<[1], [0], [0], [1], [0, 0, 1, 1], [], []>} : vector<128x128xf32>, vector<128x128xf32>, vector<128x128xf32> -> vector<128x128xf32>
    %c3_65 = arith.constant 3 : index
    %c0_66 = arith.constant 0 : index
    %c0_67 = arith.constant 0 : index
    %65 = vector.load %arg8[%c3_65, %c0_66, %c0_67] : memref<4x128x128xf32, #tpu.memory_space<vmem>>, vector<1x128x128xf32>
    %66 = vector.shape_cast %65 : vector<1x128x128xf32> to vector<128x128xf32>
    %cst_68 = arith.constant dense<0.000000e+00> : vector<128x128xf32>
    %67 = tpu.matmul %64, %66, %cst_68 {dimension_numbers = #tpu.dot_dimension_numbers<[1], [0], [0], [1], [0, 0, 1, 1], [], []>} : vector<128x128xf32>, vector<128x128xf32>, vector<128x128xf32> -> vector<128x128xf32>
    %68 = arith.addf %61, %67 : vector<128x128xf32>
    %c0_69 = arith.constant 0 : index
    %c0_70 = arith.constant 0 : index
    %69 = vector.load %arg9[%c0_69, %c0_70] : memref<1x128xf32, #tpu.memory_space<vmem>>, vector<1x128xf32>
    %70 = vector.broadcast %69 : vector<1x128xf32> to vector<128x128xf32>
    %71 = arith.addf %68, %70 : vector<128x128xf32>
    %cst_71 = arith.constant 0.000000e+00 : f32
    %72 = vector.broadcast %cst_71 : f32 to vector<128x128xf32>
    %73 = arith.maximumf %71, %72 : vector<128x128xf32>
    %c0_72 = arith.constant 0 : index
    %c0_73 = arith.constant 0 : index
    %c0_74 = arith.constant 0 : index
    %74 = vector.load %arg10[%c0_72, %c0_73, %c0_74] : memref<4x2x128xf32, #tpu.memory_space<vmem>>, vector<1x2x128xf32>
    %75 = vector.shape_cast %74 : vector<1x2x128xf32> to vector<2x128xf32>
    %cst_75 = arith.constant dense<0.000000e+00> : vector<2x128xf32>
    %76 = tpu.matmul %75, %73, %cst_75 {dimension_numbers = #tpu.dot_dimension_numbers<[1], [0], [0], [1], [0, 0, 1, 1], [], []>} : vector<2x128xf32>, vector<128x128xf32>, vector<2x128xf32> -> vector<2x128xf32>
    %c0_76 = arith.constant 0 : index
    %c0_77 = arith.constant 0 : index
    %c0_78 = arith.constant 0 : index
    %77 = vector.load %arg11[%c0_76, %c0_77, %c0_78] : memref<4x128x32xf32, #tpu.memory_space<vmem>>, vector<1x128x32xf32>
    %78 = vector.shape_cast %77 : vector<1x128x32xf32> to vector<128x32xf32>
    %cst_79 = arith.constant dense<0.000000e+00> : vector<2x32xf32>
    %79 = tpu.matmul %76, %78, %cst_79 {dimension_numbers = #tpu.dot_dimension_numbers<[1], [0], [0], [1], [0, 0, 1, 1], [], []>} : vector<2x128xf32>, vector<128x32xf32>, vector<2x32xf32> -> vector<2x32xf32>
    %c1_80 = arith.constant 1 : index
    %c0_81 = arith.constant 0 : index
    %c0_82 = arith.constant 0 : index
    %80 = vector.load %arg10[%c1_80, %c0_81, %c0_82] : memref<4x2x128xf32, #tpu.memory_space<vmem>>, vector<1x2x128xf32>
    %81 = vector.shape_cast %80 : vector<1x2x128xf32> to vector<2x128xf32>
    %cst_83 = arith.constant dense<0.000000e+00> : vector<2x128xf32>
    %82 = tpu.matmul %81, %73, %cst_83 {dimension_numbers = #tpu.dot_dimension_numbers<[1], [0], [0], [1], [0, 0, 1, 1], [], []>} : vector<2x128xf32>, vector<128x128xf32>, vector<2x128xf32> -> vector<2x128xf32>
    %c1_84 = arith.constant 1 : index
    %c0_85 = arith.constant 0 : index
    %c0_86 = arith.constant 0 : index
    %83 = vector.load %arg11[%c1_84, %c0_85, %c0_86] : memref<4x128x32xf32, #tpu.memory_space<vmem>>, vector<1x128x32xf32>
    %84 = vector.shape_cast %83 : vector<1x128x32xf32> to vector<128x32xf32>
    %cst_87 = arith.constant dense<0.000000e+00> : vector<2x32xf32>
    %85 = tpu.matmul %82, %84, %cst_87 {dimension_numbers = #tpu.dot_dimension_numbers<[1], [0], [0], [1], [0, 0, 1, 1], [], []>} : vector<2x128xf32>, vector<128x32xf32>, vector<2x32xf32> -> vector<2x32xf32>
    %86 = arith.addf %79, %85 : vector<2x32xf32>
    %c2_88 = arith.constant 2 : index
    %c0_89 = arith.constant 0 : index
    %c0_90 = arith.constant 0 : index
    %87 = vector.load %arg10[%c2_88, %c0_89, %c0_90] : memref<4x2x128xf32, #tpu.memory_space<vmem>>, vector<1x2x128xf32>
    %88 = vector.shape_cast %87 : vector<1x2x128xf32> to vector<2x128xf32>
    %cst_91 = arith.constant dense<0.000000e+00> : vector<2x128xf32>
    %89 = tpu.matmul %88, %73, %cst_91 {dimension_numbers = #tpu.dot_dimension_numbers<[1], [0], [0], [1], [0, 0, 1, 1], [], []>} : vector<2x128xf32>, vector<128x128xf32>, vector<2x128xf32> -> vector<2x128xf32>
    %c2_92 = arith.constant 2 : index
    %c0_93 = arith.constant 0 : index
    %c0_94 = arith.constant 0 : index
    %90 = vector.load %arg11[%c2_92, %c0_93, %c0_94] : memref<4x128x32xf32, #tpu.memory_space<vmem>>, vector<1x128x32xf32>
    %91 = vector.shape_cast %90 : vector<1x128x32xf32> to vector<128x32xf32>
    %cst_95 = arith.constant dense<0.000000e+00> : vector<2x32xf32>
    %92 = tpu.matmul %89, %91, %cst_95 {dimension_numbers = #tpu.dot_dimension_numbers<[1], [0], [0], [1], [0, 0, 1, 1], [], []>} : vector<2x128xf32>, vector<128x32xf32>, vector<2x32xf32> -> vector<2x32xf32>
    %93 = arith.addf %86, %92 : vector<2x32xf32>
    %c3_96 = arith.constant 3 : index
    %c0_97 = arith.constant 0 : index
    %c0_98 = arith.constant 0 : index
    %94 = vector.load %arg10[%c3_96, %c0_97, %c0_98] : memref<4x2x128xf32, #tpu.memory_space<vmem>>, vector<1x2x128xf32>
    %95 = vector.shape_cast %94 : vector<1x2x128xf32> to vector<2x128xf32>
    %cst_99 = arith.constant dense<0.000000e+00> : vector<2x128xf32>
    %96 = tpu.matmul %95, %73, %cst_99 {dimension_numbers = #tpu.dot_dimension_numbers<[1], [0], [0], [1], [0, 0, 1, 1], [], []>} : vector<2x128xf32>, vector<128x128xf32>, vector<2x128xf32> -> vector<2x128xf32>
    %c3_100 = arith.constant 3 : index
    %c0_101 = arith.constant 0 : index
    %c0_102 = arith.constant 0 : index
    %97 = vector.load %arg11[%c3_100, %c0_101, %c0_102] : memref<4x128x32xf32, #tpu.memory_space<vmem>>, vector<1x128x32xf32>
    %98 = vector.shape_cast %97 : vector<1x128x32xf32> to vector<128x32xf32>
    %cst_103 = arith.constant dense<0.000000e+00> : vector<2x32xf32>
    %99 = tpu.matmul %96, %98, %cst_103 {dimension_numbers = #tpu.dot_dimension_numbers<[1], [0], [0], [1], [0, 0, 1, 1], [], []>} : vector<2x128xf32>, vector<128x32xf32>, vector<2x32xf32> -> vector<2x32xf32>
    %100 = arith.addf %93, %99 : vector<2x32xf32>
    %c0_104 = arith.constant 0 : index
    %c0_105 = arith.constant 0 : index
    %101 = vector.load %arg12[%c0_104, %c0_105] : memref<1x32xf32, #tpu.memory_space<vmem>>, vector<1x32xf32>
    %102 = vector.broadcast %101 : vector<1x32xf32> to vector<2x32xf32>
    %103 = arith.addf %100, %102 : vector<2x32xf32>
    %cst_106 = arith.constant 0.000000e+00 : f32
    %104 = vector.broadcast %cst_106 : f32 to vector<2x32xf32>
    %105 = arith.maximumf %103, %104 : vector<2x32xf32>
    %c0_107 = arith.constant 0 : index
    %c0_108 = arith.constant 0 : index
    %106 = vector.load %arg13[%c0_107, %c0_108] : memref<2x32xf32, #tpu.memory_space<vmem>>, vector<2x32xf32>
    tpu.vector_store %arg13[%c0_107, %c0_108], %105 {strides = array<i32>} : memref<2x32xf32, #tpu.memory_space<vmem>>, vector<2x32xf32>,
    return
  }
  func.func @transform_0(%arg0: i32) -> (i32, i32) {
    %c0_i32 = arith.constant 0 : i32
    %c0_i32_0 = arith.constant 0 : i32
    %c0_i32_1 = arith.constant 0 : i32
    return %c0_i32, %c0_i32_0 : i32, i32
  }
  func.func @transform_1(%arg0: i32) -> (i32, i32) {
    %c0_i32 = arith.constant 0 : i32
    %c0_i32_0 = arith.constant 0 : i32
    %c0_i32_1 = arith.constant 0 : i32
    return %c0_i32, %c0_i32_0 : i32, i32
  }
  func.func @transform_2(%arg0: i32) -> (i32, i32) {
    %c0_i32 = arith.constant 0 : i32
    %c0_i32_0 = arith.constant 0 : i32
    %c0_i32_1 = arith.constant 0 : i32
    return %c0_i32, %c0_i32_0 : i32, i32
  }
  func.func @transform_3(%arg0: i32) -> (i32, i32, i32) {
    %c0_i32 = arith.constant 0 : i32
    %c0_i32_0 = arith.constant 0 : i32
    %c0_i32_1 = arith.constant 0 : i32
    %c0_i32_2 = arith.constant 0 : i32
    return %c0_i32, %c0_i32_0, %c0_i32_1 : i32, i32, i32
  }
  func.func @transform_4(%arg0: i32) -> (i32, i32, i32) {
    %c0_i32 = arith.constant 0 : i32
    %c0_i32_0 = arith.constant 0 : i32
    %c0_i32_1 = arith.constant 0 : i32
    %c0_i32_2 = arith.constant 0 : i32
    return %c0_i32, %c0_i32_0, %c0_i32_1 : i32, i32, i32
  }
  func.func @transform_5(%arg0: i32) -> (i32, i32) {
    %c0_i32 = arith.constant 0 : i32
    %c0_i32_0 = arith.constant 0 : i32
    %c0_i32_1 = arith.constant 0 : i32
    return %c0_i32, %c0_i32_0 : i32, i32
  }
  func.func @transform_6(%arg0: i32) -> (i32, i32, i32) {
    %c0_i32 = arith.constant 0 : i32
    %c0_i32_0 = arith.constant 0 : i32
    %c0_i32_1 = arith.constant 0 : i32
    %c0_i32_2 = arith.constant 0 : i32
    return %c0_i32, %c0_i32_0, %c0_i32_1 : i32, i32, i32
  }
  func.func @transform_7(%arg0: i32) -> (i32, i32, i32) {
    %c0_i32 = arith.constant 0 : i32
    %c0_i32_0 = arith.constant 0 : i32
    %c0_i32_1 = arith.constant 0 : i32
    %c0_i32_2 = arith.constant 0 : i32
    return %c0_i32, %c0_i32_0, %c0_i32_1 : i32, i32, i32
  }
  func.func @transform_8(%arg0: i32) -> (i32, i32) {
    %c0_i32 = arith.constant 0 : i32
    %c0_i32_0 = arith.constant 0 : i32
    %c0_i32_1 = arith.constant 0 : i32
    return %c0_i32, %c0_i32_0 : i32, i32
  }
  func.func @transform_9(%arg0: i32) -> (i32, i32, i32) {
    %c0_i32 = arith.constant 0 : i32
    %c0_i32_0 = arith.constant 0 : i32
    %c0_i32_1 = arith.constant 0 : i32
    %c0_i32_2 = arith.constant 0 : i32
    return %c0_i32, %c0_i32_0, %c0_i32_1 : i32, i32, i32
  }
  func.func @transform_10(%arg0: i32) -> (i32, i32, i32) {
    %c0_i32 = arith.constant 0 : i32
    %c0_i32_0 = arith.constant 0 : i32
    %c0_i32_1 = arith.constant 0 : i32
    %c0_i32_2 = arith.constant 0 : i32
    return %c0_i32, %c0_i32_0, %c0_i32_1 : i32, i32, i32
  }
  func.func @transform_11(%arg0: i32) -> (i32, i32) {
    %c0_i32 = arith.constant 0 : i32
    %c0_i32_0 = arith.constant 0 : i32
    %c0_i32_1 = arith.constant 0 : i32
    return %c0_i32, %c0_i32_0 : i32, i32
  }
  func.func @transform_12(%arg0: i32) -> (i32, i32) {
    %c0_i32 = arith.constant 0 : i32
    %c0_i32_0 = arith.constant 0 : i32
    %c0_i32_1 = arith.constant 0 : i32
    return %c0_i32, %c0_i32_0 : i32, i32
  }
}

</mosaic_0001>

<bundles_post_ra>
// kernel: dqn_forward.1
= control target key start
LH: loop header
LB: loop body
LE: loop exit
PB: predicated region body
PF: predicated region fallthrough
CT: control target
= control target key end

     0   :  { %17 = vsyncpa [#allocation3], 0  ;;  %s7030_s0 = inlined_call_operand.vmem [shape: f32[128,1], index: 0, kind: input, shape index: {}]   ;;  %s7031_s1 = inlined_call_operand.vmem [shape: f32[1,128], index: 1, kind: input, shape index: {}]   ;;  %s7032_s2 = inlined_call_operand.vmem [shape: f32[1,128], index: 2, kind: input, shape index: {}]   ;;  %s7033_s3 = inlined_call_operand.vmem [shape: f32[4,128,128], index: 3, kind: input, shape index: {}]   ;;  %s7034_s4 = inlined_call_operand.hbm [shape: f32[4,128,128], index: 4, kind: input, shape index: {}]   ;;  %s7035_s5 = inlined_call_operand.vmem [shape: f32[1,128], index: 5, kind: input, shape index: {}]   ;;  %s7036_s6 = inlined_call_operand.hbm [shape: f32[4,128,128], index: 6, kind: input, shape index: {}]   ;;  %s7037_s7 = inlined_call_operand.hbm [shape: f32[4,128,128], index: 7, kind: input, shape index: {}]   ;;  %s7038_s8 = inlined_call_operand.vmem [shape: f32[1,128], index: 8, kind: input, shape index: {}]   ;;  %s7039_s9 = inlined_call_operand.vmem [shape: f32[4,2,128], index: 9, kind: input, shape index: {}]   ;;  %s7040_s10 = inlined_call_operand.vmem [shape: f32[4,128,32], index: 10, kind: input, shape index: {}]   ;;  %s7041_s11 = inlined_call_operand.vmem [shape: f32[1,32], index: 11, kind: input, shape index: {}]   ;;  %s7042_s12 = inlined_call_operand.hbm [shape: f32[2,32], index: 12, kind: output, shape index: {}]  }
   0x1   :  { %18 = vsyncpa [#allocation6], 0 }
   0x2   :  { %19 = vsyncpa [#allocation4], 0  ;;  %s5659_s21 = smov [#allocation5]   ;;  %s5660_s23 = smov [#allocation2]  }
   0x3   :  { %s47_s22 = sshll.u32 %s5659_s21, 4  ;;  %s33_s24 = sshll.u32 %s5660_s23, 4  ;;  %s48_s22 = int_to_ptr.vmem [resolvable:$true] %s47_s22  ;;  %s34_s24 = int_to_ptr.vmem [resolvable:$true] %s33_s24 }
   0x4   :  { %s5581_s25 = scalar_lea.vmem %s48_s22, 8192  ;;  %p5586_p1 = scmp.lt.s32.totalorder %s48_s22, %s48_s22 }
   0x5   :  { %p5582_p0 = scmp.ne.s32.totalorder %s48_s22, %s5581_s25  ;;  %p5587_p2 = scmp.lt.s32.totalorder %s5581_s25, %s5581_s25 }
   0x7   :  { %p5588_p3 = por %p5587_p2, %p5586_p1 }
   0x9   :  { %p5589_p4 = pnand %p5588_p3, %p5582_p0 }
   0xb   :  { %5592 = shalt.err (!%p5589_p4)
}
   0xc   :  { %s5661_s26 = smov 128   ;;  %s5662_s27 = smov 8  }
   0xd   :  { %53 = dma.hbm_to_vmem [thread:$0]  %s7036_s6, 8192, %s48_s22, [#allocation6], %s5661_s26, %s5661_s26, %s5662_s27  }
   0xe   :  { %s5601_s30 = scalar_lea.vmem %s34_s24, 8192  ;;  %p5606_p6 = scmp.lt.s32.totalorder %s34_s24, %s34_s24 }
   0xf   :  { %p5602_p5 = scmp.ne.s32.totalorder %s34_s24, %s5601_s30  ;;  %p5607_p7 = scmp.lt.s32.totalorder %s5601_s30, %s5601_s30 }
  0x11   :  { %p5608_p8 = por %p5607_p7, %p5606_p6 }
  0x13   :  { %p5609_p9 = pnand %p5608_p8, %p5602_p5 }
  0x15   :  { %5612 = shalt.err (!%p5609_p9)
}
  0x16   :  { %39 = dma.hbm_to_vmem [thread:$0]  %s7034_s4, 8192, %s34_s24, [#allocation3], %s5661_s26, %s5661_s26, %s5662_s27  }
  0x17   :  { %s5663_s15 = smov [#allocation7]  }
  0x18   :  { %s59_s16 = sshll.u32 %s5663_s15, 4  ;;  %s60_s16 = int_to_ptr.vmem [resolvable:$true] %s59_s16 }
  0x19   :  { %s5621_s17 = scalar_lea.vmem %s60_s16, 8192  ;;  %p5626_p11 = scmp.lt.s32.totalorder %s60_s16, %s60_s16 }
  0x1a   :  { %p5622_p10 = scmp.ne.s32.totalorder %s60_s16, %s5621_s17  ;;  %p5627_p12 = scmp.lt.s32.totalorder %s5621_s17, %s5621_s17 }
  0x1c   :  { %p5628_p13 = por %p5627_p12, %p5626_p11 }
  0x1e   :  { %p5629_p0 = pnand %p5628_p13, %p5622_p10 }
  0x20   :  { %5632 = shalt.err (!%p5629_p0)
}
  0x21   :  { %65 = dma.hbm_to_vmem [thread:$0]  %s7037_s7, 8192, %s60_s16, [#allocation6], %s5661_s26, %s5661_s26, %s5662_s27  }
  0x22   :  { %5653 = dma.done.wait [#allocation3], 8192  }
  0x23   :  { %5654 = vsyncadd [#allocation3], 4294959104 }
  0x24   :  { %5655 = dma.done.wait [#allocation6], 16384  }
  0x25   :  { %5656 = vsyncadd [#allocation6], 4294950912  ;;  %v5664_v0 = vmov 0   ;;  %v98_v1 = vld [vmem:[%s7030_s0 + $0x78] sm:$0xff]  ;;  %v96_v2 = vld [vmem:[%s7030_s0 + $0x68] sm:$0xff]  ;;  %vm5666_vm0 = vmmov 0  }
  0x26   :  { %5572 = vset.pattern.permute.xlu1 %v5664_v0  ;;  %5571 = vset.pattern.permute.xlu0 %v5664_v0  ;;  %v97_v3 = vld [vmem:[%s7030_s0 + $0x70] sm:$0xff]  ;;  %v95_v4 = vld [vmem:[%s7030_s0 + $0x60] sm:$0xff]  ;;  %v94_v5 = vld [vmem:[%s7030_s0 + $0x58] sm:$0xff]  ;;  %vm3616_vm1 = vcmask 254976  }
  0x27   :  { %177 = vperm.xlu0 %5571, %v98_v1   ;;  %167 = vperm.xlu1 %5572, %v96_v2   ;;  %v93_v6 = vld [vmem:[%s7030_s0 + $0x50] sm:$0xff]  ;;  %v92_v7 = vld [vmem:[%s7030_s0 + $0x48] sm:$0xff]  ;;  %v91_v8 = vld [vmem:[%s7030_s0 + $0x40] sm:$0xff] }
  0x28   :  { %v90_v9 = vld [vmem:[%s7030_s0 + $0x38] sm:$0xff]  ;;  %v89_v10 = vld [vmem:[%s7030_s0 + $0x30] sm:$0xff]  ;;  %v88_v11 = vld [vmem:[%s7030_s0 + $0x28] sm:$0xff] }
  0x29   :  { %v87_v12 = vld [vmem:[%s7030_s0 + $0x20] sm:$0xff]  ;;  %v86_v13 = vld [vmem:[%s7030_s0 + $0x18] sm:$0xff]  ;;  %v85_v14 = vld [vmem:[%s7030_s0 + $0x10] sm:$0xff] }
  0x2a   :  { %v84_v15 = vld [vmem:[%s7030_s0 + $0x8] sm:$0xff]  ;;  %v83_v16 = vld [vmem:[%s7030_s0] sm:$0xff] }
  0x2b   :  { %172 = vperm.xlu0 %5571, %v97_v3   ;;  %162 = vperm.xlu1 %5572, %v95_v4   ;;  %v241_v17 = vld [vmem:[%s7033_s3] sm:$0xff] }
  0x2c   :  { %v3636_v18 = vld [vmem:[%s7033_s3 + $0x80] sm:$0xff]  ;;  %4418 = vmatprep.mubr.f32.mxu0 %v241_v17 }
  0x2d   :  { %4474 = vmatprep.mubr.f32.mxu1 %v3636_v18  ;;  %v5799_v19 = vld [vmem:[%s7031_s1] ss:$0 sm:$0xff] }
  0x2e   :  { %v5804_v20 = vld [vmem:[%s7032_s2] ss:$0 sm:$0xff] }
  0x2f   :  { %157 = vperm.xlu0 %5571, %v94_v5   ;;  %152 = vperm.xlu1 %5572, %v93_v6  }
  0x33   :  { %147 = vperm.xlu0 %5571, %v92_v7   ;;  %142 = vperm.xlu1 %5572, %v91_v8  }
  0x37   :  { %137 = vperm.xlu0 %5571, %v90_v9   ;;  %132 = vperm.xlu1 %5572, %v89_v10  }
  0x3b   :  { %127 = vperm.xlu0 %5571, %v88_v11   ;;  %122 = vperm.xlu1 %5572, %v87_v12  }
  0x3f   :  { %117 = vperm.xlu0 %5571, %v86_v13   ;;  %112 = vperm.xlu1 %5572, %v85_v14  }
  0x43   :  { %107 = vperm.xlu0 %5571, %v84_v15   ;;  %102 = vperm.xlu1 %5572, %v83_v16  }
  0xa2   :  { %v178_v21 = vpop.permute.xlu0 %177  ;;  %v168_v22 = vpop.permute.xlu1 %167 }
  0xa3   :  { %v201_v23 = vmul.f32 %v5799_v19, %v178_v21  ;;  %v199_v25 = vmul.f32 %v5799_v19, %v168_v22  ;;  %v3637_v22 = vld [vmem:[%s7033_s3 + $0x88] sm:$0xff] }
  0xa5   :  { %v224_v24 = vadd.f32 %v5804_v20, %v201_v23  ;;  %v222_v31 = vadd.f32 %v5804_v20, %v199_v25  ;;  %v596_v23 = vld [vmem:[#allocation2 + $0xf8] sm:$0xff]  ;;  %v3638_v25 = vld [vmem:[%s7033_s3 + $0x90] sm:$0xff] }
  0xa6   :  { %v173_v26 = vpop.permute.xlu0 %172  ;;  %v163_v27 = vpop.permute.xlu1 %162 }
  0xa7   :  { %v5809_v28 = vmax.f32 %v224_v24, 0.0  ;;  %v200_v29 = vmul.f32 %v5799_v19, %v173_v26  ;;  %v198_v30 = vmul.f32 %v5799_v19, %v163_v27  ;;  %v5824_v39 = vmax.f32 %v222_v31, 0.0  ;;  %v243_v24 = vld [vmem:[%s7033_s3 + $0x10] sm:$0xff]  ;;  %v5946_v27 = vld [vmem:[#allocation2 + $0x78] sm:$0xff]  ;;  %v594_v31 = vld [vmem:[#allocation2 + $0xe8] sm:$0xff] }
  0xa8   :  { %v595_v26 = vld [vmem:[#allocation2 + $0xf0] sm:$0xff] }
  0xa9   :  { %v223_v32 = vadd.f32 %v5804_v20, %v200_v29  ;;  %4386 = vmatprep.subr.mxu0 %v5809_v28  ;;  %4442 = vmatprep.subr.mxu1 %v5809_v28  ;;  %v221_v36 = vadd.f32 %v5804_v20, %v198_v30  ;;  %v3639_v29 = vld [vmem:[%s7033_s3 + $0x98] sm:$0xff] }
  0xaa   :  { %4387 = vmatpush3.msra.mxu0 %v5809_v28  ;;  %4443 = vmatpush3.msra.mxu1 %v5809_v28  ;;  %v158_v33 = vpop.permute.xlu0 %157  ;;  %v153_v34 = vpop.permute.xlu1 %152  ;;  %v244_v30 = vld [vmem:[%s7033_s3 + $0x18] sm:$0xff] }
  0xab   :  { %v5819_v35 = vmax.f32 %v223_v32, 0.0  ;;  %v197_v37 = vmul.f32 %v5799_v19, %v158_v33  ;;  %v196_v38 = vmul.f32 %v5799_v19, %v153_v34  ;;  %v5831_v43 = vmax.f32 %v221_v36, 0.0  ;;  %v245_v32 = vld [vmem:[%s7033_s3 + $0x20] sm:$0xff]  ;;  %v3641_v36 = vld [vmem:[%s7033_s3 + $0xa8] sm:$0xff] }
  0xac   :  { %v593_v33 = vld [vmem:[#allocation2 + $0xe0] sm:$0xff] }
  0xad   :  { %v220_v40 = vadd.f32 %v5804_v20, %v197_v37  ;;  %4388 = vmatprep.subr.mxu0 %v5819_v35  ;;  %4444 = vmatprep.subr.mxu1 %v5819_v35  ;;  %v219_v44 = vadd.f32 %v5804_v20, %v196_v38  ;;  %v3640_v34 = vld [vmem:[%s7033_s3 + $0xa0] sm:$0xff]  ;;  %v246_v37 = vld [vmem:[%s7033_s3 + $0x28] sm:$0xff]  ;;  %v592_v38 = vld [vmem:[#allocation2 + $0xd8] sm:$0xff] }
  0xae   :  { %4389 = vmatpush3.msra.mxu0 %v5819_v35  ;;  %4445 = vmatpush3.msra.mxu1 %v5819_v35  ;;  %v148_v41 = vpop.permute.xlu0 %147  ;;  %v143_v42 = vpop.permute.xlu1 %142 }
  0xaf   :  { %v195_v45 = vmul.f32 %v5799_v19, %v148_v41  ;;  %v194_v46 = vmul.f32 %v5799_v19, %v143_v42  ;;  %4390 = vmatprep.subr.mxu0 %v5824_v39  ;;  %4446 = vmatprep.subr.mxu1 %v5824_v39  ;;  %v5840_v47 = vmax.f32 %v220_v40, 0.0  ;;  %v5847_v51 = vmax.f32 %v219_v44, 0.0  ;;  %v247_v40 = vld [vmem:[%s7033_s3 + $0x30] sm:$0xff]  ;;  %v3643_v44 = vld [vmem:[%s7033_s3 + $0xb8] sm:$0xff] }
  0xb0   :  { %4391 = vmatpush3.msra.mxu0 %v5824_v39  ;;  %4447 = vmatpush3.msra.mxu1 %v5824_v39  ;;  %v591_v41 = vld [vmem:[#allocation2 + $0xd0] sm:$0xff] }
  0xb1   :  { %v218_v48 = vadd.f32 %v5804_v20, %v195_v45  ;;  %4392 = vmatprep.subr.mxu0 %v5831_v43  ;;  %4448 = vmatprep.subr.mxu1 %v5831_v43  ;;  %v217_v52 = vadd.f32 %v5804_v20, %v194_v46  ;;  %v3642_v42 = vld [vmem:[%s7033_s3 + $0xb0] sm:$0xff]  ;;  %v248_v45 = vld [vmem:[%s7033_s3 + $0x38] sm:$0xff]  ;;  %v590_v46 = vld [vmem:[#allocation2 + $0xc8] sm:$0xff] }
  0xb2   :  { %4393 = vmatpush3.msra.mxu0 %v5831_v43  ;;  %4449 = vmatpush3.msra.mxu1 %v5831_v43  ;;  %v138_v49 = vpop.permute.xlu0 %137  ;;  %v133_v50 = vpop.permute.xlu1 %132 }
  0xb3   :  { %v193_v53 = vmul.f32 %v5799_v19, %v138_v49  ;;  %v192_v54 = vmul.f32 %v5799_v19, %v133_v50  ;;  %4394 = vmatprep.subr.mxu0 %v5840_v47  ;;  %4450 = vmatprep.subr.mxu1 %v5840_v47  ;;  %v5856_v55 = vmax.f32 %v218_v48, 0.0  ;;  %v5863_v59 = vmax.f32 %v217_v52, 0.0  ;;  %v249_v48 = vld [vmem:[%s7033_s3 + $0x40] sm:$0xff]  ;;  %v3645_v52 = vld [vmem:[%s7033_s3 + $0xc8] sm:$0xff] }
  0xb4   :  { %4395 = vmatpush3.msra.mxu0 %v5840_v47  ;;  %4451 = vmatpush3.msra.mxu1 %v5840_v47  ;;  %v589_v49 = vld [vmem:[#allocation2 + $0xc0] sm:$0xff] }
  0xb5   :  { %v216_v56 = vadd.f32 %v5804_v20, %v193_v53  ;;  %4396 = vmatprep.subr.mxu0 %v5847_v51  ;;  %4452 = vmatprep.subr.mxu1 %v5847_v51  ;;  %v215_v60 = vadd.f32 %v5804_v20, %v192_v54  ;;  %v3644_v50 = vld [vmem:[%s7033_s3 + $0xc0] sm:$0xff]  ;;  %v250_v53 = vld [vmem:[%s7033_s3 + $0x48] sm:$0xff]  ;;  %v588_v54 = vld [vmem:[#allocation2 + $0xb8] sm:$0xff] }
  0xb6   :  { %4397 = vmatpush3.msra.mxu0 %v5847_v51  ;;  %4453 = vmatpush3.msra.mxu1 %v5847_v51  ;;  %v128_v57 = vpop.permute.xlu0 %127  ;;  %v123_v58 = vpop.permute.xlu1 %122 }
  0xb7   :  { %v191_v61 = vmul.f32 %v5799_v19, %v128_v57  ;;  %v190_v62 = vmul.f32 %v5799_v19, %v123_v58  ;;  %4398 = vmatprep.subr.mxu0 %v5856_v55  ;;  %4454 = vmatprep.subr.mxu1 %v5856_v55  ;;  %v5872_v63 = vmax.f32 %v216_v56, 0.0  ;;  %v5879_v3 = vmax.f32 %v215_v60, 0.0  ;;  %v251_v56 = vld [vmem:[%s7033_s3 + $0x50] sm:$0xff]  ;;  %v3647_v60 = vld [vmem:[%s7033_s3 + $0xd8] sm:$0xff] }
  0xb8   :  { %4399 = vmatpush3.msra.mxu0 %v5856_v55  ;;  %4455 = vmatpush3.msra.mxu1 %v5856_v55  ;;  %v587_v57 = vld [vmem:[#allocation2 + $0xb0] sm:$0xff] }
  0xb9   :  { %v214_v0 = vadd.f32 %v5804_v20, %v191_v61  ;;  %4400 = vmatprep.subr.mxu0 %v5863_v59  ;;  %4456 = vmatprep.subr.mxu1 %v5863_v59  ;;  %v213_v4 = vadd.f32 %v5804_v20, %v190_v62  ;;  %v3646_v58 = vld [vmem:[%s7033_s3 + $0xd0] sm:$0xff]  ;;  %v252_v61 = vld [vmem:[%s7033_s3 + $0x58] sm:$0xff]  ;;  %v586_v62 = vld [vmem:[#allocation2 + $0xa8] sm:$0xff] }
  0xba   :  { %4401 = vmatpush3.msra.mxu0 %v5863_v59  ;;  %4457 = vmatpush3.msra.mxu1 %v5863_v59  ;;  %v118_v1 = vpop.permute.xlu0 %117  ;;  %v113_v2 = vpop.permute.xlu1 %112 }
  0xbb   :  { %v189_v5 = vmul.f32 %v5799_v19, %v118_v1  ;;  %v188_v6 = vmul.f32 %v5799_v19, %v113_v2  ;;  %4402 = vmatprep.subr.mxu0 %v5872_v63  ;;  %4458 = vmatprep.subr.mxu1 %v5872_v63  ;;  %v5888_v7 = vmax.f32 %v214_v0, 0.0  ;;  %v5895_v11 = vmax.f32 %v213_v4, 0.0  ;;  %v253_v0 = vld [vmem:[%s7033_s3 + $0x60] sm:$0xff]  ;;  %v3649_v4 = vld [vmem:[%s7033_s3 + $0xe8] sm:$0xff] }
  0xbc   :  { %4403 = vmatpush3.msra.mxu0 %v5872_v63  ;;  %4459 = vmatpush3.msra.mxu1 %v5872_v63  ;;  %v585_v1 = vld [vmem:[#allocation2 + $0xa0] sm:$0xff] }
  0xbd   :  { %v212_v8 = vadd.f32 %v5804_v20, %v189_v5  ;;  %4404 = vmatprep.subr.mxu0 %v5879_v3  ;;  %4460 = vmatprep.subr.mxu1 %v5879_v3  ;;  %v211_v12 = vadd.f32 %v5804_v20, %v188_v6  ;;  %v3648_v2 = vld [vmem:[%s7033_s3 + $0xe0] sm:$0xff]  ;;  %v254_v5 = vld [vmem:[%s7033_s3 + $0x68] sm:$0xff]  ;;  %v584_v6 = vld [vmem:[#allocation2 + $0x98] sm:$0xff] }
  0xbe   :  { %4405 = vmatpush3.msra.mxu0 %v5879_v3  ;;  %4461 = vmatpush3.msra.mxu1 %v5879_v3  ;;  %v108_v9 = vpop.permute.xlu0 %107  ;;  %v103_v10 = vpop.permute.xlu1 %102 }
  0xbf   :  { %v187_v13 = vmul.f32 %v5799_v19, %v108_v9  ;;  %v186_v14 = vmul.f32 %v5799_v19, %v103_v10  ;;  %4406 = vmatprep.subr.mxu0 %v5888_v7  ;;  %4462 = vmatprep.subr.mxu1 %v5888_v7  ;;  %v5904_v15 = vmax.f32 %v212_v8, 0.0  ;;  %v5911_v17 = vmax.f32 %v211_v12, 0.0  ;;  %v255_v8 = vld [vmem:[%s7033_s3 + $0x70] sm:$0xff]  ;;  %v3651_v12 = vld [vmem:[%s7033_s3 + $0xf8] sm:$0xff] }
  0xc0   :  { %4407 = vmatpush3.msra.mxu0 %v5888_v7  ;;  %4463 = vmatpush3.msra.mxu1 %v5888_v7  ;;  %v583_v9 = vld [vmem:[#allocation2 + $0x90] sm:$0xff] }
  0xc1   :  { %v210_v16 = vadd.f32 %v5804_v20, %v187_v13  ;;  %4408 = vmatprep.subr.mxu0 %v5895_v11  ;;  %4464 = vmatprep.subr.mxu1 %v5895_v11  ;;  %v209_v18 = vadd.f32 %v5804_v20, %v186_v14  ;;  %v242_v20 = vld [vmem:[%s7033_s3 + $0x8] sm:$0xff]  ;;  %v3650_v10 = vld [vmem:[%s7033_s3 + $0xf0] sm:$0xff]  ;;  %v256_v13 = vld [vmem:[%s7033_s3 + $0x78] sm:$0xff] }
  0xc2   :  { %4409 = vmatpush3.msra.mxu0 %v5895_v11  ;;  %4465 = vmatpush3.msra.mxu1 %v5895_v11  ;;  %v582_v14 = vld [vmem:[#allocation2 + $0x88] sm:$0xff] }
  0xc3   :  { %4410 = vmatprep.subr.mxu0 %v5904_v15  ;;  %4466 = vmatprep.subr.mxu1 %v5904_v15  ;;  %v5918_v19 = vmax.f32 %v210_v16, 0.0  ;;  %v5924_v21 = vmax.f32 %v209_v18, 0.0  ;;  %v581_v16 = vld [vmem:[#allocation2 + $0x80] sm:$0xff]  ;;  %v416_v18 = vld [vmem:[#allocation2 + $0x70] sm:$0xff] }
  0xc4   :  { %4411 = vmatpush3.msra.mxu0 %v5904_v15  ;;  %4467 = vmatpush3.msra.mxu1 %v5904_v15 }
  0xc5   :  { %4412 = vmatprep.subr.mxu0 %v5911_v17  ;;  %4468 = vmatprep.subr.mxu1 %v5911_v17 }
  0xc6   :  { %4413 = vmatpush3.msra.mxu0 %v5911_v17  ;;  %4469 = vmatpush3.msra.mxu1 %v5911_v17 }
  0xc7   :  { %4414 = vmatprep.subr.mxu0 %v5918_v19  ;;  %4470 = vmatprep.subr.mxu1 %v5918_v19 }
  0xc8   :  { %4415 = vmatpush3.msra.mxu0 %v5918_v19  ;;  %4471 = vmatpush3.msra.mxu1 %v5918_v19 }
  0xc9   :  { %4416 = vmatprep.subr.mxu0 %v5924_v21  ;;  %4472 = vmatprep.subr.mxu1 %v5924_v21 }
  0xca   :  { %4417 = vmatpush3.msra.mxu0 %v5924_v21  ;;  %4473 = vmatpush3.msra.mxu1 %v5924_v21 }
  0xcb   :  { %4419 = vmatmul.mubr.f32.vlgmr.msra.gmra.mxu0 %v242_v20  ;;  %4475 = vmatmul.mubr.f32.vlgmr.msra.gmra.mxu1 %v3637_v22  ;;  %v415_v20 = vld [vmem:[#allocation2 + $0x68] sm:$0xff]  ;;  %v414_v22 = vld [vmem:[#allocation2 + $0x60] sm:$0xff] }
  0xcc   :  { %4498 = vmatprep.subr.mxu0 %v596_v23  ;;  %4421 = vmatprep.mubr.f32.mxu0 %v243_v24  ;;  %v412_v24 = vld [vmem:[#allocation2 + $0x50] sm:$0xff] }
  0xcd   :  { %4499 = vmatpush3.msra.mxu0 %v596_v23  ;;  %4477 = vmatprep.mubr.f32.mxu1 %v3638_v25  ;;  %v413_v23 = vld [vmem:[#allocation2 + $0x58] sm:$0xff]  ;;  %v411_v25 = vld [vmem:[#allocation2 + $0x48] sm:$0xff] }
  0xce   :  { %4500 = vmatprep.subr.mxu0 %v595_v26  ;;  %4554 = vmatprep.subr.mxu1 %v5946_v27 }
  0xcf   :  { %4501 = vmatpush3.msra.mxu0 %v595_v26  ;;  %4478 = vmatmul.mubr.f32.gmra.mxu1 %v3639_v29  ;;  %v410_v26 = vld [vmem:[#allocation2 + $0x40] sm:$0xff]  ;;  %v408_v29 = vld [vmem:[#allocation2 + $0x30] sm:$0xff] }
  0xd0   :  { %4422 = vmatmul.mubr.f32.gmra.mxu0 %v244_v30  ;;  %4502 = vmatprep.subr.mxu0 %v594_v31  ;;  %v407_v30 = vld [vmem:[#allocation2 + $0x28] sm:$0xff] }
  0xd1   :  { %4503 = vmatpush3.msra.mxu0 %v594_v31  ;;  %4424 = vmatprep.mubr.f32.mxu0 %v245_v32  ;;  %v406_v31 = vld [vmem:[#allocation2 + $0x20] sm:$0xff]  ;;  %v405_v32 = vld [vmem:[#allocation2 + $0x18] sm:$0xff] }
  0xd2   :  { %4504 = vmatprep.subr.mxu0 %v593_v33  ;;  %4480 = vmatprep.mubr.f32.mxu1 %v3640_v34  ;;  %v403_v34 = vld [vmem:[#allocation2 + $0x8] sm:$0xff] }
  0xd3   :  { %4505 = vmatpush3.msra.mxu0 %v593_v33  ;;  %4481 = vmatmul.mubr.f32.gmra.mxu1 %v3641_v36  ;;  %v404_v33 = vld [vmem:[#allocation2 + $0x10] sm:$0xff]  ;;  %v402_v36 = vld [vmem:[#allocation2] sm:$0xff] }
  0xd4   :  { %4425 = vmatmul.mubr.f32.gmra.mxu0 %v246_v37  ;;  %4506 = vmatprep.subr.mxu0 %v592_v38 }
  0xd5   :  { %4507 = vmatpush3.msra.mxu0 %v592_v38  ;;  %4427 = vmatprep.mubr.f32.mxu0 %v247_v40 }
  0xd6   :  { %4508 = vmatprep.subr.mxu0 %v591_v41  ;;  %4483 = vmatprep.mubr.f32.mxu1 %v3642_v42 }
  0xd7   :  { %4509 = vmatpush3.msra.mxu0 %v591_v41  ;;  %4484 = vmatmul.mubr.f32.gmra.mxu1 %v3643_v44 }
  0xd8   :  { %4428 = vmatmul.mubr.f32.gmra.mxu0 %v248_v45  ;;  %4510 = vmatprep.subr.mxu0 %v590_v46 }
  0xd9   :  { %4511 = vmatpush3.msra.mxu0 %v590_v46  ;;  %4430 = vmatprep.mubr.f32.mxu0 %v249_v48 }
  0xda   :  { %4512 = vmatprep.subr.mxu0 %v589_v49  ;;  %4486 = vmatprep.mubr.f32.mxu1 %v3644_v50 }
  0xdb   :  { %4513 = vmatpush3.msra.mxu0 %v589_v49  ;;  %4487 = vmatmul.mubr.f32.gmra.mxu1 %v3645_v52 }
  0xdc   :  { %4431 = vmatmul.mubr.f32.gmra.mxu0 %v250_v53  ;;  %4514 = vmatprep.subr.mxu0 %v588_v54 }
  0xdd   :  { %4515 = vmatpush3.msra.mxu0 %v588_v54  ;;  %4433 = vmatprep.mubr.f32.mxu0 %v251_v56 }
  0xde   :  { %4516 = vmatprep.subr.mxu0 %v587_v57  ;;  %4489 = vmatprep.mubr.f32.mxu1 %v3646_v58 }
  0xdf   :  { %4517 = vmatpush3.msra.mxu0 %v587_v57  ;;  %4490 = vmatmul.mubr.f32.gmra.mxu1 %v3647_v60 }
  0xe0   :  { %4434 = vmatmul.mubr.f32.gmra.mxu0 %v252_v61  ;;  %4518 = vmatprep.subr.mxu0 %v586_v62 }
  0xe1   :  { %4519 = vmatpush3.msra.mxu0 %v586_v62  ;;  %4436 = vmatprep.mubr.f32.mxu0 %v253_v0 }
  0xe2   :  { %4520 = vmatprep.subr.mxu0 %v585_v1  ;;  %4492 = vmatprep.mubr.f32.mxu1 %v3648_v2 }
  0xe3   :  { %4521 = vmatpush3.msra.mxu0 %v585_v1  ;;  %4493 = vmatmul.mubr.f32.gmra.mxu1 %v3649_v4 }
  0xe4   :  { %4437 = vmatmul.mubr.f32.gmra.mxu0 %v254_v5  ;;  %4522 = vmatprep.subr.mxu0 %v584_v6 }
  0xe5   :  { %4523 = vmatpush3.msra.mxu0 %v584_v6  ;;  %4439 = vmatprep.mubr.f32.mxu0 %v255_v8 }
  0xe6   :  { %4524 = vmatprep.subr.mxu0 %v583_v9  ;;  %4495 = vmatprep.mubr.f32.mxu1 %v3650_v10 }
  0xe7   :  { %4525 = vmatpush3.msra.mxu0 %v583_v9  ;;  %4496 = vmatmul.mubr.f32.gmra.mxu1 %v3651_v12 }
  0xe8   :  { %4440 = vmatmul.mubr.f32.gmra.mxu0 %v256_v13  ;;  %4526 = vmatprep.subr.mxu0 %v582_v14 }
  0xe9   :  { %4527 = vmatpush3.msra.mxu0 %v582_v14  ;;  %4555 = vmatpush3.msra.mxu1 %v5946_v27  ;;  %v409_v27 = vld [vmem:[#allocation2 + $0x38] sm:$0xff] }
  0xea   :  { %4528 = vmatprep.subr.mxu0 %v581_v16  ;;  %4556 = vmatprep.subr.mxu1 %v416_v18 }
  0xeb   :  { %4529 = vmatpush3.msra.mxu0 %v581_v16  ;;  %4557 = vmatpush3.msra.mxu1 %v416_v18  ;;  %v3652_v16 = vld [vmem:[%s7033_s3 + $0x100] sm:$0xff]  ;;  %v3653_v18 = vld [vmem:[%s7033_s3 + $0x108] sm:$0xff] }
  0xec   :  { %4610 = vmatprep.subr.mxu0 %v5809_v28  ;;  %4558 = vmatprep.subr.mxu1 %v415_v20 }
  0xed   :  { %4559 = vmatpush3.msra.mxu1 %v415_v20  ;;  %v3654_v20 = vld [vmem:[%s7033_s3 + $0x110] sm:$0xff] }
  0xee   :  { %4560 = vmatprep.subr.mxu1 %v414_v22 }
  0xef   :  { %4561 = vmatpush3.msra.mxu1 %v414_v22  ;;  %v3655_v22 = vld [vmem:[%s7033_s3 + $0x118] sm:$0xff] }
  0xf0   :  { %4562 = vmatprep.subr.mxu1 %v413_v23 }
  0xf1   :  { %4563 = vmatpush3.msra.mxu1 %v413_v23  ;;  %v3656_v23 = vld [vmem:[%s7033_s3 + $0x120] sm:$0xff] }
  0xf2   :  { %4564 = vmatprep.subr.mxu1 %v412_v24 }
  0xf3   :  { %4565 = vmatpush3.msra.mxu1 %v412_v24  ;;  %v3658_v24 = vld [vmem:[%s7033_s3 + $0x130] sm:$0xff] }
  0xf4   :  { %4566 = vmatprep.subr.mxu1 %v411_v25 }
  0xf5   :  { %4567 = vmatpush3.msra.mxu1 %v411_v25  ;;  %v1065_v25 = vld [vmem:[#allocation2 + $0x178] sm:$0xff] }
  0xf6   :  { %4568 = vmatprep.subr.mxu1 %v410_v26 }
  0xf7   :  { %4569 = vmatpush3.msra.mxu1 %v410_v26  ;;  %v3673_v26 = vld [vmem:[%s7033_s3 + $0x1a8] sm:$0xff] }
  0xf8   :  { %4570 = vmatprep.subr.mxu1 %v409_v27 }
  0xf9   :  { %4571 = vmatpush3.msra.mxu1 %v409_v27  ;;  %v1064_v27 = vld [vmem:[#allocation2 + $0x170] sm:$0xff] }
  0xfa   :  { %4572 = vmatprep.subr.mxu1 %v408_v29 }
  0xfb   :  { %4573 = vmatpush3.msra.mxu1 %v408_v29  ;;  %v1063_v29 = vld [vmem:[#allocation2 + $0x168] sm:$0xff] }
  0xfc   :  { %4574 = vmatprep.subr.mxu1 %v407_v30 }
  0xfd   :  { %4575 = vmatpush3.msra.mxu1 %v407_v30  ;;  %v3675_v30 = vld [vmem:[%s7033_s3 + $0x1b8] sm:$0xff] }
  0xfe   :  { %4576 = vmatprep.subr.mxu1 %v406_v31 }
  0xff   :  { %4577 = vmatpush3.msra.mxu1 %v406_v31  ;;  %v3676_v31 = vld [vmem:[%s7033_s3 + $0x1c0] sm:$0xff] }
 0x100   :  { %4578 = vmatprep.subr.mxu1 %v405_v32 }
 0x101   :  { %4579 = vmatpush3.msra.mxu1 %v405_v32  ;;  %v1062_v32 = vld [vmem:[#allocation2 + $0x160] sm:$0xff] }
 0x102   :  { %4580 = vmatprep.subr.mxu1 %v404_v33 }
 0x103   :  { %4581 = vmatpush3.msra.mxu1 %v404_v33  ;;  %v1061_v33 = vld [vmem:[#allocation2 + $0x158] sm:$0xff] }
 0x104   :  { %4582 = vmatprep.subr.mxu1 %v403_v34 }
 0x105   :  { %4583 = vmatpush3.msra.mxu1 %v403_v34  ;;  %v3677_v34 = vld [vmem:[%s7033_s3 + $0x1c8] sm:$0xff] }
 0x106   :  { %4584 = vmatprep.subr.mxu1 %v402_v36 }
 0x107   :  { %4585 = vmatpush3.msra.mxu1 %v402_v36  ;;  %v3678_v36 = vld [vmem:[%s7033_s3 + $0x1d0] sm:$0xff] }
 0x108   :  { %4666 = vmatprep.subr.mxu1 %v1065_v25 }
 0x18b   :  { %v4420_v37 = vpop.f32.mrf.mxu0  ;;  %v4476_v38 = vpop.f32.mrf.mxu1 }
 0x18d   :  { %v323_v40 = vpop.f32.mrf.mxu0  ;;  %v501_v41 = vpop.f32.mrf.mxu1 }
 0x18e   :  { %4530 = vmatprep.mubr.f32.mxu0 %v501_v41  ;;  %4586 = vmatprep.mubr.f32.mxu1 %v323_v40  ;;  %v3679_v40 = vld [vmem:[%s7033_s3 + $0x1d8] sm:$0xff]  ;;  %v3680_v41 = vld [vmem:[%s7033_s3 + $0x1e0] sm:$0xff] }
 0x18f   :  { %v4479_v42 = vpop.f32.mrf.mxu1  ;;  %4531 = vmatmul.mubr.f32.vlgmr.msra.gmra.mxu0 %v4476_v38  ;;  %4587 = vmatmul.mubr.f32.vlgmr.msra.gmra.mxu1 %v4420_v37  ;;  %v1060_v37 = vld [vmem:[#allocation2 + $0x150] sm:$0xff]  ;;  %v1059_v38 = vld [vmem:[#allocation2 + $0x148] sm:$0xff] }
 0x190   :  { %v4423_v44 = vpop.f32.mrf.mxu0  ;;  %4611 = vmatpush3.msra.mxu0 %v5809_v28  ;;  %4667 = vmatpush3.msra.mxu1 %v1065_v25 }
 0x191   :  { %4612 = vmatprep.subr.mxu0 %v5819_v35  ;;  %v511_v45 = vpop.f32.mrf.mxu1  ;;  %4668 = vmatprep.subr.mxu1 %v1064_v27 }
 0x192   :  { %v333_v46 = vpop.f32.mrf.mxu0  ;;  %4613 = vmatpush3.msra.mxu0 %v5819_v35  ;;  %4533 = vmatprep.mubr.f32.mxu0 %v511_v45  ;;  %v3681_v45 = vld [vmem:[%s7033_s3 + $0x1e8] sm:$0xff] }
 0x193   :  { %4589 = vmatprep.mubr.f32.mxu1 %v333_v46  ;;  %4614 = vmatprep.subr.mxu0 %v5824_v39  ;;  %v4482_v48 = vpop.f32.mrf.mxu1  ;;  %v3682_v46 = vld [vmem:[%s7033_s3 + $0x1f0] sm:$0xff] }
 0x194   :  { %v4426_v49 = vpop.f32.mrf.mxu0  ;;  %4534 = vmatmul.mubr.f32.gmra.mxu0 %v4479_v42  ;;  %4590 = vmatmul.mubr.f32.gmra.mxu1 %v4423_v44  ;;  %v1058_v42 = vld [vmem:[#allocation2 + $0x140] sm:$0xff]  ;;  %v1057_v44 = vld [vmem:[#allocation2 + $0x138] sm:$0xff] }
 0x195   :  { %4615 = vmatpush3.msra.mxu0 %v5824_v39  ;;  %v521_v50 = vpop.f32.mrf.mxu1  ;;  %4669 = vmatpush3.msra.mxu1 %v1064_v27 }
 0x196   :  { %4616 = vmatprep.subr.mxu0 %v5831_v43  ;;  %v343_v52 = vpop.f32.mrf.mxu0  ;;  %4536 = vmatprep.mubr.f32.mxu0 %v521_v50  ;;  %v3683_v50 = vld [vmem:[%s7033_s3 + $0x1f8] sm:$0xff] }
 0x197   :  { %4617 = vmatpush3.msra.mxu0 %v5831_v43  ;;  %4592 = vmatprep.mubr.f32.mxu1 %v343_v52  ;;  %v4485_v53 = vpop.f32.mrf.mxu1  ;;  %v1054_v52 = vld [vmem:[#allocation2 + $0x120] sm:$0xff] }
 0x198   :  { %4618 = vmatprep.subr.mxu0 %v5840_v47  ;;  %v4429_v54 = vpop.f32.mrf.mxu0  ;;  %4537 = vmatmul.mubr.f32.gmra.mxu0 %v4482_v48  ;;  %v1056_v48 = vld [vmem:[#allocation2 + $0x130] sm:$0xff] }
 0x199   :  { %4593 = vmatmul.mubr.f32.gmra.mxu1 %v4426_v49  ;;  %4619 = vmatpush3.msra.mxu0 %v5840_v47  ;;  %v531_v56 = vpop.f32.mrf.mxu1  ;;  %v1055_v49 = vld [vmem:[#allocation2 + $0x128] sm:$0xff] }
 0x19a   :  { %4620 = vmatprep.subr.mxu0 %v5847_v51  ;;  %v353_v57 = vpop.f32.mrf.mxu0  ;;  %4539 = vmatprep.mubr.f32.mxu0 %v531_v56  ;;  %v1051_v56 = vld [vmem:[#allocation2 + $0x108] sm:$0xff] }
 0x19b   :  { %4621 = vmatpush3.msra.mxu0 %v5847_v51  ;;  %4595 = vmatprep.mubr.f32.mxu1 %v353_v57  ;;  %v4488_v58 = vpop.f32.mrf.mxu1  ;;  %v1050_v57 = vld [vmem:[#allocation2 + $0x100] sm:$0xff] }
 0x19c   :  { %4622 = vmatprep.subr.mxu0 %v5856_v55  ;;  %v4432_v60 = vpop.f32.mrf.mxu0  ;;  %4540 = vmatmul.mubr.f32.gmra.mxu0 %v4485_v53  ;;  %v1053_v53 = vld [vmem:[#allocation2 + $0x118] sm:$0xff] }
 0x19d   :  { %4596 = vmatmul.mubr.f32.gmra.mxu1 %v4429_v54  ;;  %4623 = vmatpush3.msra.mxu0 %v5856_v55  ;;  %v541_v61 = vpop.f32.mrf.mxu1  ;;  %v1052_v54 = vld [vmem:[#allocation2 + $0x110] sm:$0xff] }
 0x19e   :  { %4624 = vmatprep.subr.mxu0 %v5863_v59  ;;  %v363_v62 = vpop.f32.mrf.mxu0  ;;  %4542 = vmatprep.mubr.f32.mxu0 %v541_v61 }
 0x19f   :  { %4625 = vmatpush3.msra.mxu0 %v5863_v59  ;;  %4598 = vmatprep.mubr.f32.mxu1 %v363_v62  ;;  %v4491_v0 = vpop.f32.mrf.mxu1 }
 0x1a0   :  { %4626 = vmatprep.subr.mxu0 %v5872_v63  ;;  %v4435_v1 = vpop.f32.mrf.mxu0  ;;  %4543 = vmatmul.mubr.f32.gmra.mxu0 %v4488_v58  ;;  %v1405_v58 = vld [vmem:[#allocation2 + $0x1f8] sm:$0xff] }
 0x1a1   :  { %4599 = vmatmul.mubr.f32.gmra.mxu1 %v4432_v60  ;;  %4627 = vmatpush3.msra.mxu0 %v5872_v63  ;;  %v551_v2 = vpop.f32.mrf.mxu1 }
 0x1a2   :  { %4628 = vmatprep.subr.mxu0 %v5879_v3  ;;  %v373_v4 = vpop.f32.mrf.mxu0  ;;  %4545 = vmatprep.mubr.f32.mxu0 %v551_v2 }
 0x1a3   :  { %4629 = vmatpush3.msra.mxu0 %v5879_v3  ;;  %4601 = vmatprep.mubr.f32.mxu1 %v373_v4  ;;  %v4494_v5 = vpop.f32.mrf.mxu1 }
 0x1a4   :  { %4630 = vmatprep.subr.mxu0 %v5888_v7  ;;  %v4438_v6 = vpop.f32.mrf.mxu0  ;;  %4546 = vmatmul.mubr.f32.gmra.mxu0 %v4491_v0 }
 0x1a5   :  { %4602 = vmatmul.mubr.f32.gmra.mxu1 %v4435_v1  ;;  %4631 = vmatpush3.msra.mxu0 %v5888_v7  ;;  %v561_v8 = vpop.f32.mrf.mxu1 }
 0x1a6   :  { %4632 = vmatprep.subr.mxu0 %v5895_v11  ;;  %v383_v9 = vpop.f32.mrf.mxu0  ;;  %4548 = vmatprep.mubr.f32.mxu0 %v561_v8 }
 0x1a7   :  { %4633 = vmatpush3.msra.mxu0 %v5895_v11  ;;  %4604 = vmatprep.mubr.f32.mxu1 %v383_v9  ;;  %v4497_v10 = vpop.f32.mrf.mxu1 }
 0x1a8   :  { %4634 = vmatprep.subr.mxu0 %v5904_v15  ;;  %v4441_v12 = vpop.f32.mrf.mxu0  ;;  %4549 = vmatmul.mubr.f32.gmra.mxu0 %v4494_v5 }
 0x1a9   :  { %4605 = vmatmul.mubr.f32.gmra.mxu1 %v4438_v6  ;;  %4635 = vmatpush3.msra.mxu0 %v5904_v15  ;;  %v571_v13 = vpop.f32.mrf.mxu1 }
 0x1aa   :  { %4636 = vmatprep.subr.mxu0 %v5911_v17  ;;  %v393_v14 = vpop.f32.mrf.mxu0  ;;  %4551 = vmatprep.mubr.f32.mxu0 %v571_v13 }
 0x1ab   :  { %4637 = vmatpush3.msra.mxu0 %v5911_v17  ;;  %4607 = vmatprep.mubr.f32.mxu1 %v393_v14 }
 0x1ac   :  { %4638 = vmatprep.subr.mxu0 %v5918_v19  ;;  %4552 = vmatmul.mubr.f32.gmra.mxu0 %v4497_v10 }
 0x1ad   :  { %4608 = vmatmul.mubr.f32.gmra.mxu1 %v4441_v12  ;;  %4639 = vmatpush3.msra.mxu0 %v5918_v19 }
 0x1ae   :  { %4640 = vmatprep.subr.mxu0 %v5924_v21  ;;  %4642 = vmatprep.mubr.f32.mxu0 %v3652_v16 }
 0x1af   :  { %4641 = vmatpush3.msra.mxu0 %v5924_v21  ;;  %4670 = vmatprep.subr.mxu1 %v1063_v29 }
 0x1b0   :  { %4722 = vmatprep.subr.mxu0 %v5809_v28  ;;  %4643 = vmatmul.mubr.f32.vlgmr.msra.gmra.mxu0 %v3653_v18 }
 0x1b1   :  { %4723 = vmatpush3.msra.mxu0 %v5809_v28  ;;  %4645 = vmatprep.mubr.f32.mxu0 %v3654_v20  ;;  %v3657_v28 = vld [vmem:[%s7033_s3 + $0x128] sm:$0xff] }
 0x1b2   :  { %4724 = vmatprep.subr.mxu0 %v5819_v35  ;;  %4671 = vmatpush3.msra.mxu1 %v1063_v29 }
 0x1b3   :  { %4725 = vmatpush3.msra.mxu0 %v5819_v35  ;;  %v3659_v35 = vld [vmem:[%s7033_s3 + $0x138] sm:$0xff]  ;;  %4672 = vmatprep.subr.mxu1 %v1062_v32 }
 0x1b4   :  { %4726 = vmatprep.subr.mxu0 %v5824_v39  ;;  %4646 = vmatmul.mubr.f32.gmra.mxu0 %v3655_v22 }
 0x1b5   :  { %4727 = vmatpush3.msra.mxu0 %v5824_v39  ;;  %4648 = vmatprep.mubr.f32.mxu0 %v3656_v23  ;;  %v3660_v39 = vld [vmem:[%s7033_s3 + $0x140] sm:$0xff] }
 0x1b6   :  { %4728 = vmatprep.subr.mxu0 %v5831_v43  ;;  %4673 = vmatpush3.msra.mxu1 %v1062_v32 }
 0x1b7   :  { %4729 = vmatpush3.msra.mxu0 %v5831_v43  ;;  %v3661_v43 = vld [vmem:[%s7033_s3 + $0x148] sm:$0xff]  ;;  %4674 = vmatprep.subr.mxu1 %v1061_v33 }
 0x1b8   :  { %4730 = vmatprep.subr.mxu0 %v5840_v47  ;;  %4649 = vmatmul.mubr.f32.gmra.mxu0 %v3657_v28 }
 0x1b9   :  { %4731 = vmatpush3.msra.mxu0 %v5840_v47  ;;  %4651 = vmatprep.mubr.f32.mxu0 %v3658_v24  ;;  %v3662_v47 = vld [vmem:[%s7033_s3 + $0x150] sm:$0xff] }
 0x1ba   :  { %4732 = vmatprep.subr.mxu0 %v5847_v51  ;;  %4675 = vmatpush3.msra.mxu1 %v1061_v33  ;;  %v1403_v33 = vld [vmem:[#allocation2 + $0x1e8] sm:$0xff] }
 0x1bb   :  { %4733 = vmatpush3.msra.mxu0 %v5847_v51  ;;  %v3663_v51 = vld [vmem:[%s7033_s3 + $0x158] sm:$0xff]  ;;  %4676 = vmatprep.subr.mxu1 %v1060_v37 }
 0x1bc   :  { %4734 = vmatprep.subr.mxu0 %v5856_v55  ;;  %4652 = vmatmul.mubr.f32.gmra.mxu0 %v3659_v35 }
 0x1bd   :  { %4735 = vmatpush3.msra.mxu0 %v5856_v55  ;;  %4654 = vmatprep.mubr.f32.mxu0 %v3660_v39  ;;  %v3664_v55 = vld [vmem:[%s7033_s3 + $0x160] sm:$0xff] }
 0x1be   :  { %4736 = vmatprep.subr.mxu0 %v5863_v59  ;;  %4677 = vmatpush3.msra.mxu1 %v1060_v37 }
 0x1bf   :  { %4737 = vmatpush3.msra.mxu0 %v5863_v59  ;;  %v3665_v59 = vld [vmem:[%s7033_s3 + $0x168] sm:$0xff]  ;;  %4678 = vmatprep.subr.mxu1 %v1059_v38 }
 0x1c0   :  { %4738 = vmatprep.subr.mxu0 %v5872_v63  ;;  %4655 = vmatmul.mubr.f32.gmra.mxu0 %v3661_v43 }
 0x1c1   :  { %4739 = vmatpush3.msra.mxu0 %v5872_v63  ;;  %4657 = vmatprep.mubr.f32.mxu0 %v3662_v47  ;;  %v3666_v63 = vld [vmem:[%s7033_s3 + $0x170] sm:$0xff] }
 0x1c2   :  { %4740 = vmatprep.subr.mxu0 %v5879_v3  ;;  %4679 = vmatpush3.msra.mxu1 %v1059_v38  ;;  %v1401_v38 = vld [vmem:[#allocation2 + $0x1d8] sm:$0xff] }
 0x1c3   :  { %4741 = vmatpush3.msra.mxu0 %v5879_v3  ;;  %v3667_v3 = vld [vmem:[%s7033_s3 + $0x178] sm:$0xff]  ;;  %4680 = vmatprep.subr.mxu1 %v1058_v42 }
 0x1c4   :  { %4742 = vmatprep.subr.mxu0 %v5888_v7  ;;  %4658 = vmatmul.mubr.f32.gmra.mxu0 %v3663_v51 }
 0x1c5   :  { %4743 = vmatpush3.msra.mxu0 %v5888_v7  ;;  %4660 = vmatprep.mubr.f32.mxu0 %v3664_v55  ;;  %v3668_v7 = vld [vmem:[%s7033_s3 + $0x180] sm:$0xff] }
 0x1c6   :  { %4744 = vmatprep.subr.mxu0 %v5895_v11  ;;  %4681 = vmatpush3.msra.mxu1 %v1058_v42 }
 0x1c7   :  { %4745 = vmatpush3.msra.mxu0 %v5895_v11  ;;  %v3669_v11 = vld [vmem:[%s7033_s3 + $0x188] sm:$0xff]  ;;  %4682 = vmatprep.subr.mxu1 %v1057_v44 }
 0x1c8   :  { %4746 = vmatprep.subr.mxu0 %v5904_v15  ;;  %4661 = vmatmul.mubr.f32.gmra.mxu0 %v3665_v59 }
 0x1c9   :  { %4747 = vmatpush3.msra.mxu0 %v5904_v15  ;;  %4663 = vmatprep.mubr.f32.mxu0 %v3666_v63  ;;  %v3670_v15 = vld [vmem:[%s7033_s3 + $0x190] sm:$0xff] }
 0x1ca   :  { %4748 = vmatprep.subr.mxu0 %v5911_v17  ;;  %4683 = vmatpush3.msra.mxu1 %v1057_v44  ;;  %v1399_v44 = vld [vmem:[#allocation2 + $0x1c8] sm:$0xff] }
 0x1cb   :  { %4749 = vmatpush3.msra.mxu0 %v5911_v17  ;;  %v3671_v17 = vld [vmem:[%s7033_s3 + $0x198] sm:$0xff]  ;;  %4684 = vmatprep.subr.mxu1 %v1056_v48 }
 0x1cc   :  { %4750 = vmatprep.subr.mxu0 %v5918_v19  ;;  %4664 = vmatmul.mubr.f32.gmra.mxu0 %v3667_v3 }
 0x1cd   :  { %4751 = vmatpush3.msra.mxu0 %v5918_v19  ;;  %4754 = vmatprep.mubr.f32.mxu0 %v3668_v7  ;;  %v3672_v19 = vld [vmem:[%s7033_s3 + $0x1a0] sm:$0xff] }
 0x1ce   :  { %4752 = vmatprep.subr.mxu0 %v5924_v21  ;;  %4685 = vmatpush3.msra.mxu1 %v1056_v48 }
 0x1cf   :  { %4753 = vmatpush3.msra.mxu0 %v5924_v21  ;;  %v3674_v21 = vld [vmem:[%s7033_s3 + $0x1b0] sm:$0xff]  ;;  %4686 = vmatprep.subr.mxu1 %v1055_v49 }
 0x1d0   :  { %4755 = vmatmul.mubr.f32.vlgmr.msra.gmra.mxu0 %v3669_v11  ;;  %4687 = vmatpush3.msra.mxu1 %v1055_v49  ;;  %v1397_v49 = vld [vmem:[#allocation2 + $0x1b8] sm:$0xff] }
 0x1d1   :  { %4757 = vmatprep.mubr.f32.mxu0 %v3670_v15  ;;  %4688 = vmatprep.subr.mxu1 %v1054_v52 }
 0x1d2   :  { %4689 = vmatpush3.msra.mxu1 %v1054_v52  ;;  %v1396_v52 = vld [vmem:[#allocation2 + $0x1b0] sm:$0xff] }
 0x1d3   :  { %4690 = vmatprep.subr.mxu1 %v1053_v53 }
 0x1d4   :  { %4758 = vmatmul.mubr.f32.gmra.mxu0 %v3671_v17  ;;  %4691 = vmatpush3.msra.mxu1 %v1053_v53 }
 0x1d5   :  { %4760 = vmatprep.mubr.f32.mxu0 %v3672_v19  ;;  %4692 = vmatprep.subr.mxu1 %v1052_v54 }
 0x1d6   :  { %4693 = vmatpush3.msra.mxu1 %v1052_v54  ;;  %v1395_v54 = vld [vmem:[#allocation2 + $0x1a8] sm:$0xff] }
 0x1d7   :  { %4694 = vmatprep.subr.mxu1 %v1051_v56 }
 0x1d8   :  { %4761 = vmatmul.mubr.f32.gmra.mxu0 %v3673_v26  ;;  %4695 = vmatpush3.msra.mxu1 %v1051_v56 }
 0x1d9   :  { %4763 = vmatprep.mubr.f32.mxu0 %v3674_v21  ;;  %4696 = vmatprep.subr.mxu1 %v1050_v57 }
 0x1da   :  { %4697 = vmatpush3.msra.mxu1 %v1050_v57  ;;  %v1394_v57 = vld [vmem:[#allocation2 + $0x1a0] sm:$0xff] }
 0x1db   :  { %4778 = vmatprep.subr.mxu1 %v1405_v58 }
 0x1dc   :  { %4764 = vmatmul.mubr.f32.gmra.mxu0 %v3675_v30 }
 0x1dd   :  { %4766 = vmatprep.mubr.f32.mxu0 %v3676_v31  ;;  %v1404_v31 = vld [vmem:[#allocation2 + $0x1f0] sm:$0xff] }
 0x1e0   :  { %4767 = vmatmul.mubr.f32.gmra.mxu0 %v3677_v34 }
 0x1e1   :  { %4769 = vmatprep.mubr.f32.mxu0 %v3678_v36  ;;  %v1402_v36 = vld [vmem:[#allocation2 + $0x1e0] sm:$0xff] }
 0x1e4   :  { %4770 = vmatmul.mubr.f32.gmra.mxu0 %v3679_v40 }
 0x1e5   :  { %4772 = vmatprep.mubr.f32.mxu0 %v3680_v41  ;;  %v1400_v41 = vld [vmem:[#allocation2 + $0x1d0] sm:$0xff] }
 0x1e8   :  { %4773 = vmatmul.mubr.f32.gmra.mxu0 %v3681_v45 }
 0x1e9   :  { %4775 = vmatprep.mubr.f32.mxu0 %v3682_v46  ;;  %v1398_v46 = vld [vmem:[#allocation2 + $0x1c0] sm:$0xff] }
 0x1ec   :  { %4776 = vmatmul.mubr.f32.gmra.mxu0 %v3683_v50 }
 0x24f   :  { %v4532_v60 = vpop.f32.mrf.mxu0  ;;  %v4588_v61 = vpop.f32.mrf.mxu1 }
 0x250   :  { %v6188_v62 = vadd.f32 %v4588_v61, %v4532_v60  ;;  %v1393_v60 = vld [vmem:[#allocation2 + $0x198] sm:$0xff] }
 0x251   :  { %v6190_v0 = vpop.f32.mrf.mxu0  ;;  %v6192_v1 = vpop.f32.mrf.mxu1 }
 0x254   :  { %v4535_v2 = vpop.f32.mrf.mxu0  ;;  %v4591_v4 = vpop.f32.mrf.mxu1 }
 0x255   :  { %v6194_v5 = vadd.f32 %v4591_v4, %v4535_v2  ;;  %v1392_v2 = vld [vmem:[#allocation2 + $0x190] sm:$0xff] }
 0x256   :  { %v6196_v6 = vpop.f32.mrf.mxu0  ;;  %v6198_v8 = vpop.f32.mrf.mxu1 }
 0x258   :  { %v4538_v9 = vpop.f32.mrf.mxu0 }
 0x259   :  { %v4594_v10 = vpop.f32.mrf.mxu1 }
 0x25a   :  { %v6200_v12 = vadd.f32 %v4594_v10, %v4538_v9  ;;  %v6202_v13 = vpop.f32.mrf.mxu0  ;;  %v1391_v9 = vld [vmem:[#allocation2 + $0x188] sm:$0xff] }
 0x25b   :  { %v6204_v14 = vpop.f32.mrf.mxu1 }
 0x25c   :  { %v4541_v16 = vpop.f32.mrf.mxu0 }
 0x25d   :  { %v4597_v18 = vpop.f32.mrf.mxu1 }
 0x25e   :  { %v6206_v20 = vadd.f32 %v4597_v18, %v4541_v16  ;;  %v6208_v22 = vpop.f32.mrf.mxu0  ;;  %v1390_v16 = vld [vmem:[#allocation2 + $0x180] sm:$0xff] }
 0x25f   :  { %v6210_v23 = vpop.f32.mrf.mxu1 }
 0x260   :  { %v4544_v28 = vpop.f32.mrf.mxu0 }
 0x261   :  { %v4600_v24 = vpop.f32.mrf.mxu1 }
 0x262   :  { %v6212_v35 = vadd.f32 %v4600_v24, %v4544_v28  ;;  %v703_v39 = vpop.f32.mrf.mxu0 }
 0x263   :  { %v848_v43 = vpop.f32.mrf.mxu1 }
 0x264   :  { %v6214_v47 = vadd.f32 %v848_v43, %v703_v39  ;;  %v4547_v51 = vpop.f32.mrf.mxu0 }
 0x265   :  { %v4603_v55 = vpop.f32.mrf.mxu1 }
 0x266   :  { %v6216_v59 = vadd.f32 %v4603_v55, %v4547_v51  ;;  %v713_v63 = vpop.f32.mrf.mxu0 }
 0x267   :  { %v858_v3 = vpop.f32.mrf.mxu1 }
 0x268   :  { %v6218_v7 = vadd.f32 %v858_v3, %v713_v63  ;;  %v4550_v11 = vpop.f32.mrf.mxu0 }
 0x269   :  { %v4606_v15 = vpop.f32.mrf.mxu1 }
 0x26a   :  { %v6220_v17 = vadd.f32 %v4606_v15, %v4550_v11  ;;  %v723_v19 = vpop.f32.mrf.mxu0 }
 0x26b   :  { %v868_v25 = vpop.f32.mrf.mxu1 }
 0x26c   :  { %v6222_v26 = vadd.f32 %v868_v25, %v723_v19  ;;  %v6224_v21 = vpop.f32.mrf.mxu0 }
 0x26e   :  { %v6226_v27 = vpop.f32.mrf.mxu0 }
 0x270   :  { %v4644_v29 = vpop.f32.mrf.mxu0 }
 0x272   :  { %v970_v30 = vpop.f32.mrf.mxu0 }
 0x273   :  { %4698 = vmatprep.mubr.f32.mxu1 %v970_v30 }
 0x274   :  { %v4647_v32 = vpop.f32.mrf.mxu0  ;;  %4699 = vmatmul.mubr.f32.vlgmr.msra.gmra.mxu1 %v4644_v29 }
 0x275   :  { %4779 = vmatpush3.msra.mxu1 %v1405_v58 }
 0x276   :  { %v980_v34 = vpop.f32.mrf.mxu0  ;;  %4780 = vmatprep.subr.mxu1 %v1404_v31 }
 0x277   :  { %4701 = vmatprep.mubr.f32.mxu1 %v980_v34  ;;  %4781 = vmatpush3.msra.mxu1 %v1404_v31  ;;  %v4609_v34 = vpop.f32.mrf.mxu1 }
 0x278   :  { %v4650_v37 = vpop.f32.mrf.mxu0  ;;  %4702 = vmatmul.mubr.f32.gmra.mxu1 %v4647_v32  ;;  %4782 = vmatprep.subr.mxu1 %v1403_v33  ;;  %v1606_v32 = vld [vmem:[#allocation5] sm:$0xff] }
 0x279   :  { %4783 = vmatpush3.msra.mxu1 %v1403_v33  ;;  %v1784_v33 = vld [vmem:[#allocation5 + $0x80] sm:$0xff]  ;;  %4866 = vmatprep.mubr.f32.mxu0 %v1606_v32 }
 0x27a   :  { %v990_v40 = vpop.f32.mrf.mxu0  ;;  %4784 = vmatprep.subr.mxu1 %v1402_v36 }
 0x27b   :  { %4704 = vmatprep.mubr.f32.mxu1 %v990_v40  ;;  %4785 = vmatpush3.msra.mxu1 %v1402_v36  ;;  %v878_v36 = vpop.f32.mrf.mxu1 }
 0x27c   :  { %v4653_v42 = vpop.f32.mrf.mxu0  ;;  %4705 = vmatmul.mubr.f32.gmra.mxu1 %v4650_v37  ;;  %4786 = vmatprep.subr.mxu1 %v1401_v38 }
 0x27d   :  { %4787 = vmatpush3.msra.mxu1 %v1401_v38 }
 0x27e   :  { %v1000_v45 = vpop.f32.mrf.mxu0  ;;  %4788 = vmatprep.subr.mxu1 %v1400_v41 }
 0x27f   :  { %4707 = vmatprep.mubr.f32.mxu1 %v1000_v45  ;;  %4789 = vmatpush3.msra.mxu1 %v1400_v41 }
 0x280   :  { %v4656_v48 = vpop.f32.mrf.mxu0  ;;  %4708 = vmatmul.mubr.f32.gmra.mxu1 %v4653_v42  ;;  %4790 = vmatprep.subr.mxu1 %v1399_v44 }
 0x281   :  { %4791 = vmatpush3.msra.mxu1 %v1399_v44 }
 0x282   :  { %v1010_v50 = vpop.f32.mrf.mxu0  ;;  %4792 = vmatprep.subr.mxu1 %v1398_v46 }
 0x283   :  { %4710 = vmatprep.mubr.f32.mxu1 %v1010_v50  ;;  %4793 = vmatpush3.msra.mxu1 %v1398_v46 }
 0x284   :  { %v4659_v53 = vpop.f32.mrf.mxu0  ;;  %4711 = vmatmul.mubr.f32.gmra.mxu1 %v4656_v48  ;;  %4794 = vmatprep.subr.mxu1 %v1397_v49 }
 0x285   :  { %4795 = vmatpush3.msra.mxu1 %v1397_v49 }
 0x286   :  { %v1020_v56 = vpop.f32.mrf.mxu0  ;;  %4796 = vmatprep.subr.mxu1 %v1396_v52 }
 0x287   :  { %4713 = vmatprep.mubr.f32.mxu1 %v1020_v56  ;;  %4797 = vmatpush3.msra.mxu1 %v1396_v52 }
 0x288   :  { %v4662_v58 = vpop.f32.mrf.mxu0  ;;  %4714 = vmatmul.mubr.f32.gmra.mxu1 %v4659_v53  ;;  %4798 = vmatprep.subr.mxu1 %v1395_v54 }
 0x289   :  { %4799 = vmatpush3.msra.mxu1 %v1395_v54 }
 0x28a   :  { %v1030_v61 = vpop.f32.mrf.mxu0  ;;  %4800 = vmatprep.subr.mxu1 %v1394_v57 }
 0x28b   :  { %4716 = vmatprep.mubr.f32.mxu1 %v1030_v61  ;;  %4801 = vmatpush3.msra.mxu1 %v1394_v57 }
 0x28c   :  { %v4665_v4 = vpop.f32.mrf.mxu0  ;;  %4717 = vmatmul.mubr.f32.gmra.mxu1 %v4662_v58  ;;  %4802 = vmatprep.subr.mxu1 %v1393_v60 }
 0x28d   :  { %4803 = vmatpush3.msra.mxu1 %v1393_v60 }
 0x28e   :  { %v1040_v10 = vpop.f32.mrf.mxu0  ;;  %4804 = vmatprep.subr.mxu1 %v1392_v2 }
 0x28f   :  { %4719 = vmatprep.mubr.f32.mxu1 %v1040_v10  ;;  %4805 = vmatpush3.msra.mxu1 %v1392_v2 }
 0x290   :  { %4720 = vmatmul.mubr.f32.gmra.mxu1 %v4665_v4  ;;  %v4756_v18 = vpop.f32.mrf.mxu0  ;;  %4806 = vmatprep.subr.mxu1 %v1391_v9 }
 0x291   :  { %4807 = vmatpush3.msra.mxu1 %v1391_v9 }
 0x292   :  { %v1310_v28 = vpop.f32.mrf.mxu0  ;;  %4808 = vmatprep.subr.mxu1 %v1390_v16 }
 0x293   :  { %4809 = vmatpush3.msra.mxu1 %v1390_v16  ;;  %4810 = vmatprep.mubr.f32.mxu1 %v1310_v28 }
 0x294   :  { %v4759_v24 = vpop.f32.mrf.mxu0  ;;  %4811 = vmatmul.mubr.f32.vlgmr.msra.gmra.mxu1 %v4756_v18 }
 0x296   :  { %v1320_v39 = vpop.f32.mrf.mxu0 }
 0x297   :  { %4813 = vmatprep.mubr.f32.mxu1 %v1320_v39 }
 0x298   :  { %v4762_v43 = vpop.f32.mrf.mxu0  ;;  %4814 = vmatmul.mubr.f32.gmra.mxu1 %v4759_v24 }
 0x29a   :  { %v1330_v51 = vpop.f32.mrf.mxu0 }
 0x29b   :  { %4816 = vmatprep.mubr.f32.mxu1 %v1330_v51  ;;  %v884_v51 = vadd.f32 %v4609_v34, %v6224_v21 }
 0x29c   :  { %v4765_v55 = vpop.f32.mrf.mxu0  ;;  %4817 = vmatmul.mubr.f32.gmra.mxu1 %v4762_v43 }
 0x29e   :  { %v1340_v63 = vpop.f32.mrf.mxu0 }
 0x29f   :  { %4819 = vmatprep.mubr.f32.mxu1 %v1340_v63  ;;  %v879_v63 = vadd.f32 %v878_v36, %v6226_v27 }
 0x2a0   :  { %v4768_v3 = vpop.f32.mrf.mxu0  ;;  %4820 = vmatmul.mubr.f32.gmra.mxu1 %v4765_v55 }
 0x2a2   :  { %v1350_v11 = vpop.f32.mrf.mxu0 }
 0x2a3   :  { %4822 = vmatprep.mubr.f32.mxu1 %v1350_v11 }
 0x2a4   :  { %v4771_v15 = vpop.f32.mrf.mxu0  ;;  %4823 = vmatmul.mubr.f32.gmra.mxu1 %v4768_v3 }
 0x2a6   :  { %v1360_v19 = vpop.f32.mrf.mxu0 }
 0x2a7   :  { %4825 = vmatprep.mubr.f32.mxu1 %v1360_v19 }
 0x2a8   :  { %v4774_v25 = vpop.f32.mrf.mxu0  ;;  %4826 = vmatmul.mubr.f32.gmra.mxu1 %v4771_v15 }
 0x2aa   :  { %v1370_v29 = vpop.f32.mrf.mxu0 }
 0x2ab   :  { %4828 = vmatprep.mubr.f32.mxu1 %v1370_v29 }
 0x2ac   :  { %v4777_v30 = vpop.f32.mrf.mxu0  ;;  %4829 = vmatmul.mubr.f32.gmra.mxu1 %v4774_v25 }
 0x2ae   :  { %v1380_v31 = vpop.f32.mrf.mxu0 }
 0x2af   :  { %4831 = vmatprep.mubr.f32.mxu1 %v1380_v31  ;;  %v6264_v31 = vld [vmem:[%s7035_s5] ss:$0 sm:$0xff] }
 0x2b0   :  { %4832 = vmatmul.mubr.f32.gmra.mxu1 %v4777_v30 }
 0x2b1   :  { %4922 = vmatprep.mubr.f32.mxu1 %v1784_v33 }
 0x334   :  { %v4700_v37 = vpop.f32.mrf.mxu1 }
 0x335   :  { %v6229_v38 = vadd.f32 %v4700_v37, %v6188_v62 }
 0x336   :  { %v6231_v40 = vpop.f32.mrf.mxu1 }
 0x338   :  { %v4703_v41 = vpop.f32.mrf.mxu1 }
 0x339   :  { %v6234_v42 = vadd.f32 %v4703_v41, %v6194_v5 }
 0x33a   :  { %v6236_v44 = vpop.f32.mrf.mxu1 }
 0x33c   :  { %v4706_v45 = vpop.f32.mrf.mxu1 }
 0x33d   :  { %v6239_v46 = vadd.f32 %v4706_v45, %v6200_v12 }
 0x33e   :  { %v6241_v48 = vpop.f32.mrf.mxu1 }
 0x340   :  { %v4709_v49 = vpop.f32.mrf.mxu1 }
 0x342   :  { %v6243_v50 = vpop.f32.mrf.mxu1 }
 0x344   :  { %v4712_v52 = vpop.f32.mrf.mxu1 }
 0x345   :  { %v1220_v45 = vadd.f32 %v4712_v52, %v6212_v35  ;;  %v839_v35 = vadd.f32 %v6210_v23, %v6208_v22  ;;  %v1218_v52 = vadd.f32 %v4709_v49, %v6206_v20  ;;  %v829_v20 = vadd.f32 %v6204_v14, %v6202_v13 }
 0x346   :  { %v1172_v62 = vpop.f32.mrf.mxu1 }
 0x347   :  { %v1217_v22 = vadd.f32 %v6243_v50, %v839_v35  ;;  %v1791_v35 = vld [vmem:[#allocation5 + $0xb8] sm:$0xff] }
 0x348   :  { %v4715_v53 = vpop.f32.mrf.mxu1 }
 0x349   :  { %v1222_v21 = vadd.f32 %v4715_v53, %v6216_v59  ;;  %v1219_v59 = vadd.f32 %v1172_v62, %v6214_v47 }
 0x34a   :  { %v1182_v54 = vpop.f32.mrf.mxu1 }
 0x34c   :  { %v4718_v56 = vpop.f32.mrf.mxu1 }
 0x34d   :  { %v1224_v3 = vadd.f32 %v4718_v56, %v6220_v17  ;;  %v1221_v17 = vadd.f32 %v1182_v54, %v6218_v7 }
 0x34e   :  { %v1192_v57 = vpop.f32.mrf.mxu1 }
 0x34f   :  { %v1223_v19 = vadd.f32 %v1192_v57, %v6222_v26 }
 0x350   :  { %v4721_v58 = vpop.f32.mrf.mxu1 }
 0x351   :  { %v1226_v11 = vadd.f32 %v4721_v58, %v884_v51 }
 0x352   :  { %v1202_v5 = vpop.f32.mrf.mxu1 }
 0x353   :  { %v1225_v25 = vadd.f32 %v1202_v5, %v879_v63 }
 0x354   :  { %v6245_v60 = vpop.f32.mrf.mxu1 }
 0x355   :  { %v1552_v63 = vadd.f32 %v6245_v60, %v6229_v38 }
 0x356   :  { %v6247_v61 = vpop.f32.mrf.mxu1 }
 0x357   :  { %v1575_v38 = vadd.f32 %v6264_v31, %v1552_v63  ;;  %v1798_v63 = vld [vmem:[#allocation5 + $0xf0] sm:$0xff] }
 0x358   :  { %v6249_v2 = vpop.f32.mrf.mxu1 }
 0x359   :  { %v1554_v51 = vadd.f32 %v6249_v2, %v6234_v42 }
 0x35a   :  { %v6251_v12 = vpop.f32.mrf.mxu1 }
 0x35c   :  { %v6253_v4 = vpop.f32.mrf.mxu1 }
 0x35e   :  { %v6255_v9 = vpop.f32.mrf.mxu1 }
 0x360   :  { %v4821_v10 = vpop.f32.mrf.mxu1 }
 0x361   :  { %v1558_v23 = vadd.f32 %v4821_v10, %v1218_v52  ;;  %v1215_v10 = vadd.f32 %v6241_v48, %v829_v20  ;;  %v1613_v52 = vld [vmem:[#allocation5 + $0x38] sm:$0xff]  ;;  %v1615_v20 = vld [vmem:[#allocation5 + $0x48] sm:$0xff] }
 0x362   :  { %v1502_v16 = vpop.f32.mrf.mxu1 }
 0x363   :  { %v1557_v49 = vadd.f32 %v1502_v16, %v1217_v22  ;;  %v1581_v13 = vadd.f32 %v6264_v31, %v1558_v23  ;;  %v819_v16 = vadd.f32 %v6198_v8, %v6196_v6  ;;  %v1555_v48 = vadd.f32 %v6255_v9, %v1215_v10  ;;  %v1954_v22 = vld [vmem:[#allocation7 + $0xc0] sm:$0xff]  ;;  %v1952_v10 = vld [vmem:[#allocation7 + $0xb0] sm:$0xff] }
 0x364   :  { %v4824_v18 = vpop.f32.mrf.mxu1  ;;  %v809_v9 = vadd.f32 %v6192_v1, %v6190_v0  ;;  %v1577_v0 = vadd.f32 %v6264_v31, %v1554_v51  ;;  %v1792_v23 = vld [vmem:[#allocation5 + $0xc0] sm:$0xff] }
 0x365   :  { %v1560_v7 = vadd.f32 %v4824_v18, %v1220_v45  ;;  %v6340_v8 = vmax.f32 %v1581_v13, 0.0  ;;  %v1789_v45 = vld [vmem:[#allocation5 + $0xa8] sm:$0xff]  ;;  %v1795_v13 = vld [vmem:[#allocation5 + $0xd8] sm:$0xff]  ;;  %v1796_v51 = vld [vmem:[#allocation5 + $0xe0] sm:$0xff] }
 0x366   :  { %v1512_v28 = vpop.f32.mrf.mxu1  ;;  %v1211_v2 = vadd.f32 %v6231_v40, %v809_v9  ;;  %v6375_v60 = vmax.f32 %v1577_v0, 0.0  ;;  %v1619_v9 = vld [vmem:[#allocation5 + $0x68] sm:$0xff]  ;;  %v1799_v0 = vld [vmem:[#allocation5 + $0xf8] sm:$0xff] }
 0x367   :  { %v1559_v5 = vadd.f32 %v1512_v28, %v1219_v59  ;;  %v1583_v18 = vadd.f32 %v6264_v31, %v1560_v7  ;;  %v1612_v59 = vld [vmem:[#allocation5 + $0x30] sm:$0xff] }
 0x368   :  { %v4827_v24 = vpop.f32.mrf.mxu1  ;;  %v1956_v7 = vld [vmem:[#allocation7 + $0xd0] sm:$0xff] }
 0x369   :  { %v1562_v36 = vadd.f32 %v4827_v24, %v1222_v21  ;;  %v1582_v28 = vadd.f32 %v6264_v31, %v1559_v5  ;;  %v6320_v14 = vmax.f32 %v1583_v18, 0.0  ;;  %v1960_v21 = vld [vmem:[#allocation7 + $0xf0] sm:$0xff]  ;;  %v1955_v5 = vld [vmem:[#allocation7 + $0xc8] sm:$0xff] }
 0x36a   :  { %v1522_v39 = vpop.f32.mrf.mxu1  ;;  %v1793_v18 = vld [vmem:[#allocation5 + $0xc8] sm:$0xff] }
 0x36b   :  { %v1561_v56 = vadd.f32 %v1522_v39, %v1221_v17  ;;  %v1585_v53 = vadd.f32 %v6264_v31, %v1562_v36  ;;  %v1556_v39 = vadd.f32 %v6253_v4, %v6239_v46  ;;  %v6330_v46 = vmax.f32 %v1582_v28, 0.0  ;;  %v1959_v17 = vld [vmem:[#allocation7 + $0xe8] sm:$0xff]  ;;  %v1610_v36 = vld [vmem:[#allocation5 + $0x20] sm:$0xff]  ;;  %v1616_v28 = vld [vmem:[#allocation5 + $0x50] sm:$0xff] }
 0x36c   :  { %v4830_v43 = vpop.f32.mrf.mxu1  ;;  %v1213_v4 = vadd.f32 %v6236_v44, %v819_v16  ;;  %v1617_v16 = vld [vmem:[#allocation5 + $0x58] sm:$0xff] }
 0x36d   :  { %v1564_v29 = vadd.f32 %v4830_v43, %v1224_v3  ;;  %v1584_v47 = vadd.f32 %v6264_v31, %v1561_v56  ;;  %v6301_v24 = vmax.f32 %v1585_v53, 0.0  ;;  %v1580_v43 = vadd.f32 %v6264_v31, %v1557_v49  ;;  %v1611_v56 = vld [vmem:[#allocation5 + $0x28] sm:$0xff]  ;;  %v1790_v53 = vld [vmem:[#allocation5 + $0xb0] sm:$0xff]  ;;  %v1953_v49 = vld [vmem:[#allocation7 + $0xb8] sm:$0xff] }
 0x36e   :  { %v1532_v55 = vpop.f32.mrf.mxu1  ;;  %v1579_v6 = vadd.f32 %v6264_v31, %v1556_v39  ;;  %v1553_v44 = vadd.f32 %v6251_v12, %v1213_v4  ;;  %v1551_v12 = vadd.f32 %v6247_v61, %v1211_v2  ;;  %v1794_v39 = vld [vmem:[#allocation5 + $0xd0] sm:$0xff]  ;;  %v1950_v4 = vld [vmem:[#allocation7 + $0xa0] sm:$0xff] }
 0x36f   :  { %v1563_v33 = vadd.f32 %v1532_v55, %v1223_v19  ;;  %v1587_v26 = vadd.f32 %v6264_v31, %v1564_v29  ;;  %v6310_v50 = vmax.f32 %v1584_v47, 0.0  ;;  %v1578_v55 = vadd.f32 %v6264_v31, %v1555_v48  ;;  %v1785_v29 = vld [vmem:[#allocation5 + $0x88] sm:$0xff]  ;;  %v1614_v47 = vld [vmem:[#allocation5 + $0x40] sm:$0xff]  ;;  %v1948_v2 = vld [vmem:[#allocation7 + $0x90] sm:$0xff] }
 0x370   :  { %v4833_v15 = vpop.f32.mrf.mxu1  ;;  %v6350_v42 = vmax.f32 %v1580_v43, 0.0  ;;  %v6360_v1 = vmax.f32 %v1579_v6, 0.0  ;;  %v1576_v3 = vadd.f32 %v6264_v31, %v1553_v44  ;;  %v1574_v61 = vadd.f32 %v6264_v31, %v1551_v12  ;;  %v1951_v48 = vld [vmem:[#allocation7 + $0xa8] sm:$0xff]  ;;  %v1618_v43 = vld [vmem:[#allocation5 + $0x60] sm:$0xff]  ;;  %v1949_v44 = vld [vmem:[#allocation7 + $0x98] sm:$0xff] }
 0x371   :  { %v1566_v30 = vadd.f32 %v4833_v15, %v1226_v11  ;;  %v1586_v57 = vadd.f32 %v6264_v31, %v1563_v33  ;;  %v6283_v54 = vmax.f32 %v1587_v26, 0.0  ;;  %v6368_v40 = vmax.f32 %v1578_v55, 0.0  ;;  %v6404_v33 = vld [vmem:[#allocation7 + $0x78] sm:$0xff]  ;;  %v1958_v26 = vld [vmem:[#allocation7 + $0xe0] sm:$0xff]  ;;  %v1797_v6 = vld [vmem:[#allocation5 + $0xe8] sm:$0xff] }
 0x372   :  { %v1542_v32 = vpop.f32.mrf.mxu1  ;;  %v6382_v11 = vmax.f32 %v1576_v3, 0.0  ;;  %v6388_v15 = vmax.f32 %v1575_v38, 0.0  ;;  %v6394_v19 = vmax.f32 %v1574_v61, 0.0  ;;  %v1620_v55 = vld [vmem:[#allocation5 + $0x70] sm:$0xff]  ;;  %v1621_v12 = vld [vmem:[#allocation5 + $0x78] sm:$0xff]  ;;  %v1947_v3 = vld [vmem:[#allocation7 + $0x88] sm:$0xff] }
 0x373   :  { %v1589_v27 = vadd.f32 %v6264_v31, %v1566_v30  ;;  %v1565_v34 = vadd.f32 %v1542_v32, %v1225_v25  ;;  %v6293_v62 = vmax.f32 %v1586_v57, 0.0  ;;  %v1607_v25 = vld [vmem:[#allocation5 + $0x8] sm:$0xff]  ;;  %v1961_v30 = vld [vmem:[#allocation7 + $0xf8] sm:$0xff]  ;;  %v1786_v32 = vld [vmem:[#allocation5 + $0x90] sm:$0xff] }
 0x374   :  { %v1957_v57 = vld [vmem:[#allocation7 + $0xd8] sm:$0xff]  ;;  %v1946_v38 = vld [vmem:[#allocation7 + $0x80] sm:$0xff]  ;;  %v1781_v61 = vld [vmem:[#allocation7 + $0x70] sm:$0xff] }
 0x375   :  { %v6270_v37 = vmax.f32 %v1589_v27, 0.0  ;;  %v1588_v41 = vadd.f32 %v6264_v31, %v1565_v34  ;;  %v1608_v31 = vld [vmem:[#allocation5 + $0x10] sm:$0xff]  ;;  %v1787_v27 = vld [vmem:[#allocation5 + $0x98] sm:$0xff] }
 0x376   :  { %v1609_v34 = vld [vmem:[#allocation5 + $0x18] sm:$0xff] }
 0x377   :  { %v6275_v58 = vmax.f32 %v1588_v41, 0.0  ;;  %4834 = vmatprep.subr.mxu0 %v6270_v37  ;;  %4890 = vmatprep.subr.mxu1 %v6270_v37  ;;  %v1788_v41 = vld [vmem:[#allocation5 + $0xa0] sm:$0xff] }
 0x378   :  { %4835 = vmatpush3.msra.mxu0 %v6270_v37  ;;  %4891 = vmatpush3.msra.mxu1 %v6270_v37 }
 0x379   :  { %4836 = vmatprep.subr.mxu0 %v6275_v58  ;;  %4892 = vmatprep.subr.mxu1 %v6275_v58 }
 0x37a   :  { %4837 = vmatpush3.msra.mxu0 %v6275_v58  ;;  %4893 = vmatpush3.msra.mxu1 %v6275_v58 }
 0x37b   :  { %4838 = vmatprep.subr.mxu0 %v6283_v54  ;;  %4894 = vmatprep.subr.mxu1 %v6283_v54 }
 0x37c   :  { %4839 = vmatpush3.msra.mxu0 %v6283_v54  ;;  %4895 = vmatpush3.msra.mxu1 %v6283_v54 }
 0x37d   :  { %4840 = vmatprep.subr.mxu0 %v6293_v62  ;;  %4896 = vmatprep.subr.mxu1 %v6293_v62 }
 0x37e   :  { %4841 = vmatpush3.msra.mxu0 %v6293_v62  ;;  %4897 = vmatpush3.msra.mxu1 %v6293_v62 }
 0x37f   :  { %4842 = vmatprep.subr.mxu0 %v6301_v24  ;;  %4898 = vmatprep.subr.mxu1 %v6301_v24 }
 0x380   :  { %4843 = vmatpush3.msra.mxu0 %v6301_v24  ;;  %4899 = vmatpush3.msra.mxu1 %v6301_v24 }
 0x381   :  { %4844 = vmatprep.subr.mxu0 %v6310_v50  ;;  %4900 = vmatprep.subr.mxu1 %v6310_v50 }
 0x382   :  { %4845 = vmatpush3.msra.mxu0 %v6310_v50  ;;  %4901 = vmatpush3.msra.mxu1 %v6310_v50 }
 0x383   :  { %4846 = vmatprep.subr.mxu0 %v6320_v14  ;;  %4902 = vmatprep.subr.mxu1 %v6320_v14 }
 0x384   :  { %4847 = vmatpush3.msra.mxu0 %v6320_v14  ;;  %4903 = vmatpush3.msra.mxu1 %v6320_v14 }
 0x385   :  { %4848 = vmatprep.subr.mxu0 %v6330_v46  ;;  %4904 = vmatprep.subr.mxu1 %v6330_v46 }
 0x386   :  { %4849 = vmatpush3.msra.mxu0 %v6330_v46  ;;  %4905 = vmatpush3.msra.mxu1 %v6330_v46 }
 0x387   :  { %4850 = vmatprep.subr.mxu0 %v6340_v8  ;;  %4906 = vmatprep.subr.mxu1 %v6340_v8 }
 0x388   :  { %4851 = vmatpush3.msra.mxu0 %v6340_v8  ;;  %4907 = vmatpush3.msra.mxu1 %v6340_v8 }
 0x389   :  { %4852 = vmatprep.subr.mxu0 %v6350_v42  ;;  %4908 = vmatprep.subr.mxu1 %v6350_v42 }
 0x38a   :  { %4853 = vmatpush3.msra.mxu0 %v6350_v42  ;;  %4909 = vmatpush3.msra.mxu1 %v6350_v42 }
 0x38b   :  { %4854 = vmatprep.subr.mxu0 %v6360_v1  ;;  %4910 = vmatprep.subr.mxu1 %v6360_v1 }
 0x38c   :  { %4855 = vmatpush3.msra.mxu0 %v6360_v1  ;;  %4911 = vmatpush3.msra.mxu1 %v6360_v1 }
 0x38d   :  { %4856 = vmatprep.subr.mxu0 %v6368_v40  ;;  %4912 = vmatprep.subr.mxu1 %v6368_v40 }
 0x38e   :  { %4857 = vmatpush3.msra.mxu0 %v6368_v40  ;;  %4913 = vmatpush3.msra.mxu1 %v6368_v40 }
 0x38f   :  { %4858 = vmatprep.subr.mxu0 %v6375_v60  ;;  %4914 = vmatprep.subr.mxu1 %v6375_v60 }
 0x390   :  { %4859 = vmatpush3.msra.mxu0 %v6375_v60  ;;  %4915 = vmatpush3.msra.mxu1 %v6375_v60 }
 0x391   :  { %4860 = vmatprep.subr.mxu0 %v6382_v11  ;;  %4916 = vmatprep.subr.mxu1 %v6382_v11 }
 0x392   :  { %4861 = vmatpush3.msra.mxu0 %v6382_v11  ;;  %4917 = vmatpush3.msra.mxu1 %v6382_v11 }
 0x393   :  { %4862 = vmatprep.subr.mxu0 %v6388_v15  ;;  %4918 = vmatprep.subr.mxu1 %v6388_v15 }
 0x394   :  { %4863 = vmatpush3.msra.mxu0 %v6388_v15  ;;  %4919 = vmatpush3.msra.mxu1 %v6388_v15 }
 0x395   :  { %4864 = vmatprep.subr.mxu0 %v6394_v19  ;;  %4920 = vmatprep.subr.mxu1 %v6394_v19 }
 0x396   :  { %4865 = vmatpush3.msra.mxu0 %v6394_v19  ;;  %4921 = vmatpush3.msra.mxu1 %v6394_v19 }
 0x397   :  { %4867 = vmatmul.mubr.f32.vlgmr.msra.gmra.mxu0 %v1607_v25  ;;  %4923 = vmatmul.mubr.f32.vlgmr.msra.gmra.mxu1 %v1785_v29  ;;  %v1780_v25 = vld [vmem:[#allocation7 + $0x68] sm:$0xff]  ;;  %v1779_v29 = vld [vmem:[#allocation7 + $0x60] sm:$0xff] }
 0x398   :  { %4946 = vmatprep.subr.mxu0 %v1961_v30  ;;  %4869 = vmatprep.mubr.f32.mxu0 %v1608_v31  ;;  %v1777_v31 = vld [vmem:[#allocation7 + $0x50] sm:$0xff] }
 0x399   :  { %4947 = vmatpush3.msra.mxu0 %v1961_v30  ;;  %4925 = vmatprep.mubr.f32.mxu1 %v1786_v32  ;;  %v1778_v30 = vld [vmem:[#allocation7 + $0x58] sm:$0xff]  ;;  %v1776_v32 = vld [vmem:[#allocation7 + $0x48] sm:$0xff] }
 0x39a   :  { %4948 = vmatprep.subr.mxu0 %v1960_v21  ;;  %5002 = vmatprep.subr.mxu1 %v6404_v33 }
 0x39b   :  { %4949 = vmatpush3.msra.mxu0 %v1960_v21  ;;  %4926 = vmatmul.mubr.f32.gmra.mxu1 %v1787_v27  ;;  %v1775_v21 = vld [vmem:[#allocation7 + $0x40] sm:$0xff]  ;;  %v1773_v27 = vld [vmem:[#allocation7 + $0x30] sm:$0xff] }
 0x39c   :  { %4870 = vmatmul.mubr.f32.gmra.mxu0 %v1609_v34  ;;  %4950 = vmatprep.subr.mxu0 %v1959_v17  ;;  %v1772_v34 = vld [vmem:[#allocation7 + $0x28] sm:$0xff] }
 0x39d   :  { %4951 = vmatpush3.msra.mxu0 %v1959_v17  ;;  %4872 = vmatprep.mubr.f32.mxu0 %v1610_v36  ;;  %v1771_v17 = vld [vmem:[#allocation7 + $0x20] sm:$0xff]  ;;  %v1770_v36 = vld [vmem:[#allocation7 + $0x18] sm:$0xff] }
 0x39e   :  { %4952 = vmatprep.subr.mxu0 %v1958_v26  ;;  %4928 = vmatprep.mubr.f32.mxu1 %v1788_v41  ;;  %v1768_v41 = vld [vmem:[#allocation7 + $0x8] sm:$0xff] }
 0x39f   :  { %4953 = vmatpush3.msra.mxu0 %v1958_v26  ;;  %4929 = vmatmul.mubr.f32.gmra.mxu1 %v1789_v45  ;;  %v1769_v26 = vld [vmem:[#allocation7 + $0x10] sm:$0xff]  ;;  %v1767_v45 = vld [vmem:[#allocation7] sm:$0xff] }
 0x3a0   :  { %4873 = vmatmul.mubr.f32.gmra.mxu0 %v1611_v56  ;;  %4954 = vmatprep.subr.mxu0 %v1957_v57 }
 0x3a1   :  { %4955 = vmatpush3.msra.mxu0 %v1957_v57  ;;  %4875 = vmatprep.mubr.f32.mxu0 %v1612_v59 }
 0x3a2   :  { %4956 = vmatprep.subr.mxu0 %v1956_v7  ;;  %4931 = vmatprep.mubr.f32.mxu1 %v1790_v53 }
 0x3a3   :  { %4957 = vmatpush3.msra.mxu0 %v1956_v7  ;;  %4932 = vmatmul.mubr.f32.gmra.mxu1 %v1791_v35 }
 0x3a4   :  { %4876 = vmatmul.mubr.f32.gmra.mxu0 %v1613_v52  ;;  %4958 = vmatprep.subr.mxu0 %v1955_v5 }
 0x3a5   :  { %4959 = vmatpush3.msra.mxu0 %v1955_v5  ;;  %4878 = vmatprep.mubr.f32.mxu0 %v1614_v47 }
 0x3a6   :  { %4960 = vmatprep.subr.mxu0 %v1954_v22  ;;  %4934 = vmatprep.mubr.f32.mxu1 %v1792_v23 }
 0x3a7   :  { %4961 = vmatpush3.msra.mxu0 %v1954_v22  ;;  %4935 = vmatmul.mubr.f32.gmra.mxu1 %v1793_v18 }
 0x3a8   :  { %4879 = vmatmul.mubr.f32.gmra.mxu0 %v1615_v20  ;;  %4962 = vmatprep.subr.mxu0 %v1953_v49 }
 0x3a9   :  { %4963 = vmatpush3.msra.mxu0 %v1953_v49  ;;  %4881 = vmatprep.mubr.f32.mxu0 %v1616_v28 }
 0x3aa   :  { %4964 = vmatprep.subr.mxu0 %v1952_v10  ;;  %4937 = vmatprep.mubr.f32.mxu1 %v1794_v39 }
 0x3ab   :  { %4965 = vmatpush3.msra.mxu0 %v1952_v10  ;;  %4938 = vmatmul.mubr.f32.gmra.mxu1 %v1795_v13 }
 0x3ac   :  { %4882 = vmatmul.mubr.f32.gmra.mxu0 %v1617_v16  ;;  %4966 = vmatprep.subr.mxu0 %v1951_v48 }
 0x3ad   :  { %4967 = vmatpush3.msra.mxu0 %v1951_v48  ;;  %4884 = vmatprep.mubr.f32.mxu0 %v1618_v43 }
 0x3ae   :  { %4968 = vmatprep.subr.mxu0 %v1950_v4  ;;  %4940 = vmatprep.mubr.f32.mxu1 %v1796_v51 }
 0x3af   :  { %4969 = vmatpush3.msra.mxu0 %v1950_v4  ;;  %4941 = vmatmul.mubr.f32.gmra.mxu1 %v1797_v6 }
 0x3b0   :  { %4885 = vmatmul.mubr.f32.gmra.mxu0 %v1619_v9  ;;  %4970 = vmatprep.subr.mxu0 %v1949_v44 }
 0x3b1   :  { %4971 = vmatpush3.msra.mxu0 %v1949_v44  ;;  %4887 = vmatprep.mubr.f32.mxu0 %v1620_v55 }
 0x3b2   :  { %4972 = vmatprep.subr.mxu0 %v1948_v2  ;;  %4943 = vmatprep.mubr.f32.mxu1 %v1798_v63 }
 0x3b3   :  { %4973 = vmatpush3.msra.mxu0 %v1948_v2  ;;  %4944 = vmatmul.mubr.f32.gmra.mxu1 %v1799_v0 }
 0x3b4   :  { %4888 = vmatmul.mubr.f32.gmra.mxu0 %v1621_v12  ;;  %4974 = vmatprep.subr.mxu0 %v1947_v3 }
 0x3b5   :  { %4975 = vmatpush3.msra.mxu0 %v1947_v3  ;;  %5003 = vmatpush3.msra.mxu1 %v6404_v33  ;;  %v1774_v33 = vld [vmem:[#allocation7 + $0x38] sm:$0xff] }
 0x3b6   :  { %4976 = vmatprep.subr.mxu0 %v1946_v38  ;;  %5004 = vmatprep.subr.mxu1 %v1781_v61 }
 0x3b7   :  { %4977 = vmatpush3.msra.mxu0 %v1946_v38  ;;  %5005 = vmatpush3.msra.mxu1 %v1781_v61  ;;  %v2253_v38 = vld [vmem:[#allocation5 + $0x100] sm:$0xff]  ;;  %v2254_v61 = vld [vmem:[#allocation5 + $0x108] sm:$0xff] }
 0x3b8   :  { %5058 = vmatprep.subr.mxu0 %v6270_v37  ;;  %5006 = vmatprep.subr.mxu1 %v1780_v25 }
 0x3b9   :  { %5007 = vmatpush3.msra.mxu1 %v1780_v25  ;;  %v2255_v25 = vld [vmem:[#allocation5 + $0x110] sm:$0xff] }
 0x3ba   :  { %5008 = vmatprep.subr.mxu1 %v1779_v29 }
 0x3bb   :  { %5009 = vmatpush3.msra.mxu1 %v1779_v29  ;;  %v2256_v29 = vld [vmem:[#allocation5 + $0x118] sm:$0xff] }
 0x3bc   :  { %5010 = vmatprep.subr.mxu1 %v1778_v30 }
 0x3bd   :  { %5011 = vmatpush3.msra.mxu1 %v1778_v30  ;;  %v2257_v30 = vld [vmem:[#allocation5 + $0x120] sm:$0xff] }
 0x3be   :  { %5012 = vmatprep.subr.mxu1 %v1777_v31 }
 0x3bf   :  { %5013 = vmatpush3.msra.mxu1 %v1777_v31  ;;  %v2258_v31 = vld [vmem:[#allocation5 + $0x128] sm:$0xff] }
 0x3c0   :  { %5014 = vmatprep.subr.mxu1 %v1776_v32 }
 0x3c1   :  { %5015 = vmatpush3.msra.mxu1 %v1776_v32  ;;  %v2259_v32 = vld [vmem:[#allocation5 + $0x130] sm:$0xff] }
 0x3c2   :  { %5016 = vmatprep.subr.mxu1 %v1775_v21 }
 0x3c3   :  { %5017 = vmatpush3.msra.mxu1 %v1775_v21  ;;  %v2597_v21 = vld [vmem:[#allocation5 + $0x1a0] sm:$0xff] }
 0x3c4   :  { %5018 = vmatprep.subr.mxu1 %v1774_v33 }
 0x3c5   :  { %5019 = vmatpush3.msra.mxu1 %v1774_v33  ;;  %v2430_v33 = vld [vmem:[#allocation7 + $0x178] sm:$0xff] }
 0x3c6   :  { %5020 = vmatprep.subr.mxu1 %v1773_v27 }
 0x3c7   :  { %5021 = vmatpush3.msra.mxu1 %v1773_v27  ;;  %v2599_v27 = vld [vmem:[#allocation5 + $0x1b0] sm:$0xff] }
 0x3c8   :  { %5022 = vmatprep.subr.mxu1 %v1772_v34 }
 0x3c9   :  { %5023 = vmatpush3.msra.mxu1 %v1772_v34  ;;  %v2429_v34 = vld [vmem:[#allocation7 + $0x170] sm:$0xff] }
 0x3ca   :  { %5024 = vmatprep.subr.mxu1 %v1771_v17 }
 0x3cb   :  { %5025 = vmatpush3.msra.mxu1 %v1771_v17  ;;  %v2600_v17 = vld [vmem:[#allocation5 + $0x1b8] sm:$0xff] }
 0x3cc   :  { %5026 = vmatprep.subr.mxu1 %v1770_v36 }
 0x3cd   :  { %5027 = vmatpush3.msra.mxu1 %v1770_v36  ;;  %v2427_v36 = vld [vmem:[#allocation7 + $0x160] sm:$0xff] }
 0x3ce   :  { %5028 = vmatprep.subr.mxu1 %v1769_v26 }
 0x3cf   :  { %5029 = vmatpush3.msra.mxu1 %v1769_v26  ;;  %v2426_v26 = vld [vmem:[#allocation7 + $0x158] sm:$0xff] }
 0x3d0   :  { %5030 = vmatprep.subr.mxu1 %v1768_v41 }
 0x3d1   :  { %5031 = vmatpush3.msra.mxu1 %v1768_v41  ;;  %v2602_v41 = vld [vmem:[#allocation5 + $0x1c8] sm:$0xff] }
 0x3d2   :  { %5032 = vmatprep.subr.mxu1 %v1767_v45 }
 0x3d3   :  { %5033 = vmatpush3.msra.mxu1 %v1767_v45  ;;  %v2603_v45 = vld [vmem:[#allocation5 + $0x1d0] sm:$0xff] }
 0x3d4   :  { %5114 = vmatprep.subr.mxu1 %v2430_v33 }
 0x457   :  { %v4868_v56 = vpop.f32.mrf.mxu0  ;;  %v4924_v57 = vpop.f32.mrf.mxu1 }
 0x459   :  { %v1688_v59 = vpop.f32.mrf.mxu0  ;;  %v1866_v7 = vpop.f32.mrf.mxu1 }
 0x45a   :  { %4978 = vmatprep.mubr.f32.mxu0 %v1866_v7  ;;  %5034 = vmatprep.mubr.f32.mxu1 %v1688_v59  ;;  %v2604_v59 = vld [vmem:[#allocation5 + $0x1d8] sm:$0xff]  ;;  %v2605_v7 = vld [vmem:[#allocation5 + $0x1e0] sm:$0xff] }
 0x45b   :  { %v4927_v53 = vpop.f32.mrf.mxu1  ;;  %4979 = vmatmul.mubr.f32.vlgmr.msra.gmra.mxu0 %v4924_v57  ;;  %5035 = vmatmul.mubr.f32.vlgmr.msra.gmra.mxu1 %v4868_v56  ;;  %v2425_v56 = vld [vmem:[#allocation7 + $0x150] sm:$0xff]  ;;  %v2424_v57 = vld [vmem:[#allocation7 + $0x148] sm:$0xff] }
 0x45c   :  { %v4871_v35 = vpop.f32.mrf.mxu0  ;;  %5059 = vmatpush3.msra.mxu0 %v6270_v37  ;;  %5115 = vmatpush3.msra.mxu1 %v2430_v33 }
 0x45d   :  { %5060 = vmatprep.subr.mxu0 %v6275_v58  ;;  %v1876_v52 = vpop.f32.mrf.mxu1  ;;  %5116 = vmatprep.subr.mxu1 %v2429_v34 }
 0x45e   :  { %v1698_v5 = vpop.f32.mrf.mxu0  ;;  %5061 = vmatpush3.msra.mxu0 %v6275_v58  ;;  %4981 = vmatprep.mubr.f32.mxu0 %v1876_v52  ;;  %v2606_v52 = vld [vmem:[#allocation5 + $0x1e8] sm:$0xff] }
 0x45f   :  { %5037 = vmatprep.mubr.f32.mxu1 %v1698_v5  ;;  %5062 = vmatprep.subr.mxu0 %v6283_v54  ;;  %v4930_v47 = vpop.f32.mrf.mxu1  ;;  %v2607_v5 = vld [vmem:[#allocation5 + $0x1f0] sm:$0xff] }
 0x460   :  { %v4874_v22 = vpop.f32.mrf.mxu0  ;;  %4982 = vmatmul.mubr.f32.gmra.mxu0 %v4927_v53  ;;  %5038 = vmatmul.mubr.f32.gmra.mxu1 %v4871_v35  ;;  %v2423_v53 = vld [vmem:[#allocation7 + $0x140] sm:$0xff]  ;;  %v2422_v35 = vld [vmem:[#allocation7 + $0x138] sm:$0xff] }
 0x461   :  { %5063 = vmatpush3.msra.mxu0 %v6283_v54  ;;  %v1886_v23 = vpop.f32.mrf.mxu1  ;;  %5117 = vmatpush3.msra.mxu1 %v2429_v34 }
 0x462   :  { %5064 = vmatprep.subr.mxu0 %v6293_v62  ;;  %v1708_v18 = vpop.f32.mrf.mxu0  ;;  %4984 = vmatprep.mubr.f32.mxu0 %v1886_v23  ;;  %v2608_v23 = vld [vmem:[#allocation5 + $0x1f8] sm:$0xff] }
 0x463   :  { %5065 = vmatpush3.msra.mxu0 %v6293_v62  ;;  %5040 = vmatprep.mubr.f32.mxu1 %v1708_v18  ;;  %v4933_v20 = vpop.f32.mrf.mxu1  ;;  %v2419_v18 = vld [vmem:[#allocation7 + $0x120] sm:$0xff] }
 0x464   :  { %5066 = vmatprep.subr.mxu0 %v6301_v24  ;;  %v4877_v49 = vpop.f32.mrf.mxu0  ;;  %4985 = vmatmul.mubr.f32.gmra.mxu0 %v4930_v47  ;;  %v2421_v47 = vld [vmem:[#allocation7 + $0x130] sm:$0xff] }
 0x465   :  { %5041 = vmatmul.mubr.f32.gmra.mxu1 %v4874_v22  ;;  %5067 = vmatpush3.msra.mxu0 %v6301_v24  ;;  %v1896_v28 = vpop.f32.mrf.mxu1  ;;  %v2420_v22 = vld [vmem:[#allocation7 + $0x128] sm:$0xff] }
 0x466   :  { %5068 = vmatprep.subr.mxu0 %v6310_v50  ;;  %v1718_v10 = vpop.f32.mrf.mxu0  ;;  %4987 = vmatprep.mubr.f32.mxu0 %v1896_v28  ;;  %v2416_v28 = vld [vmem:[#allocation7 + $0x108] sm:$0xff] }
 0x467   :  { %5069 = vmatpush3.msra.mxu0 %v6310_v50  ;;  %5043 = vmatprep.mubr.f32.mxu1 %v1718_v10  ;;  %v4936_v39 = vpop.f32.mrf.mxu1  ;;  %v2415_v10 = vld [vmem:[#allocation7 + $0x100] sm:$0xff] }
 0x468   :  { %5070 = vmatprep.subr.mxu0 %v6320_v14  ;;  %v4880_v13 = vpop.f32.mrf.mxu0  ;;  %4988 = vmatmul.mubr.f32.gmra.mxu0 %v4933_v20  ;;  %v2418_v20 = vld [vmem:[#allocation7 + $0x118] sm:$0xff] }
 0x469   :  { %5044 = vmatmul.mubr.f32.gmra.mxu1 %v4877_v49  ;;  %5071 = vmatpush3.msra.mxu0 %v6320_v14  ;;  %v1906_v16 = vpop.f32.mrf.mxu1  ;;  %v2417_v49 = vld [vmem:[#allocation7 + $0x110] sm:$0xff] }
 0x46a   :  { %5072 = vmatprep.subr.mxu0 %v6330_v46  ;;  %v1728_v48 = vpop.f32.mrf.mxu0  ;;  %4990 = vmatprep.mubr.f32.mxu0 %v1906_v16 }
 0x46b   :  { %5073 = vmatpush3.msra.mxu0 %v6330_v46  ;;  %5046 = vmatprep.mubr.f32.mxu1 %v1728_v48  ;;  %v4939_v43 = vpop.f32.mrf.mxu1 }
 0x46c   :  { %5074 = vmatprep.subr.mxu0 %v6340_v8  ;;  %v4883_v4 = vpop.f32.mrf.mxu0  ;;  %4991 = vmatmul.mubr.f32.gmra.mxu0 %v4936_v39  ;;  %v2770_v39 = vld [vmem:[#allocation7 + $0x1f8] sm:$0xff] }
 0x46d   :  { %5047 = vmatmul.mubr.f32.gmra.mxu1 %v4880_v13  ;;  %5075 = vmatpush3.msra.mxu0 %v6340_v8  ;;  %v1916_v51 = vpop.f32.mrf.mxu1 }
 0x46e   :  { %5076 = vmatprep.subr.mxu0 %v6350_v42  ;;  %v1738_v6 = vpop.f32.mrf.mxu0  ;;  %4993 = vmatprep.mubr.f32.mxu0 %v1916_v51 }
 0x46f   :  { %5077 = vmatpush3.msra.mxu0 %v6350_v42  ;;  %5049 = vmatprep.mubr.f32.mxu1 %v1738_v6  ;;  %v4942_v9 = vpop.f32.mrf.mxu1 }
 0x470   :  { %5078 = vmatprep.subr.mxu0 %v6360_v1  ;;  %v4886_v44 = vpop.f32.mrf.mxu0  ;;  %4994 = vmatmul.mubr.f32.gmra.mxu0 %v4939_v43 }
 0x471   :  { %5050 = vmatmul.mubr.f32.gmra.mxu1 %v4883_v4  ;;  %5079 = vmatpush3.msra.mxu0 %v6360_v1  ;;  %v1926_v55 = vpop.f32.mrf.mxu1 }
 0x472   :  { %5080 = vmatprep.subr.mxu0 %v6368_v40  ;;  %v1748_v2 = vpop.f32.mrf.mxu0  ;;  %4996 = vmatprep.mubr.f32.mxu0 %v1926_v55 }
 0x473   :  { %5081 = vmatpush3.msra.mxu0 %v6368_v40  ;;  %5052 = vmatprep.mubr.f32.mxu1 %v1748_v2  ;;  %v4945_v63 = vpop.f32.mrf.mxu1 }
 0x474   :  { %5082 = vmatprep.subr.mxu0 %v6375_v60  ;;  %v4889_v0 = vpop.f32.mrf.mxu0  ;;  %4997 = vmatmul.mubr.f32.gmra.mxu0 %v4942_v9 }
 0x475   :  { %5053 = vmatmul.mubr.f32.gmra.mxu1 %v4886_v44  ;;  %5083 = vmatpush3.msra.mxu0 %v6375_v60  ;;  %v1936_v12 = vpop.f32.mrf.mxu1 }
 0x476   :  { %5084 = vmatprep.subr.mxu0 %v6382_v11  ;;  %v1758_v3 = vpop.f32.mrf.mxu0  ;;  %4999 = vmatprep.mubr.f32.mxu0 %v1936_v12 }
 0x477   :  { %5085 = vmatpush3.msra.mxu0 %v6382_v11  ;;  %5055 = vmatprep.mubr.f32.mxu1 %v1758_v3 }
 0x478   :  { %5086 = vmatprep.subr.mxu0 %v6388_v15  ;;  %5000 = vmatmul.mubr.f32.gmra.mxu0 %v4945_v63 }
 0x479   :  { %5056 = vmatmul.mubr.f32.gmra.mxu1 %v4889_v0  ;;  %5087 = vmatpush3.msra.mxu0 %v6388_v15 }
 0x47a   :  { %5088 = vmatprep.subr.mxu0 %v6394_v19  ;;  %5090 = vmatprep.mubr.f32.mxu0 %v2253_v38 }
 0x47b   :  { %5089 = vmatpush3.msra.mxu0 %v6394_v19 }
 0x47c   :  { %5170 = vmatprep.subr.mxu0 %v6270_v37  ;;  %5091 = vmatmul.mubr.f32.vlgmr.msra.gmra.mxu0 %v2254_v61 }
 0x47d   :  { %5171 = vmatpush3.msra.mxu0 %v6270_v37  ;;  %5093 = vmatprep.mubr.f32.mxu0 %v2255_v25  ;;  %v2260_v37 = vld [vmem:[#allocation5 + $0x138] sm:$0xff] }
 0x47e   :  { %5172 = vmatprep.subr.mxu0 %v6275_v58 }
 0x47f   :  { %5173 = vmatpush3.msra.mxu0 %v6275_v58  ;;  %v2261_v58 = vld [vmem:[#allocation5 + $0x140] sm:$0xff] }
 0x480   :  { %5174 = vmatprep.subr.mxu0 %v6283_v54  ;;  %5094 = vmatmul.mubr.f32.gmra.mxu0 %v2256_v29 }
 0x481   :  { %5175 = vmatpush3.msra.mxu0 %v6283_v54  ;;  %5096 = vmatprep.mubr.f32.mxu0 %v2257_v30  ;;  %v2262_v54 = vld [vmem:[#allocation5 + $0x148] sm:$0xff] }
 0x482   :  { %5176 = vmatprep.subr.mxu0 %v6293_v62 }
 0x483   :  { %5177 = vmatpush3.msra.mxu0 %v6293_v62  ;;  %v2263_v62 = vld [vmem:[#allocation5 + $0x150] sm:$0xff] }
 0x484   :  { %5178 = vmatprep.subr.mxu0 %v6301_v24  ;;  %5097 = vmatmul.mubr.f32.gmra.mxu0 %v2258_v31 }
 0x485   :  { %5179 = vmatpush3.msra.mxu0 %v6301_v24  ;;  %5099 = vmatprep.mubr.f32.mxu0 %v2259_v32  ;;  %v2264_v24 = vld [vmem:[#allocation5 + $0x158] sm:$0xff] }
 0x486   :  { %5180 = vmatprep.subr.mxu0 %v6310_v50 }
 0x487   :  { %5181 = vmatpush3.msra.mxu0 %v6310_v50  ;;  %v2265_v50 = vld [vmem:[#allocation5 + $0x160] sm:$0xff] }
 0x488   :  { %5182 = vmatprep.subr.mxu0 %v6320_v14  ;;  %5100 = vmatmul.mubr.f32.gmra.mxu0 %v2260_v37 }
 0x489   :  { %5183 = vmatpush3.msra.mxu0 %v6320_v14  ;;  %5102 = vmatprep.mubr.f32.mxu0 %v2261_v58  ;;  %v2266_v14 = vld [vmem:[#allocation5 + $0x168] sm:$0xff] }
 0x48a   :  { %5184 = vmatprep.subr.mxu0 %v6330_v46 }
 0x48b   :  { %5185 = vmatpush3.msra.mxu0 %v6330_v46  ;;  %v2267_v46 = vld [vmem:[#allocation5 + $0x170] sm:$0xff] }
 0x48c   :  { %5186 = vmatprep.subr.mxu0 %v6340_v8  ;;  %5103 = vmatmul.mubr.f32.gmra.mxu0 %v2262_v54 }
 0x48d   :  { %5187 = vmatpush3.msra.mxu0 %v6340_v8  ;;  %5105 = vmatprep.mubr.f32.mxu0 %v2263_v62  ;;  %v2268_v8 = vld [vmem:[#allocation5 + $0x178] sm:$0xff] }
 0x48e   :  { %5188 = vmatprep.subr.mxu0 %v6350_v42 }
 0x48f   :  { %5189 = vmatpush3.msra.mxu0 %v6350_v42  ;;  %v2593_v42 = vld [vmem:[#allocation5 + $0x180] sm:$0xff] }
 0x490   :  { %5190 = vmatprep.subr.mxu0 %v6360_v1  ;;  %5106 = vmatmul.mubr.f32.gmra.mxu0 %v2264_v24 }
 0x491   :  { %5191 = vmatpush3.msra.mxu0 %v6360_v1  ;;  %5108 = vmatprep.mubr.f32.mxu0 %v2265_v50  ;;  %v2594_v1 = vld [vmem:[#allocation5 + $0x188] sm:$0xff] }
 0x492   :  { %5192 = vmatprep.subr.mxu0 %v6368_v40 }
 0x493   :  { %5193 = vmatpush3.msra.mxu0 %v6368_v40  ;;  %v2595_v40 = vld [vmem:[#allocation5 + $0x190] sm:$0xff] }
 0x494   :  { %5194 = vmatprep.subr.mxu0 %v6375_v60  ;;  %5109 = vmatmul.mubr.f32.gmra.mxu0 %v2266_v14 }
 0x495   :  { %5195 = vmatpush3.msra.mxu0 %v6375_v60  ;;  %5111 = vmatprep.mubr.f32.mxu0 %v2267_v46  ;;  %v2596_v60 = vld [vmem:[#allocation5 + $0x198] sm:$0xff] }
 0x496   :  { %5196 = vmatprep.subr.mxu0 %v6382_v11 }
 0x497   :  { %5197 = vmatpush3.msra.mxu0 %v6382_v11  ;;  %v2598_v11 = vld [vmem:[#allocation5 + $0x1a8] sm:$0xff] }
 0x498   :  { %5198 = vmatprep.subr.mxu0 %v6388_v15  ;;  %5112 = vmatmul.mubr.f32.gmra.mxu0 %v2268_v8 }
 0x499   :  { %5199 = vmatpush3.msra.mxu0 %v6388_v15  ;;  %5202 = vmatprep.mubr.f32.mxu0 %v2593_v42  ;;  %v2428_v15 = vld [vmem:[#allocation7 + $0x168] sm:$0xff] }
 0x49a   :  { %5200 = vmatprep.subr.mxu0 %v6394_v19  ;;  %5118 = vmatprep.subr.mxu1 %v2428_v15 }
 0x49b   :  { %5201 = vmatpush3.msra.mxu0 %v6394_v19  ;;  %v2601_v19 = vld [vmem:[#allocation5 + $0x1c0] sm:$0xff]  ;;  %5119 = vmatpush3.msra.mxu1 %v2428_v15 }
 0x49c   :  { %5203 = vmatmul.mubr.f32.vlgmr.msra.gmra.mxu0 %v2594_v1  ;;  %5120 = vmatprep.subr.mxu1 %v2427_v36 }
 0x49d   :  { %5205 = vmatprep.mubr.f32.mxu0 %v2595_v40  ;;  %5121 = vmatpush3.msra.mxu1 %v2427_v36 }
 0x49e   :  { %5122 = vmatprep.subr.mxu1 %v2426_v26 }
 0x49f   :  { %5123 = vmatpush3.msra.mxu1 %v2426_v26 }
 0x4a0   :  { %5206 = vmatmul.mubr.f32.gmra.mxu0 %v2596_v60  ;;  %5124 = vmatprep.subr.mxu1 %v2425_v56 }
 0x4a1   :  { %5208 = vmatprep.mubr.f32.mxu0 %v2597_v21  ;;  %5125 = vmatpush3.msra.mxu1 %v2425_v56 }
 0x4a2   :  { %5126 = vmatprep.subr.mxu1 %v2424_v57 }
 0x4a3   :  { %5127 = vmatpush3.msra.mxu1 %v2424_v57  ;;  %v2768_v57 = vld [vmem:[#allocation7 + $0x1e8] sm:$0xff] }
 0x4a4   :  { %5209 = vmatmul.mubr.f32.gmra.mxu0 %v2598_v11  ;;  %5128 = vmatprep.subr.mxu1 %v2423_v53 }
 0x4a5   :  { %5211 = vmatprep.mubr.f32.mxu0 %v2599_v27  ;;  %5129 = vmatpush3.msra.mxu1 %v2423_v53 }
 0x4a6   :  { %5130 = vmatprep.subr.mxu1 %v2422_v35 }
 0x4a7   :  { %5131 = vmatpush3.msra.mxu1 %v2422_v35  ;;  %v2766_v35 = vld [vmem:[#allocation7 + $0x1d8] sm:$0xff] }
 0x4a8   :  { %5212 = vmatmul.mubr.f32.gmra.mxu0 %v2600_v17  ;;  %5132 = vmatprep.subr.mxu1 %v2421_v47 }
 0x4a9   :  { %5214 = vmatprep.mubr.f32.mxu0 %v2601_v19  ;;  %5133 = vmatpush3.msra.mxu1 %v2421_v47 }
 0x4aa   :  { %5134 = vmatprep.subr.mxu1 %v2420_v22 }
 0x4ab   :  { %5135 = vmatpush3.msra.mxu1 %v2420_v22  ;;  %v2764_v22 = vld [vmem:[#allocation7 + $0x1c8] sm:$0xff] }
 0x4ac   :  { %5215 = vmatmul.mubr.f32.gmra.mxu0 %v2602_v41  ;;  %5136 = vmatprep.subr.mxu1 %v2419_v18 }
 0x4ad   :  { %5217 = vmatprep.mubr.f32.mxu0 %v2603_v45  ;;  %5137 = vmatpush3.msra.mxu1 %v2419_v18  ;;  %v2769_v45 = vld [vmem:[#allocation7 + $0x1f0] sm:$0xff]  ;;  %v2763_v18 = vld [vmem:[#allocation7 + $0x1c0] sm:$0xff] }
 0x4ae   :  { %5138 = vmatprep.subr.mxu1 %v2418_v20 }
 0x4af   :  { %5139 = vmatpush3.msra.mxu1 %v2418_v20 }
 0x4b0   :  { %5218 = vmatmul.mubr.f32.gmra.mxu0 %v2604_v59  ;;  %5140 = vmatprep.subr.mxu1 %v2417_v49 }
 0x4b1   :  { %5220 = vmatprep.mubr.f32.mxu0 %v2605_v7  ;;  %5141 = vmatpush3.msra.mxu1 %v2417_v49  ;;  %v2767_v7 = vld [vmem:[#allocation7 + $0x1e0] sm:$0xff]  ;;  %v2762_v49 = vld [vmem:[#allocation7 + $0x1b8] sm:$0xff] }
 0x4b2   :  { %5142 = vmatprep.subr.mxu1 %v2416_v28 }
 0x4b3   :  { %5143 = vmatpush3.msra.mxu1 %v2416_v28 }
 0x4b4   :  { %5221 = vmatmul.mubr.f32.gmra.mxu0 %v2606_v52  ;;  %5144 = vmatprep.subr.mxu1 %v2415_v10 }
 0x4b5   :  { %5223 = vmatprep.mubr.f32.mxu0 %v2607_v5  ;;  %5145 = vmatpush3.msra.mxu1 %v2415_v10  ;;  %v2765_v5 = vld [vmem:[#allocation7 + $0x1d0] sm:$0xff] }
 0x4b6   :  { %5226 = vmatprep.subr.mxu1 %v2770_v39  ;;  %v2761_v10 = vld [vmem:[#allocation7 + $0x1b0] sm:$0xff] }
 0x4b8   :  { %5224 = vmatmul.mubr.f32.gmra.mxu0 %v2608_v23 }
 0x51b   :  { %v4980_v13 = vpop.f32.mrf.mxu0  ;;  %v5036_v16 = vpop.f32.mrf.mxu1 }
 0x51c   :  { %v6472_v48 = vadd.f32 %v5036_v16, %v4980_v13  ;;  %v2760_v13 = vld [vmem:[#allocation7 + $0x1a8] sm:$0xff] }
 0x51d   :  { %v2028_v43 = vpop.f32.mrf.mxu0  ;;  %v2173_v4 = vpop.f32.mrf.mxu1 }
 0x51e   :  { %v6474_v51 = vadd.f32 %v2173_v4, %v2028_v43  ;;  %v2759_v43 = vld [vmem:[#allocation7 + $0x1a0] sm:$0xff] }
 0x520   :  { %v4983_v6 = vpop.f32.mrf.mxu0  ;;  %v5039_v9 = vpop.f32.mrf.mxu1 }
 0x521   :  { %v6476_v44 = vadd.f32 %v5039_v9, %v4983_v6  ;;  %v2758_v6 = vld [vmem:[#allocation7 + $0x198] sm:$0xff] }
 0x522   :  { %v2038_v55 = vpop.f32.mrf.mxu0  ;;  %v2183_v2 = vpop.f32.mrf.mxu1 }
 0x523   :  { %v6478_v63 = vadd.f32 %v2183_v2, %v2038_v55  ;;  %v2757_v55 = vld [vmem:[#allocation7 + $0x190] sm:$0xff] }
 0x524   :  { %v4986_v0 = vpop.f32.mrf.mxu0 }
 0x525   :  { %v5042_v12 = vpop.f32.mrf.mxu1 }
 0x526   :  { %v6480_v3 = vadd.f32 %v5042_v12, %v4986_v0  ;;  %v2048_v38 = vpop.f32.mrf.mxu0  ;;  %v2756_v0 = vld [vmem:[#allocation7 + $0x188] sm:$0xff] }
 0x527   :  { %v2193_v61 = vpop.f32.mrf.mxu1 }
 0x528   :  { %v6482_v25 = vadd.f32 %v2193_v61, %v2048_v38  ;;  %v4989_v29 = vpop.f32.mrf.mxu0  ;;  %v2755_v38 = vld [vmem:[#allocation7 + $0x180] sm:$0xff] }
 0x529   :  { %v5045_v30 = vpop.f32.mrf.mxu1 }
 0x52a   :  { %v6484_v31 = vadd.f32 %v5045_v30, %v4989_v29  ;;  %v2058_v32 = vpop.f32.mrf.mxu0 }
 0x52b   :  { %v2203_v37 = vpop.f32.mrf.mxu1 }
 0x52c   :  { %v6486_v58 = vadd.f32 %v2203_v37, %v2058_v32  ;;  %v4992_v54 = vpop.f32.mrf.mxu0 }
 0x52d   :  { %v5048_v62 = vpop.f32.mrf.mxu1 }
 0x52e   :  { %v6488_v24 = vadd.f32 %v5048_v62, %v4992_v54  ;;  %v2068_v50 = vpop.f32.mrf.mxu0 }
 0x52f   :  { %v2213_v14 = vpop.f32.mrf.mxu1 }
 0x530   :  { %v6490_v46 = vadd.f32 %v2213_v14, %v2068_v50  ;;  %v4995_v8 = vpop.f32.mrf.mxu0 }
 0x531   :  { %v5051_v42 = vpop.f32.mrf.mxu1 }
 0x532   :  { %v6492_v1 = vadd.f32 %v5051_v42, %v4995_v8  ;;  %v2078_v40 = vpop.f32.mrf.mxu0 }
 0x533   :  { %v2223_v60 = vpop.f32.mrf.mxu1 }
 0x534   :  { %v6494_v21 = vadd.f32 %v2223_v60, %v2078_v40  ;;  %v4998_v33 = vpop.f32.mrf.mxu0 }
 0x535   :  { %v5054_v11 = vpop.f32.mrf.mxu1 }
 0x536   :  { %v6496_v27 = vadd.f32 %v5054_v11, %v4998_v33  ;;  %v2088_v34 = vpop.f32.mrf.mxu0 }
 0x537   :  { %v2233_v15 = vpop.f32.mrf.mxu1 }
 0x538   :  { %v6498_v17 = vadd.f32 %v2233_v15, %v2088_v34  ;;  %v6500_v19 = vpop.f32.mrf.mxu0  ;;  %v5665_v15 = vmov 0.0  }
 0x539   :  { %5282 = vmatprep.subr.mxu0 %v5665_v15  ;;  %5314 = vmatprep.mubr.msk.f32.mxu0 %vm5666_vm0, %v5665_v15 }
 0x53a   :  { %v6502_v36 = vpop.f32.mrf.mxu0 }
 0x53c   :  { %v5092_v26 = vpop.f32.mrf.mxu0 }
 0x53e   :  { %v2335_v41 = vpop.f32.mrf.mxu0 }
 0x53f   :  { %5146 = vmatprep.mubr.f32.mxu1 %v2335_v41 }
 0x540   :  { %v5095_v56 = vpop.f32.mrf.mxu0  ;;  %5147 = vmatmul.mubr.f32.vlgmr.msra.gmra.mxu1 %v5092_v26  ;;  %v5057_v26 = vpop.f32.mrf.mxu1 }
 0x541   :  { %5227 = vmatpush3.msra.mxu1 %v2770_v39 }
 0x542   :  { %v2345_v59 = vpop.f32.mrf.mxu0  ;;  %5228 = vmatprep.subr.mxu1 %v2769_v45  ;;  %v2243_v41 = vpop.f32.mrf.mxu1 }
 0x543   :  { %5149 = vmatprep.mubr.f32.mxu1 %v2345_v59  ;;  %5229 = vmatpush3.msra.mxu1 %v2769_v45 }
 0x544   :  { %v5098_v53 = vpop.f32.mrf.mxu0  ;;  %5150 = vmatmul.mubr.f32.gmra.mxu1 %v5095_v56  ;;  %5230 = vmatprep.subr.mxu1 %v2768_v57 }
 0x545   :  { %5231 = vmatpush3.msra.mxu1 %v2768_v57 }
 0x546   :  { %v2355_v52 = vpop.f32.mrf.mxu0  ;;  %5232 = vmatprep.subr.mxu1 %v2767_v7 }
 0x547   :  { %5152 = vmatprep.mubr.f32.mxu1 %v2355_v52  ;;  %5233 = vmatpush3.msra.mxu1 %v2767_v7 }
 0x548   :  { %v5101_v47 = vpop.f32.mrf.mxu0  ;;  %5153 = vmatmul.mubr.f32.gmra.mxu1 %v5098_v53  ;;  %5234 = vmatprep.subr.mxu1 %v2766_v35 }
 0x549   :  { %5235 = vmatpush3.msra.mxu1 %v2766_v35 }
 0x54a   :  { %v2365_v23 = vpop.f32.mrf.mxu0  ;;  %5236 = vmatprep.subr.mxu1 %v2765_v5 }
 0x54b   :  { %5155 = vmatprep.mubr.f32.mxu1 %v2365_v23  ;;  %5237 = vmatpush3.msra.mxu1 %v2765_v5 }
 0x54c   :  { %v5104_v20 = vpop.f32.mrf.mxu0  ;;  %5156 = vmatmul.mubr.f32.gmra.mxu1 %v5101_v47  ;;  %5238 = vmatprep.subr.mxu1 %v2764_v22 }
 0x54d   :  { %5239 = vmatpush3.msra.mxu1 %v2764_v22 }
 0x54e   :  { %v2375_v28 = vpop.f32.mrf.mxu0  ;;  %5240 = vmatprep.subr.mxu1 %v2763_v18 }
 0x54f   :  { %5158 = vmatprep.mubr.f32.mxu1 %v2375_v28  ;;  %5241 = vmatpush3.msra.mxu1 %v2763_v18 }
 0x550   :  { %v5107_v39 = vpop.f32.mrf.mxu0  ;;  %5159 = vmatmul.mubr.f32.gmra.mxu1 %v5104_v20  ;;  %5242 = vmatprep.subr.mxu1 %v2762_v49 }
 0x551   :  { %5243 = vmatpush3.msra.mxu1 %v2762_v49 }
 0x552   :  { %v2385_v16 = vpop.f32.mrf.mxu0  ;;  %5244 = vmatprep.subr.mxu1 %v2761_v10 }
 0x553   :  { %5161 = vmatprep.mubr.f32.mxu1 %v2385_v16  ;;  %5245 = vmatpush3.msra.mxu1 %v2761_v10 }
 0x554   :  { %v5110_v4 = vpop.f32.mrf.mxu0  ;;  %5162 = vmatmul.mubr.f32.gmra.mxu1 %v5107_v39  ;;  %5246 = vmatprep.subr.mxu1 %v2760_v13 }
 0x555   :  { %5247 = vmatpush3.msra.mxu1 %v2760_v13 }
 0x556   :  { %v2395_v9 = vpop.f32.mrf.mxu0  ;;  %5248 = vmatprep.subr.mxu1 %v2759_v43 }
 0x557   :  { %5164 = vmatprep.mubr.f32.mxu1 %v2395_v9  ;;  %5249 = vmatpush3.msra.mxu1 %v2759_v43 }
 0x558   :  { %v5113_v2 = vpop.f32.mrf.mxu0  ;;  %5165 = vmatmul.mubr.f32.gmra.mxu1 %v5110_v4  ;;  %5250 = vmatprep.subr.mxu1 %v2758_v6 }
 0x559   :  { %5251 = vmatpush3.msra.mxu1 %v2758_v6 }
 0x55a   :  { %v2405_v12 = vpop.f32.mrf.mxu0  ;;  %5252 = vmatprep.subr.mxu1 %v2757_v55 }
 0x55b   :  { %5167 = vmatprep.mubr.f32.mxu1 %v2405_v12  ;;  %5253 = vmatpush3.msra.mxu1 %v2757_v55 }
 0x55c   :  { %5168 = vmatmul.mubr.f32.gmra.mxu1 %v5113_v2  ;;  %v5204_v61 = vpop.f32.mrf.mxu0  ;;  %5254 = vmatprep.subr.mxu1 %v2756_v0 }
 0x55d   :  { %5255 = vmatpush3.msra.mxu1 %v2756_v0 }
 0x55e   :  { %v2675_v29 = vpop.f32.mrf.mxu0  ;;  %5256 = vmatprep.subr.mxu1 %v2755_v38 }
 0x55f   :  { %5257 = vmatpush3.msra.mxu1 %v2755_v38  ;;  %5258 = vmatprep.mubr.f32.mxu1 %v2675_v29 }
 0x560   :  { %v5207_v30 = vpop.f32.mrf.mxu0  ;;  %5259 = vmatmul.mubr.f32.vlgmr.msra.gmra.mxu1 %v5204_v61  ;;  %5317 = vmatprep.subr.mxu1 %v5665_v15  ;;  %v2249_v61 = vadd.f32 %v5057_v26, %v6500_v19 }
 0x562   :  { %v2685_v32 = vpop.f32.mrf.mxu0 }
 0x563   :  { %5261 = vmatprep.mubr.f32.mxu1 %v2685_v32 }
 0x564   :  { %v5210_v37 = vpop.f32.mrf.mxu0  ;;  %5262 = vmatmul.mubr.f32.gmra.mxu1 %v5207_v30  ;;  %v2244_v30 = vadd.f32 %v2243_v41, %v6502_v36 }
 0x566   :  { %v2695_v54 = vpop.f32.mrf.mxu0 }
 0x567   :  { %5264 = vmatprep.mubr.f32.mxu1 %v2695_v54 }
 0x568   :  { %v5213_v62 = vpop.f32.mrf.mxu0  ;;  %5265 = vmatmul.mubr.f32.gmra.mxu1 %v5210_v37 }
 0x56a   :  { %v2705_v50 = vpop.f32.mrf.mxu0 }
 0x56b   :  { %5267 = vmatprep.mubr.f32.mxu1 %v2705_v50 }
 0x56c   :  { %v5216_v14 = vpop.f32.mrf.mxu0  ;;  %5268 = vmatmul.mubr.f32.gmra.mxu1 %v5213_v62 }
 0x56e   :  { %v2715_v8 = vpop.f32.mrf.mxu0 }
 0x56f   :  { %5270 = vmatprep.mubr.f32.mxu1 %v2715_v8 }
 0x570   :  { %v5219_v42 = vpop.f32.mrf.mxu0  ;;  %5271 = vmatmul.mubr.f32.gmra.mxu1 %v5216_v14 }
 0x572   :  { %v2725_v40 = vpop.f32.mrf.mxu0 }
 0x573   :  { %5273 = vmatprep.mubr.f32.mxu1 %v2725_v40 }
 0x574   :  { %v5222_v60 = vpop.f32.mrf.mxu0  ;;  %5274 = vmatmul.mubr.f32.gmra.mxu1 %v5219_v42  ;;  %v6549_v42 = vld [vmem:[%s7038_s8] ss:$0 sm:$0xff]  ;;  %s5667_s8 = smov [#allocation8]  }
 0x575   :  { %s3624_s19 = sshll.u32 %s5667_s8, 4  ;;  %s3625_s19 = int_to_ptr.vmem [resolvable:$true] %s3624_s19 }
 0x576   :  { %v2735_v33 = vpop.f32.mrf.mxu0  ;;  %p5638_p2 = scmp.lt.s32.totalorder %s3625_s19, %s3625_s19 }
 0x577   :  { %5276 = vmatprep.mubr.f32.mxu1 %v2735_v33 }
 0x578   :  { %v5225_v11 = vpop.f32.mrf.mxu0  ;;  %5277 = vmatmul.mubr.f32.gmra.mxu1 %v5222_v60 }
 0x57a   :  { %v2745_v34 = vpop.f32.mrf.mxu0 }
 0x57b   :  { %5279 = vmatprep.mubr.f32.mxu1 %v2745_v34 }
 0x57c   :  { %5280 = vmatmul.mubr.f32.gmra.mxu1 %v5225_v11 }
 0x57d   :  { %5349 = vmatprep.mubr.msk.f32.mxu1 %vm5666_vm0, %v5665_v15 }
 0x600   :  { %v5148_v45 = vpop.f32.mrf.mxu1 }
 0x601   :  { %v6511_v56 = vadd.f32 %v5148_v45, %v6472_v48 }
 0x602   :  { %v2497_v57 = vpop.f32.mrf.mxu1 }
 0x603   :  { %v6514_v59 = vadd.f32 %v2497_v57, %v6474_v51 }
 0x604   :  { %v5151_v7 = vpop.f32.mrf.mxu1 }
 0x605   :  { %v6517_v53 = vadd.f32 %v5151_v7, %v6476_v44 }
 0x606   :  { %v2507_v35 = vpop.f32.mrf.mxu1 }
 0x607   :  { %v6520_v52 = vadd.f32 %v2507_v35, %v6478_v63 }
 0x608   :  { %v5154_v5 = vpop.f32.mrf.mxu1 }
 0x609   :  { %v6523_v47 = vadd.f32 %v5154_v5, %v6480_v3 }
 0x60a   :  { %v2517_v22 = vpop.f32.mrf.mxu1 }
 0x60b   :  { %v6526_v48 = vadd.f32 %v2517_v22, %v6482_v25 }
 0x60c   :  { %v5157_v23 = vpop.f32.mrf.mxu1 }
 0x60e   :  { %v6528_v18 = vpop.f32.mrf.mxu1 }
 0x610   :  { %v5160_v51 = vpop.f32.mrf.mxu1 }
 0x611   :  { %v2585_v41 = vadd.f32 %v5160_v51, %v6488_v24  ;;  %v2583_v24 = vadd.f32 %v5157_v23, %v6484_v31 }
 0x612   :  { %v2537_v20 = vpop.f32.mrf.mxu1 }
 0x614   :  { %v5163_v49 = vpop.f32.mrf.mxu1 }
 0x615   :  { %v2587_v19 = vadd.f32 %v5163_v49, %v6492_v1  ;;  %v2584_v1 = vadd.f32 %v2537_v20, %v6490_v46  ;;  %v2582_v46 = vadd.f32 %v6528_v18, %v6486_v58 }
 0x616   :  { %v2547_v44 = vpop.f32.mrf.mxu1 }
 0x618   :  { %v5166_v28 = vpop.f32.mrf.mxu1 }
 0x619   :  { %v2589_v32 = vadd.f32 %v5166_v28, %v6496_v27  ;;  %v2586_v27 = vadd.f32 %v2547_v44, %v6494_v21 }
 0x61a   :  { %v2557_v10 = vpop.f32.mrf.mxu1 }
 0x61b   :  { %v2588_v62 = vadd.f32 %v2557_v10, %v6498_v17 }
 0x61c   :  { %v5169_v39 = vpop.f32.mrf.mxu1 }
 0x61d   :  { %v2591_v37 = vadd.f32 %v5169_v39, %v2249_v61 }
 0x61e   :  { %v2567_v63 = vpop.f32.mrf.mxu1 }
 0x61f   :  { %v2590_v50 = vadd.f32 %v2567_v63, %v2244_v30  ;;  %v2971_v30 = vld [vmem:[%s7039_s9] sm:$0x3] }
 0x620   :  { %v6530_v13 = vpop.f32.mrf.mxu1 }
 0x622   :  { %v6532_v16 = vpop.f32.mrf.mxu1 }
 0x624   :  { %v6534_v3 = vpop.f32.mrf.mxu1 }
 0x626   :  { %v6536_v43 = vpop.f32.mrf.mxu1 }
 0x628   :  { %v6538_v25 = vpop.f32.mrf.mxu1 }
 0x629   :  { %v2921_v58 = vadd.f32 %v6538_v25, %v6523_v47  ;;  %v2919_v47 = vadd.f32 %v6534_v3, %v6517_v53  ;;  %v2917_v53 = vadd.f32 %v6530_v13, %v6511_v56 }
 0x62a   :  { %v6540_v4 = vpop.f32.mrf.mxu1 }
 0x62b   :  { %v2920_v63 = vadd.f32 %v6540_v4, %v6526_v48  ;;  %v2944_v25 = vadd.f32 %v6549_v42, %v2921_v58  ;;  %v2918_v48 = vadd.f32 %v6536_v43, %v6520_v52  ;;  %v2942_v3 = vadd.f32 %v6549_v42, %v2919_v47  ;;  %v3042_v58 = vld [vmem:[%s7040_s10] sm:$0xff] }
 0x62c   :  { %v5269_v6 = vpop.f32.mrf.mxu1  ;;  %v2916_v52 = vadd.f32 %v6532_v16, %v6514_v59  ;;  %v2940_v56 = vadd.f32 %v6549_v42, %v2917_v53  ;;  %v3708_v53 = vld [vmem:[%s7040_s10 + $0x120] sm:$0xff] }
 0x62d   :  { %v2923_v20 = vadd.f32 %v5269_v6, %v2583_v24  ;;  %v2943_v4 = vadd.f32 %v6549_v42, %v2920_v63  ;;  %v2941_v43 = vadd.f32 %v6549_v42, %v2918_v48  ;;  %v6653_v13 = vmax.f32 %v2942_v3, 0.0  ;;  %v3046_v24 = vld [vmem:[%s7040_s10 + $0x20] sm:$0xff]  ;;  %v3711_v48 = vld [vmem:[%s7040_s10 + $0x138] sm:$0xff] }
 0x62e   :  { %v2867_v9 = vpop.f32.mrf.mxu1  ;;  %v2939_v59 = vadd.f32 %v6549_v42, %v2916_v52  ;;  %v3707_v3 = vld [vmem:[%s7040_s10 + $0x118] sm:$0xff]  ;;  %v3705_v52 = vld [vmem:[%s7040_s10 + $0x108] sm:$0xff] }
 0x62f   :  { %v2922_v23 = vadd.f32 %v2867_v9, %v2582_v46  ;;  %v2946_v18 = vadd.f32 %v6549_v42, %v2923_v20  ;;  %v6660_v16 = vmax.f32 %v2941_v43, 0.0  ;;  %v3689_v46 = vld [vmem:[%s7040_s10 + $0x90] sm:$0xff]  ;;  %v3704_v43 = vld [vmem:[%s7040_s10 + $0x100] sm:$0xff] }
 0x630   :  { %v5272_v55 = vpop.f32.mrf.mxu1  ;;  %v6672_v61 = vmax.f32 %v2939_v59, 0.0  ;;  %v3044_v20 = vld [vmem:[%s7040_s10 + $0x10] sm:$0xff] }
 0x631   :  { %v2925_v21 = vadd.f32 %v5272_v55, %v2585_v41  ;;  %v2945_v6 = vadd.f32 %v6549_v42, %v2922_v23  ;;  %v6619_v55 = vmax.f32 %v2946_v18, 0.0  ;;  %v3049_v41 = vld [vmem:[%s7040_s10 + $0x38] sm:$0xff]  ;;  %v3043_v23 = vld [vmem:[%s7040_s10 + $0x8] sm:$0xff] }
 0x632   :  { %v2877_v2 = vpop.f32.mrf.mxu1 }
 0x633   :  { %v2924_v22 = vadd.f32 %v2877_v2, %v2584_v1  ;;  %v2948_v44 = vadd.f32 %v6549_v42, %v2925_v21  ;;  %v6628_v2 = vmax.f32 %v2945_v6, 0.0  ;;  %v3692_v1 = vld [vmem:[%s7040_s10 + $0xa8] sm:$0xff] }
 0x634   :  { %v5275_v0 = vpop.f32.mrf.mxu1  ;;  %v3047_v21 = vld [vmem:[%s7040_s10 + $0x28] sm:$0xff] }
 0x635   :  { %v2927_v11 = vadd.f32 %v5275_v0, %v2587_v19  ;;  %v2947_v28 = vadd.f32 %v6549_v42, %v2924_v22  ;;  %v6601_v39 = vmax.f32 %v2948_v44, 0.0  ;;  %v6637_v0 = vmax.f32 %v2944_v25, 0.0  ;;  %v3053_v19 = vld [vmem:[%s7040_s10 + $0x58] sm:$0xff]  ;;  %v3688_v44 = vld [vmem:[%s7040_s10 + $0x88] sm:$0xff]  ;;  %v3703_v25 = vld [vmem:[%s7039_s9 + $0x4] sm:$0x3] }
 0x636   :  { %v2887_v12 = vpop.f32.mrf.mxu1  ;;  %v3690_v22 = vld [vmem:[%s7040_s10 + $0x98] sm:$0xff] }
 0x637   :  { %v2926_v45 = vadd.f32 %v2887_v12, %v2586_v27  ;;  %v2950_v35 = vadd.f32 %v6549_v42, %v2927_v11  ;;  %v6610_v9 = vmax.f32 %v2947_v28, 0.0  ;;  %v6646_v12 = vmax.f32 %v2943_v4, 0.0  ;;  %v3051_v27 = vld [vmem:[%s7040_s10 + $0x48] sm:$0xff]  ;;  %v3695_v11 = vld [vmem:[%s7040_s10 + $0xc0] sm:$0xff]  ;;  %v3710_v4 = vld [vmem:[%s7040_s10 + $0x130] sm:$0xff] }
 0x638   :  { %v5278_v38 = vpop.f32.mrf.mxu1  ;;  %v3687_v28 = vld [vmem:[%s7040_s10 + $0x80] sm:$0xff] }
 0x639   :  { %v2929_v14 = vadd.f32 %v5278_v38, %v2589_v32  ;;  %v2949_v51 = vadd.f32 %v6549_v42, %v2926_v45  ;;  %v6585_v31 = vmax.f32 %v2950_v35, 0.0  ;;  %v6666_v38 = vmax.f32 %v2940_v56, 0.0  ;;  %v3702_v32 = vld [vmem:[%s7040_s10 + $0xf8] sm:$0xff]  ;;  %v3693_v45 = vld [vmem:[%s7040_s10 + $0xb0] sm:$0xff]  ;;  %v3691_v35 = vld [vmem:[%s7040_s10 + $0xa0] sm:$0xff] }
 0x63a   :  { %v2897_v29 = vpop.f32.mrf.mxu1 }
 0x63b   :  { %v2928_v60 = vadd.f32 %v2897_v29, %v2588_v62  ;;  %v2952_v17 = vadd.f32 %v6549_v42, %v2929_v14  ;;  %v6592_v10 = vmax.f32 %v2949_v51, 0.0  ;;  %v3686_v29 = vld [vmem:[%s7039_s9 + $0x2] sm:$0x3]  ;;  %v3056_v62 = vld [vmem:[%s7040_s10 + $0x70] sm:$0xff]  ;;  %v3055_v14 = vld [vmem:[%s7040_s10 + $0x68] sm:$0xff] }
 0x63c   :  { %v5281_v54 = vpop.f32.mrf.mxu1  ;;  %v3045_v51 = vld [vmem:[%s7040_s10 + $0x18] sm:$0xff] }
 0x63d   :  { %v2931_v8 = vadd.f32 %v5281_v54, %v2591_v37  ;;  %v2951_v57 = vadd.f32 %v6549_v42, %v2928_v60  ;;  %v6568_v5 = vmax.f32 %v2952_v17, 0.0  ;;  %v3057_v37 = vld [vmem:[%s7040_s10 + $0x78] sm:$0xff]  ;;  %v3701_v54 = vld [vmem:[%s7040_s10 + $0xf0] sm:$0xff]  ;;  %v3050_v17 = vld [vmem:[%s7040_s10 + $0x40] sm:$0xff] }
 0x63e   :  { %v2907_v40 = vpop.f32.mrf.mxu1  ;;  %v3697_v60 = vld [vmem:[%s7040_s10 + $0xd0] sm:$0xff] }
 0x63f   :  { %v2954_v36 = vadd.f32 %v6549_v42, %v2931_v8  ;;  %v2930_v33 = vadd.f32 %v2907_v40, %v2590_v50  ;;  %v6576_v49 = vmax.f32 %v2951_v57, 0.0  ;;  %v3700_v50 = vld [vmem:[%s7040_s10 + $0xe8] sm:$0xff]  ;;  %v3699_v8 = vld [vmem:[%s7040_s10 + $0xe0] sm:$0xff]  ;;  %v3698_v40 = vld [vmem:[%s7040_s10 + $0xd8] sm:$0xff] }
 0x640   :  { %v3048_v57 = vld [vmem:[%s7040_s10 + $0x30] sm:$0xff] }
 0x641   :  { %v6555_v34 = vmax.f32 %v2954_v36, 0.0  ;;  %v2953_v26 = vadd.f32 %v6549_v42, %v2930_v33  ;;  %v3054_v42 = vld [vmem:[%s7040_s10 + $0x60] sm:$0xff]  ;;  %v3052_v36 = vld [vmem:[%s7040_s10 + $0x50] sm:$0xff]  ;;  %v3696_v33 = vld [vmem:[%s7040_s10 + $0xc8] sm:$0xff] }
 0x643   :  { %v6560_v7 = vmax.f32 %v2953_v26, 0.0  ;;  %5283 = vmatpush3.msra.mxu0 %v6555_v34  ;;  %5318 = vmatpush3.msra.mxu1 %v6555_v34  ;;  %v3694_v26 = vld [vmem:[%s7040_s10 + $0xb8] sm:$0xff] }
 0x644   :  { %5284 = vmatprep.subr.mxu0 %v5665_v15  ;;  %5319 = vmatprep.subr.mxu1 %v5665_v15 }
 0x645   :  { %5285 = vmatpush3.msra.mxu0 %v6560_v7  ;;  %5320 = vmatpush3.msra.mxu1 %v6560_v7 }
 0x646   :  { %5286 = vmatprep.subr.mxu0 %v5665_v15  ;;  %5321 = vmatprep.subr.mxu1 %v5665_v15 }
 0x647   :  { %5287 = vmatpush3.msra.mxu0 %v6568_v5  ;;  %5322 = vmatpush3.msra.mxu1 %v6568_v5 }
 0x648   :  { %5288 = vmatprep.subr.mxu0 %v5665_v15  ;;  %5323 = vmatprep.subr.mxu1 %v5665_v15 }
 0x649   :  { %5289 = vmatpush3.msra.mxu0 %v6576_v49  ;;  %5324 = vmatpush3.msra.mxu1 %v6576_v49 }
 0x64a   :  { %5290 = vmatprep.subr.mxu0 %v5665_v15  ;;  %5325 = vmatprep.subr.mxu1 %v5665_v15 }
 0x64b   :  { %5291 = vmatpush3.msra.mxu0 %v6585_v31  ;;  %5326 = vmatpush3.msra.mxu1 %v6585_v31 }
 0x64c   :  { %5292 = vmatprep.subr.mxu0 %v5665_v15  ;;  %5327 = vmatprep.subr.mxu1 %v5665_v15 }
 0x64d   :  { %5293 = vmatpush3.msra.mxu0 %v6592_v10  ;;  %5328 = vmatpush3.msra.mxu1 %v6592_v10 }
 0x64e   :  { %5294 = vmatprep.subr.mxu0 %v5665_v15  ;;  %5329 = vmatprep.subr.mxu1 %v5665_v15 }
 0x64f   :  { %5295 = vmatpush3.msra.mxu0 %v6601_v39  ;;  %5330 = vmatpush3.msra.mxu1 %v6601_v39 }
 0x650   :  { %5296 = vmatprep.subr.mxu0 %v5665_v15  ;;  %5331 = vmatprep.subr.mxu1 %v5665_v15 }
 0x651   :  { %5297 = vmatpush3.msra.mxu0 %v6610_v9  ;;  %5332 = vmatpush3.msra.mxu1 %v6610_v9 }
 0x652   :  { %5298 = vmatprep.subr.mxu0 %v5665_v15  ;;  %5333 = vmatprep.subr.mxu1 %v5665_v15 }
 0x653   :  { %5299 = vmatpush3.msra.mxu0 %v6619_v55  ;;  %5334 = vmatpush3.msra.mxu1 %v6619_v55 }
 0x654   :  { %5300 = vmatprep.subr.mxu0 %v5665_v15  ;;  %5335 = vmatprep.subr.mxu1 %v5665_v15 }
 0x655   :  { %5301 = vmatpush3.msra.mxu0 %v6628_v2  ;;  %5336 = vmatpush3.msra.mxu1 %v6628_v2 }
 0x656   :  { %5302 = vmatprep.subr.mxu0 %v5665_v15  ;;  %5337 = vmatprep.subr.mxu1 %v5665_v15 }
 0x657   :  { %5303 = vmatpush3.msra.mxu0 %v6637_v0  ;;  %5338 = vmatpush3.msra.mxu1 %v6637_v0 }
 0x658   :  { %5304 = vmatprep.subr.mxu0 %v5665_v15  ;;  %5339 = vmatprep.subr.mxu1 %v5665_v15 }
 0x659   :  { %5305 = vmatpush3.msra.mxu0 %v6646_v12  ;;  %5340 = vmatpush3.msra.mxu1 %v6646_v12 }
 0x65a   :  { %5306 = vmatprep.subr.mxu0 %v5665_v15  ;;  %5341 = vmatprep.subr.mxu1 %v5665_v15 }
 0x65b   :  { %5307 = vmatpush3.msra.mxu0 %v6653_v13  ;;  %5342 = vmatpush3.msra.mxu1 %v6653_v13 }
 0x65c   :  { %5308 = vmatprep.subr.mxu0 %v5665_v15  ;;  %5343 = vmatprep.subr.mxu1 %v5665_v15 }
 0x65d   :  { %5309 = vmatpush3.msra.mxu0 %v6660_v16  ;;  %5344 = vmatpush3.msra.mxu1 %v6660_v16 }
 0x65e   :  { %5310 = vmatprep.subr.mxu0 %v5665_v15  ;;  %5345 = vmatprep.subr.mxu1 %v5665_v15 }
 0x65f   :  { %5311 = vmatpush3.msra.mxu0 %v6666_v38  ;;  %5346 = vmatpush3.msra.mxu1 %v6666_v38 }
 0x660   :  { %5312 = vmatprep.subr.mxu0 %v5665_v15  ;;  %5347 = vmatprep.subr.mxu1 %v5665_v15 }
 0x661   :  { %5313 = vmatpush3.msra.mxu0 %v6672_v61  ;;  %5348 = vmatpush3.msra.mxu1 %v6672_v61 }
 0x662   :  { %5350 = vmatmul.mubr.f32.vlgmr.msra.gmra.mxu1 %v3686_v29  ;;  %5315 = vmatmul.mubr.f32.vlgmr.msra.gmra.mxu0 %v2971_v30  ;;  %v3735_v29 = vld [vmem:[%s7040_s10 + $0x1f0] sm:$0xff] }
 0x663   :  { %5352 = vmatprep.subr.mxu0 %v5665_v15  ;;  %5387 = vmatprep.subr.mxu1 %v5665_v15 }
 0x664   :  { %5353 = vmatpush3.msra.mxu0 %v3702_v32  ;;  %5388 = vmatpush3.msra.mxu1 %v3057_v37  ;;  %v3734_v32 = vld [vmem:[%s7040_s10 + $0x1e8] sm:$0xff]  ;;  %v3733_v37 = vld [vmem:[%s7040_s10 + $0x1e0] sm:$0xff] }
 0x665   :  { %5354 = vmatprep.subr.mxu0 %v5665_v15  ;;  %5389 = vmatprep.subr.mxu1 %v5665_v15 }
 0x666   :  { %5355 = vmatpush3.msra.mxu0 %v3701_v54  ;;  %5390 = vmatpush3.msra.mxu1 %v3056_v62  ;;  %v3732_v54 = vld [vmem:[%s7040_s10 + $0x1d8] sm:$0xff]  ;;  %v3731_v62 = vld [vmem:[%s7040_s10 + $0x1d0] sm:$0xff] }
 0x667   :  { %5356 = vmatprep.subr.mxu0 %v5665_v15  ;;  %5391 = vmatprep.subr.mxu1 %v5665_v15 }
 0x668   :  { %5357 = vmatpush3.msra.mxu0 %v3700_v50  ;;  %5392 = vmatpush3.msra.mxu1 %v3055_v14  ;;  %v3730_v50 = vld [vmem:[%s7040_s10 + $0x1c8] sm:$0xff]  ;;  %v3729_v14 = vld [vmem:[%s7040_s10 + $0x1c0] sm:$0xff] }
 0x669   :  { %5358 = vmatprep.subr.mxu0 %v5665_v15  ;;  %5393 = vmatprep.subr.mxu1 %v5665_v15 }
 0x66a   :  { %5359 = vmatpush3.msra.mxu0 %v3699_v8  ;;  %5394 = vmatpush3.msra.mxu1 %v3054_v42  ;;  %v3728_v8 = vld [vmem:[%s7040_s10 + $0x1b8] sm:$0xff]  ;;  %v3727_v42 = vld [vmem:[%s7040_s10 + $0x1b0] sm:$0xff] }
 0x66b   :  { %5360 = vmatprep.subr.mxu0 %v5665_v15  ;;  %5395 = vmatprep.subr.mxu1 %v5665_v15 }
 0x66c   :  { %5361 = vmatpush3.msra.mxu0 %v3698_v40  ;;  %5396 = vmatpush3.msra.mxu1 %v3053_v19  ;;  %v3726_v40 = vld [vmem:[%s7040_s10 + $0x1a8] sm:$0xff]  ;;  %v3725_v19 = vld [vmem:[%s7040_s10 + $0x1a0] sm:$0xff] }
 0x66d   :  { %5362 = vmatprep.subr.mxu0 %v5665_v15  ;;  %5397 = vmatprep.subr.mxu1 %v5665_v15 }
 0x66e   :  { %5363 = vmatpush3.msra.mxu0 %v3697_v60  ;;  %5398 = vmatpush3.msra.mxu1 %v3052_v36  ;;  %v3724_v60 = vld [vmem:[%s7040_s10 + $0x198] sm:$0xff]  ;;  %v3723_v36 = vld [vmem:[%s7040_s10 + $0x190] sm:$0xff] }
 0x66f   :  { %5364 = vmatprep.subr.mxu0 %v5665_v15  ;;  %5399 = vmatprep.subr.mxu1 %v5665_v15 }
 0x670   :  { %5365 = vmatpush3.msra.mxu0 %v3696_v33  ;;  %5400 = vmatpush3.msra.mxu1 %v3051_v27  ;;  %v3722_v33 = vld [vmem:[%s7040_s10 + $0x188] sm:$0xff]  ;;  %v3721_v27 = vld [vmem:[%s7040_s10 + $0x180] sm:$0xff] }
 0x671   :  { %5366 = vmatprep.subr.mxu0 %v5665_v15  ;;  %5401 = vmatprep.subr.mxu1 %v5665_v15 }
 0x672   :  { %5367 = vmatpush3.msra.mxu0 %v3695_v11  ;;  %5402 = vmatpush3.msra.mxu1 %v3050_v17 }
 0x673   :  { %5368 = vmatprep.subr.mxu0 %v5665_v15  ;;  %5403 = vmatprep.subr.mxu1 %v5665_v15 }
 0x674   :  { %5369 = vmatpush3.msra.mxu0 %v3694_v26  ;;  %5404 = vmatpush3.msra.mxu1 %v3049_v41 }
 0x675   :  { %5370 = vmatprep.subr.mxu0 %v5665_v15  ;;  %5405 = vmatprep.subr.mxu1 %v5665_v15 }
 0x676   :  { %5371 = vmatpush3.msra.mxu0 %v3693_v45  ;;  %5406 = vmatpush3.msra.mxu1 %v3048_v57 }
 0x677   :  { %5372 = vmatprep.subr.mxu0 %v5665_v15  ;;  %5407 = vmatprep.subr.mxu1 %v5665_v15 }
 0x678   :  { %5373 = vmatpush3.msra.mxu0 %v3692_v1  ;;  %5408 = vmatpush3.msra.mxu1 %v3047_v21  ;;  %v3737_v1 = vld [vmem:[%s7041_s11] ss:$0 sm:$0xff] }
 0x679   :  { %5374 = vmatprep.subr.mxu0 %v5665_v15  ;;  %5409 = vmatprep.subr.mxu1 %v5665_v15 }
 0x67a   :  { %5375 = vmatpush3.msra.mxu0 %v3691_v35  ;;  %5410 = vmatpush3.msra.mxu1 %v3046_v24 }
 0x67b   :  { %5376 = vmatprep.subr.mxu0 %v5665_v15  ;;  %5411 = vmatprep.subr.mxu1 %v5665_v15 }
 0x67c   :  { %5377 = vmatpush3.msra.mxu0 %v3690_v22  ;;  %5412 = vmatpush3.msra.mxu1 %v3045_v51 }
 0x67d   :  { %5378 = vmatprep.subr.mxu0 %v5665_v15  ;;  %5413 = vmatprep.subr.mxu1 %v5665_v15 }
 0x67e   :  { %5379 = vmatpush3.msra.mxu0 %v3689_v46  ;;  %5414 = vmatpush3.msra.mxu1 %v3044_v20 }
 0x67f   :  { %5380 = vmatprep.subr.mxu0 %v5665_v15  ;;  %5415 = vmatprep.subr.mxu1 %v5665_v15 }
 0x680   :  { %5381 = vmatpush3.msra.mxu0 %v3688_v44  ;;  %5416 = vmatpush3.msra.mxu1 %v3043_v23 }
 0x681   :  { %5382 = vmatprep.subr.mxu0 %v5665_v15  ;;  %5384 = vmatprep.mubr.msk.f32.mxu0 %vm5666_vm0, %v5665_v15 }
 0x682   :  { %5383 = vmatpush3.msra.mxu0 %v3687_v28  ;;  %5417 = vmatprep.subr.mxu1 %v5665_v15 }
 0x683   :  { %5422 = vmatprep.subr.mxu0 %v5665_v15  ;;  %5419 = vmatprep.mubr.msk.f32.mxu1 %vm5666_vm0, %v5665_v15 }
 0x684   :  { %5418 = vmatpush3.msra.mxu1 %v3042_v58 }
 0x685   :  { %5457 = vmatprep.subr.mxu1 %v5665_v15 }
 0x722   :  { %v3126_v18 = vpop.f32.mrf.mxu1  ;;  %v3038_v63 = vpop.f32.mrf.mxu0 }
 0x723   :  { %5385 = vmatmul.mubr.f32.vlgmr.msra.gmra.mxu0 %v3126_v18  ;;  %5420 = vmatmul.mubr.f32.vlgmr.msra.gmra.mxu1 %v3038_v63 }
 0x724   :  { %5423 = vmatpush3.msra.mxu0 %v6555_v34  ;;  %v5351_v6 = vpop.f32.mrf.mxu1  ;;  %5454 = vmatprep.mubr.msk.f32.mxu0 %vm5666_vm0, %v5665_v15  ;;  %v5316_v47 = vpop.f32.mrf.mxu0 }
 0x725   :  { %5424 = vmatprep.subr.mxu0 %v5665_v15  ;;  %5489 = vmatprep.mubr.msk.f32.mxu1 %vm5666_vm0, %v5665_v15 }
 0x726   :  { %5425 = vmatpush3.msra.mxu0 %v6560_v7 }
 0x727   :  { %5426 = vmatprep.subr.mxu0 %v5665_v15 }
 0x728   :  { %5427 = vmatpush3.msra.mxu0 %v6568_v5 }
 0x729   :  { %5428 = vmatprep.subr.mxu0 %v5665_v15 }
 0x72a   :  { %5429 = vmatpush3.msra.mxu0 %v6576_v49 }
 0x72b   :  { %5430 = vmatprep.subr.mxu0 %v5665_v15 }
 0x72c   :  { %5431 = vmatpush3.msra.mxu0 %v6585_v31 }
 0x72d   :  { %5432 = vmatprep.subr.mxu0 %v5665_v15 }
 0x72e   :  { %5433 = vmatpush3.msra.mxu0 %v6592_v10 }
 0x72f   :  { %5434 = vmatprep.subr.mxu0 %v5665_v15 }
 0x730   :  { %5435 = vmatpush3.msra.mxu0 %v6601_v39 }
 0x731   :  { %5436 = vmatprep.subr.mxu0 %v5665_v15 }
 0x732   :  { %5437 = vmatpush3.msra.mxu0 %v6610_v9 }
 0x733   :  { %5438 = vmatprep.subr.mxu0 %v5665_v15 }
 0x734   :  { %5439 = vmatpush3.msra.mxu0 %v6619_v55 }
 0x735   :  { %5440 = vmatprep.subr.mxu0 %v5665_v15 }
 0x736   :  { %5441 = vmatpush3.msra.mxu0 %v6628_v2 }
 0x737   :  { %5442 = vmatprep.subr.mxu0 %v5665_v15 }
 0x738   :  { %5443 = vmatpush3.msra.mxu0 %v6637_v0 }
 0x739   :  { %5444 = vmatprep.subr.mxu0 %v5665_v15 }
 0x73a   :  { %5445 = vmatpush3.msra.mxu0 %v6646_v12 }
 0x73b   :  { %5446 = vmatprep.subr.mxu0 %v5665_v15 }
 0x73c   :  { %5447 = vmatpush3.msra.mxu0 %v6653_v13 }
 0x73d   :  { %5448 = vmatprep.subr.mxu0 %v5665_v15 }
 0x73e   :  { %5449 = vmatpush3.msra.mxu0 %v6660_v16 }
 0x73f   :  { %5450 = vmatprep.subr.mxu0 %v5665_v15 }
 0x740   :  { %5451 = vmatpush3.msra.mxu0 %v6666_v38 }
 0x741   :  { %5452 = vmatprep.subr.mxu0 %v5665_v15 }
 0x742   :  { %5453 = vmatpush3.msra.mxu0 %v6672_v61 }
 0x743   :  { %5455 = vmatmul.mubr.f32.vlgmr.msra.gmra.mxu0 %v3703_v25  ;;  %5492 = vmatprep.subr.mxu0 %v5665_v15 }
 0x744   :  { %5493 = vmatpush3.msra.mxu0 %v6555_v34  ;;  %5524 = vmatprep.mubr.msk.f32.mxu0 %vm5666_vm0, %v5665_v15  ;;  %v3720_v34 = vld [vmem:[%s7039_s9 + $0x6] sm:$0x3] }
 0x745   :  { %5494 = vmatprep.subr.mxu0 %v5665_v15 }
 0x746   :  { %5495 = vmatpush3.msra.mxu0 %v6560_v7  ;;  %v3719_v7 = vld [vmem:[%s7040_s10 + $0x178] sm:$0xff] }
 0x747   :  { %5496 = vmatprep.subr.mxu0 %v5665_v15  ;;  %5458 = vmatpush3.msra.mxu1 %v3719_v7 }
 0x748   :  { %5497 = vmatpush3.msra.mxu0 %v6568_v5  ;;  %v3718_v5 = vld [vmem:[%s7040_s10 + $0x170] sm:$0xff]  ;;  %5459 = vmatprep.subr.mxu1 %v5665_v15 }
 0x749   :  { %5498 = vmatprep.subr.mxu0 %v5665_v15  ;;  %5460 = vmatpush3.msra.mxu1 %v3718_v5 }
 0x74a   :  { %5499 = vmatpush3.msra.mxu0 %v6576_v49  ;;  %v3717_v49 = vld [vmem:[%s7040_s10 + $0x168] sm:$0xff]  ;;  %5461 = vmatprep.subr.mxu1 %v5665_v15 }
 0x74b   :  { %5500 = vmatprep.subr.mxu0 %v5665_v15  ;;  %5462 = vmatpush3.msra.mxu1 %v3717_v49 }
 0x74c   :  { %5501 = vmatpush3.msra.mxu0 %v6585_v31  ;;  %v3716_v31 = vld [vmem:[%s7040_s10 + $0x160] sm:$0xff]  ;;  %5463 = vmatprep.subr.mxu1 %v5665_v15 }
 0x74d   :  { %5502 = vmatprep.subr.mxu0 %v5665_v15  ;;  %5464 = vmatpush3.msra.mxu1 %v3716_v31 }
 0x74e   :  { %5503 = vmatpush3.msra.mxu0 %v6592_v10  ;;  %v3715_v10 = vld [vmem:[%s7040_s10 + $0x158] sm:$0xff]  ;;  %5465 = vmatprep.subr.mxu1 %v5665_v15 }
 0x74f   :  { %5504 = vmatprep.subr.mxu0 %v5665_v15  ;;  %5466 = vmatpush3.msra.mxu1 %v3715_v10 }
 0x750   :  { %5505 = vmatpush3.msra.mxu0 %v6601_v39  ;;  %v3714_v39 = vld [vmem:[%s7040_s10 + $0x150] sm:$0xff]  ;;  %5467 = vmatprep.subr.mxu1 %v5665_v15 }
 0x751   :  { %5506 = vmatprep.subr.mxu0 %v5665_v15  ;;  %5468 = vmatpush3.msra.mxu1 %v3714_v39 }
 0x752   :  { %5507 = vmatpush3.msra.mxu0 %v6610_v9  ;;  %v3713_v9 = vld [vmem:[%s7040_s10 + $0x148] sm:$0xff]  ;;  %5469 = vmatprep.subr.mxu1 %v5665_v15 }
 0x753   :  { %5508 = vmatprep.subr.mxu0 %v5665_v15  ;;  %5470 = vmatpush3.msra.mxu1 %v3713_v9 }
 0x754   :  { %5509 = vmatpush3.msra.mxu0 %v6619_v55  ;;  %v3712_v55 = vld [vmem:[%s7040_s10 + $0x140] sm:$0xff]  ;;  %5471 = vmatprep.subr.mxu1 %v5665_v15 }
 0x755   :  { %5510 = vmatprep.subr.mxu0 %v5665_v15  ;;  %5472 = vmatpush3.msra.mxu1 %v3712_v55 }
 0x756   :  { %5511 = vmatpush3.msra.mxu0 %v6628_v2  ;;  %5473 = vmatprep.subr.mxu1 %v5665_v15  ;;  %v3709_v2 = vld [vmem:[%s7040_s10 + $0x128] sm:$0xff] }
 0x757   :  { %5512 = vmatprep.subr.mxu0 %v5665_v15  ;;  %5474 = vmatpush3.msra.mxu1 %v3711_v48 }
 0x758   :  { %5513 = vmatpush3.msra.mxu0 %v6637_v0  ;;  %5475 = vmatprep.subr.mxu1 %v5665_v15  ;;  %v3706_v0 = vld [vmem:[%s7040_s10 + $0x110] sm:$0xff] }
 0x759   :  { %5514 = vmatprep.subr.mxu0 %v5665_v15  ;;  %5476 = vmatpush3.msra.mxu1 %v3710_v4 }
 0x75a   :  { %5515 = vmatpush3.msra.mxu0 %v6646_v12  ;;  %5477 = vmatprep.subr.mxu1 %v5665_v15 }
 0x75b   :  { %5516 = vmatprep.subr.mxu0 %v5665_v15  ;;  %5478 = vmatpush3.msra.mxu1 %v3709_v2 }
 0x75c   :  { %5517 = vmatpush3.msra.mxu0 %v6653_v13  ;;  %5479 = vmatprep.subr.mxu1 %v5665_v15 }
 0x75d   :  { %5518 = vmatprep.subr.mxu0 %v5665_v15  ;;  %5480 = vmatpush3.msra.mxu1 %v3708_v53 }
 0x75e   :  { %5519 = vmatpush3.msra.mxu0 %v6660_v16  ;;  %5481 = vmatprep.subr.mxu1 %v5665_v15 }
 0x75f   :  { %5520 = vmatprep.subr.mxu0 %v5665_v15  ;;  %5482 = vmatpush3.msra.mxu1 %v3707_v3 }
 0x760   :  { %5521 = vmatpush3.msra.mxu0 %v6666_v38  ;;  %5483 = vmatprep.subr.mxu1 %v5665_v15  ;;  %v3736_v38 = vld [vmem:[%s7040_s10 + $0x1f8] sm:$0xff]  ;;  %s5633_s10 = scalar_lea.vmem %s3625_s19, 32 }
 0x761   :  { %5522 = vmatprep.subr.mxu0 %v5665_v15  ;;  %5484 = vmatpush3.msra.mxu1 %v3706_v0  ;;  %p5634_p1 = scmp.ne.s32.totalorder %s3625_s19, %s5633_s10  ;;  %p5639_p3 = scmp.lt.s32.totalorder %s5633_s10, %s5633_s10 }
 0x762   :  { %5523 = vmatpush3.msra.mxu0 %v6672_v61  ;;  %5485 = vmatprep.subr.mxu1 %v5665_v15 }
 0x763   :  { %5525 = vmatmul.mubr.f32.vlgmr.msra.gmra.mxu0 %v3720_v34  ;;  %5486 = vmatpush3.msra.mxu1 %v3705_v52  ;;  %p5640_p4 = por %p5639_p3, %p5638_p2 }
 0x764   :  { %5487 = vmatprep.subr.mxu1 %v5665_v15 }
 0x765   :  { %5488 = vmatpush3.msra.mxu1 %v3704_v43  ;;  %p5641_p5 = pnand %p5640_p4, %p5634_p1 }
 0x766   :  { %5527 = vmatprep.subr.mxu1 %v5665_v15 }
 0x7e3   :  { %v3213_v12 = vpop.f32.mrf.mxu0  ;;  %v3283_v56 = vpop.f32.mrf.mxu1 }
 0x7e4   :  { %v3284_v13 = vadd.f32 %v3283_v56, %v3213_v12 }
 0x7e5   :  { %v5386_v59 = vpop.f32.mrf.mxu0  ;;  %v5421_v16 = vpop.f32.mrf.mxu1 }
 0x803   :  { %v3355_v61 = vpop.f32.mrf.mxu0 }
 0x804   :  { %5490 = vmatmul.mubr.f32.vlgmr.msra.gmra.mxu1 %v3355_v61 }
 0x805   :  { %v5456_v30 = vpop.f32.mrf.mxu0  ;;  %5528 = vmatpush3.msra.mxu1 %v3736_v38  ;;  %5559 = vmatprep.mubr.msk.f32.mxu1 %vm5666_vm0, %v5665_v15 }
 0x806   :  { %5529 = vmatprep.subr.mxu1 %v5665_v15 }
 0x807   :  { %5530 = vmatpush3.msra.mxu1 %v3735_v29 }
 0x808   :  { %5531 = vmatprep.subr.mxu1 %v5665_v15 }
 0x809   :  { %5532 = vmatpush3.msra.mxu1 %v3734_v32 }
 0x80a   :  { %5533 = vmatprep.subr.mxu1 %v5665_v15 }
 0x80b   :  { %5534 = vmatpush3.msra.mxu1 %v3733_v37 }
 0x80c   :  { %5535 = vmatprep.subr.mxu1 %v5665_v15 }
 0x80d   :  { %5536 = vmatpush3.msra.mxu1 %v3732_v54 }
 0x80e   :  { %5537 = vmatprep.subr.mxu1 %v5665_v15 }
 0x80f   :  { %5538 = vmatpush3.msra.mxu1 %v3731_v62 }
 0x810   :  { %5539 = vmatprep.subr.mxu1 %v5665_v15 }
 0x811   :  { %5540 = vmatpush3.msra.mxu1 %v3730_v50 }
 0x812   :  { %5541 = vmatprep.subr.mxu1 %v5665_v15 }
 0x813   :  { %5542 = vmatpush3.msra.mxu1 %v3729_v14 }
 0x814   :  { %5543 = vmatprep.subr.mxu1 %v5665_v15 }
 0x815   :  { %5544 = vmatpush3.msra.mxu1 %v3728_v8 }
 0x816   :  { %5545 = vmatprep.subr.mxu1 %v5665_v15 }
 0x817   :  { %5546 = vmatpush3.msra.mxu1 %v3727_v42 }
 0x818   :  { %5547 = vmatprep.subr.mxu1 %v5665_v15 }
 0x819   :  { %5548 = vmatpush3.msra.mxu1 %v3726_v40 }
 0x81a   :  { %5549 = vmatprep.subr.mxu1 %v5665_v15 }
 0x81b   :  { %5550 = vmatpush3.msra.mxu1 %v3725_v19 }
 0x81c   :  { %5551 = vmatprep.subr.mxu1 %v5665_v15 }
 0x81d   :  { %5552 = vmatpush3.msra.mxu1 %v3724_v60 }
 0x81e   :  { %5553 = vmatprep.subr.mxu1 %v5665_v15 }
 0x81f   :  { %5554 = vmatpush3.msra.mxu1 %v3723_v36 }
 0x820   :  { %5555 = vmatprep.subr.mxu1 %v5665_v15 }
 0x821   :  { %5556 = vmatpush3.msra.mxu1 %v3722_v33 }
 0x822   :  { %5557 = vmatprep.subr.mxu1 %v5665_v15 }
 0x823   :  { %v3515_v11 = vpop.f32.mrf.mxu0  ;;  %5558 = vmatpush3.msra.mxu1 %v3721_v27 }
 0x824   :  { %5560 = vmatmul.mubr.f32.vlgmr.msra.gmra.mxu1 %v3515_v11 }
 0x825   :  { %v5526_v17 = vpop.f32.mrf.mxu0 }
 0x8c4   :  { %v3442_v26 = vpop.f32.mrf.mxu1 }
 0x8c5   :  { %v3446_v45 = vadd.f32 %v3442_v26, %v3284_v13 }
 0x8c6   :  { %v5491_v41 = vpop.f32.mrf.mxu1 }
 0x8e4   :  { %v3602_v57 = vpop.f32.mrf.mxu1 }
 0x8e5   :  { %v3606_v21 = vadd.f32 %v3602_v57, %v3446_v45 }
 0x8e6   :  { %v5561_v35 = vpop.f32.mrf.mxu1 }
 0x8e7   :  { %v3614_v24 = vadd.f32 %v3737_v1, %v3606_v21 }
 0x8e9   :  { %v3615_v22 = vmax.f32 %v3614_v24, 0.0 }
 0x8eb   :  { %3617 = vst.msk [vmem:[#allocation8] sm:$0x3] %vm3616_vm1, %v3615_v22 }
 0x8ec   :  { %5644 = shalt.err (!%p5641_p5)
}
 0x8ed   :  { %3627 = dma.vmem_to_hbm [thread:$0]  %s3625_s19, 32, %s7042_s12, [#allocation4]  }
 0x8ee   :  { %5657 = dma.done.wait [#allocation4], 32  }
 0x8ef   :  { %5658 = vsyncadd [#allocation4], 4294967264 }
 0x8f0   :  { %3631 = vsyncpa [#allocation3], 1 }
 0x8f1   :  { %3632 = vsyncpa [#allocation6], 1 }
 0x8f2   :  { %3633 = vsyncpa [#allocation4], 1 }

</bundles_post_ra>
